<compile_context>
chip_gen: v5e
topology: v5e:2x2
jax: 0.10.0
libtpu: 0.0.40
codegen_flags: <defaults>
</compile_context>

<pallas_src>
import jax
import jax.numpy as jnp
import numpy as np
from jax.experimental import pallas as pl
from jax.experimental.pallas import tpu as pltpu


# ----------------------------- small helpers ------------------------------

def _round_up(n, m):
    return ((n + m - 1) // m) * m


def _ceil_div(a, b):
    return -(-a // b)


def _pad_gate_cols(w, h, hp):
    """(in, 4H) -> (in, 4Hp): zero-pad each of the [i,f,g,o] blocks to Hp.

    Zero padding per gate block keeps the padded state exactly 0:
    i=f=o=sigmoid(0)=0.5, g=tanh(0)=0 and c starts at 0, so c_new = 0.5*c = 0
    and h_new = 0.5*tanh(0) = 0 forever.
    """
    if hp == h:
        return w
    rows = w.shape[0]
    w4 = w.reshape(rows, 4, h)
    w4 = jnp.pad(w4, ((0, 0), (0, 0), (0, hp - h)))
    return w4.reshape(rows, 4 * hp)


def _pad_rows(w, h, hp):
    if hp == h:
        return w
    return jnp.pad(w, ((0, hp - h), (0, 0)))


def _resident_spec(shape):
    """BlockSpec for a grid-invariant operand: full array, single-buffered."""
    zeros = (0,) * len(shape)
    return pl.BlockSpec(shape, lambda b, t: zeros, pipeline_mode=pl.Buffered(1))


# ------------------------------ Pallas kernel ------------------------------

def _make_lstm2_kernel(ts, bt, d, hp, mm_dtype, unroll):
    G = 4 * hp

    def kernel(x_ref, wih0_ref, whh0_ref, b0_ref, w1_ref, b1_ref,
               out_ref, h0_ref, c0_ref, h1_ref, c1_ref, g0_ref):
        # Zero initial (h, c) at the first time block of every batch shard
        # (== SequentialContext.init_hidden returning zeros).
        @pl.when(pl.program_id(1) == 0)
        def _():
            h0_ref[...] = jnp.zeros_like(h0_ref)
            c0_ref[...] = jnp.zeros_like(c0_ref)
            h1_ref[...] = jnp.zeros_like(h1_ref)
            c1_ref[...] = jnp.zeros_like(c1_ref)

        # ---- hoisted layer-0 input projection over the whole time block ----
        # No recurrent dependence: one big (TS*Bt, D) x (D, 4Hp) MXU matmul,
        # stored as a (bf16) slab and sliced per step inside the serial loop.
        x = x_ref[...].reshape(ts * bt, d)
        g0_all = (jnp.dot(x, wih0_ref[...], preferred_element_type=jnp.float32)
                  .reshape(ts, bt, G) + b0_ref[...])
        g0_ref[...] = g0_all.astype(g0_ref.dtype)

        # Hoisted out of the serial loop: weight loads and bias broadcast.
        whh0 = whh0_ref[...]
        w1 = w1_ref[...]
        b1 = jnp.broadcast_to(b1_ref[...], (bt, G))

        def sigmoid(v):
            # One EUP push (tanh) instead of jax.nn.sigmoid's exp + recip.
            return 0.5 * jnp.tanh(0.5 * v) + 0.5

        def gates_to_hc(g, c):
            # PyTorch gate order [i, f, g, o]; slices are 128-lane aligned
            # because hp is a multiple of 128.
            i = sigmoid(g[:, 0 * hp:1 * hp])
            f = sigmoid(g[:, 1 * hp:2 * hp])
            gg = jnp.tanh(g[:, 2 * hp:3 * hp])
            o = sigmoid(g[:, 3 * hp:4 * hp])
            c_new = f * c + i * gg
            return o * jnp.tanh(c_new), c_new

        def step(t, carry):
            h0, c0, h1, c1 = carry
            # layer 0: only the recurrent matmul remains on the serial path
            g0 = (g0_ref[t].astype(jnp.float32)
                  + jnp.dot(h0.astype(mm_dtype), whh0,
                            preferred_element_type=jnp.float32))
            h0, c0 = gates_to_hc(g0, c0)
            # layer 1 (dropout=0): single fused matmul over concat([h0, h1])
            h01 = jnp.concatenate([h0.astype(mm_dtype), h1.astype(mm_dtype)],
                                  axis=-1)
            g1 = jnp.dot(h01, w1, preferred_element_type=jnp.float32) + b1
            h1, c1 = gates_to_hc(g1, c1)
            out_ref[t] = h1.astype(out_ref.dtype)   # lane-dense (Bt, Hp) store
            return h0, c0, h1, c1

        carry = (h0_ref[...], c0_ref[...], h1_ref[...], c1_ref[...])
        h0, c0, h1, c1 = jax.lax.fori_loop(0, ts, step, carry, unroll=unroll)
        h0_ref[...] = h0
        c0_ref[...] = c0
        h1_ref[...] = h1
        c1_ref[...] = c1

    return kernel


# ------------------------------- wrapper -----------------------------------

def sequential_context_forward(inputs, params, *, time_block=None,
                               batch_block=None, mm_dtype=jnp.bfloat16,
                               out_dtype=jnp.float32, unroll=None):
    """inputs: (T, B, D) float32; params: dict of LSTM weights (see init).

    Returns the top LSTM layer's output sequence: (T, B, H) in out_dtype.
    """
    T, B, D = inputs.shape
    H = params["whh0"].shape[0]
    Hp = _round_up(H, 128)                 # lane-aligned hidden size
    G = 4 * Hp

    # ---- batch blocking: never divisor-shrink Bt; pad B instead ------------
    bt_cap = _round_up(batch_block, 8) if batch_block else 256
    n_bshards = max(1, _ceil_div(B, bt_cap))
    Bt = _round_up(_ceil_div(B, n_bshards), 8)
    Bp = Bt * n_bshards

    # ---- VMEM budget -> time block size (generation-gated via get_tpu_info)
    try:
        phys_vmem = int(pltpu.get_tpu_info().vmem_capacity_bytes)
    except Exception:
        phys_vmem = 64 * 1024 * 1024       # conservative fallback (v7x per-TC)
    vmem_limit = min(phys_vmem - (4 << 20), 120 << 20)
    vmem_limit = max(vmem_limit, 32 << 20)
    vmem_budget = int(vmem_limit * 0.85)   # headroom for compiler scratch

    mm_bytes = jnp.dtype(mm_dtype).itemsize
    out_bytes = jnp.dtype(out_dtype).itemsize
    fixed = ((D + 3 * Hp) * G * mm_bytes   # resident single-buffered weights
             + 2 * G * 4                   # biases (f32)
             + 4 * Bt * Hp * 4)            # h/c state of both layers (f32)
    per_ts = (Bt * G * mm_bytes            # layer-0 gate slab
              + 2 * Bt * D * mm_bytes      # double-buffered input block
              + 2 * Bt * Hp * out_bytes)   # double-buffered output block
    ts_cap = max(1, (vmem_budget - fixed) // per_ts)
    ts_cap = min(ts_cap, time_block if time_block else 128)
    n_tblocks = max(1, _ceil_div(T, ts_cap))
    TS = _ceil_div(T, n_tblocks)
    Tp = TS * n_tblocks

    # ---- unroll vs. vreg pressure of the four carried (Bt, Hp) f32 states --
    if unroll is None:
        state_vregs = max(1, 4 * Bt * Hp // 1024)
        unroll = 8 if state_vregs <= 16 else (4 if state_vregs <= 48 else 2)
    unroll = max(1, min(unroll, TS))

    # ---- weights: pad each [i,f,g,o] gate block to Hp, fuse layer-1 --------
    wih0 = _pad_gate_cols(params["wih0"], H, Hp).astype(mm_dtype)
    whh0 = _pad_rows(_pad_gate_cols(params["whh0"], H, Hp), H, Hp).astype(mm_dtype)
    b0 = _pad_gate_cols(params["b0"], H, Hp).astype(jnp.float32)
    w1 = jnp.concatenate(
        [_pad_rows(_pad_gate_cols(params["wih1"], H, Hp), H, Hp),
         _pad_rows(_pad_gate_cols(params["whh1"], H, Hp), H, Hp)],
        axis=0).astype(mm_dtype)           # (2Hp, 4Hp): one fused matmul
    b1 = _pad_gate_cols(params["b1"], H, Hp).astype(jnp.float32)
    assert wih0.shape == (D, G) and whh0.shape == (Hp, G)
    assert w1.shape == (2 * Hp, G) and b0.shape == (1, G) and b1.shape == (1, G)

    # ---- inputs: bf16 + zero-pad T/B up to the block sizes -----------------
    x = inputs.astype(mm_dtype)
    if Tp != T or Bp != B:
        x = jnp.pad(x, ((0, Tp - T), (0, Bp - B), (0, 0)))

    kernel = _make_lstm2_kernel(TS, Bt, D, Hp, mm_dtype, unroll)

    grid_spec = pltpu.PrefetchScalarGridSpec(
        num_scalar_prefetch=0,
        grid=(Bp // Bt, Tp // TS),         # (batch shards, time blocks)
        in_specs=[
            # a block of TS time steps per grid iteration (double-buffered)
            pl.BlockSpec((TS, Bt, D), lambda b, t: (t, b, 0)),
            # grid-invariant weights / biases: resident, single-buffered
            _resident_spec((D, G)),
            _resident_spec((Hp, G)),
            _resident_spec((1, G)),
            _resident_spec((2 * Hp, G)),
            _resident_spec((1, G)),
        ],
        out_specs=pl.BlockSpec((TS, Bt, Hp), lambda b, t: (t, b, 0)),
        scratch_shapes=[
            pltpu.VMEM((Bt, Hp), jnp.float32),   # h layer 0
            pltpu.VMEM((Bt, Hp), jnp.float32),   # c layer 0
            pltpu.VMEM((Bt, Hp), jnp.float32),   # h layer 1
            pltpu.VMEM((Bt, Hp), jnp.float32),   # c layer 1
            pltpu.VMEM((TS, Bt, G), mm_dtype),   # precomputed layer-0 gates
        ],
    )

    out = pl.pallas_call(
        kernel,
        out_shape=jax.ShapeDtypeStruct((Tp, Bp, Hp), out_dtype),
        grid_spec=grid_spec,
        compiler_params=pltpu.CompilerParams(
            # batch shards are independent (v7x's 2nd TC picks them up when
            # B is large); the time axis is a true recurrence -> sequential.
            dimension_semantics=("parallel", "arbitrary"),
            vmem_limit_bytes=int(vmem_limit)),
    )(x, wih0, whh0, b0, w1, b1)

    if Tp != T or Bp != B or Hp != H:
        # One fused slice removes the T/B/H padding.  In production choose H
        # as a multiple of 128 (and align T, B) so this is a no-op.
        out = out[:T, :B, :H]
    return out


# ----------------------- params + pure-JAX reference -----------------------

def init_lstm_params(key, input_size, hidden_size):
    """Deterministic init matching nn.LSTM parameter shapes.

    PyTorch stores weight_ih_l{k}: (4H, in), weight_hh_l{k}: (4H, H),
    bias_ih/bias_hh: (4H,).  We pre-transpose weights to (in, 4H) and fold the
    two biases together (b_ih + b_hh) into a single (1, 4H) row.
    """
    H, D = hidden_size, input_size
    k = 1.0 / np.sqrt(H)
    keys = jax.random.split(key, 8)

    def u(kk, shape):
        return jax.random.uniform(kk, shape, jnp.float32, minval=-k, maxval=k)

    w_ih0 = u(keys[0], (4 * H, D))
    w_hh0 = u(keys[1], (4 * H, H))
    b_ih0 = u(keys[2], (4 * H,))
    b_hh0 = u(keys[3], (4 * H,))
    w_ih1 = u(keys[4], (4 * H, H))
    w_hh1 = u(keys[5], (4 * H, H))
    b_ih1 = u(keys[6], (4 * H,))
    b_hh1 = u(keys[7], (4 * H,))

    return {
        "wih0": w_ih0.T, "whh0": w_hh0.T, "b0": (b_ih0 + b_hh0)[None, :],
        "wih1": w_ih1.T, "whh1": w_hh1.T, "b1": (b_ih1 + b_hh1)[None, :],
    }


def lstm2_reference(inputs, params):
    """Pure-JAX f32 reference (lax.scan) with identical module semantics."""
    H = params["whh0"].shape[0]

    def cell(x, h, c, wih, whh, b):
        gates = x @ wih + h @ whh + b
        i = jax.nn.sigmoid(gates[:, 0 * H:1 * H])
        f = jax.nn.sigmoid(gates[:, 1 * H:2 * H])
        g = jnp.tanh(gates[:, 2 * H:3 * H])
        o = jax.nn.sigmoid(gates[:, 3 * H:4 * H])
        c_new = f * c + i * g
        h_new = o * jnp.tanh(c_new)
        return h_new, c_new

    B = inputs.shape[1]
    zeros = jnp.zeros((B, H), jnp.float32)

    def step(carry, x_t):
        h0, c0, h1, c1 = carry
        h0, c0 = cell(x_t, h0, c0, params["wih0"], params["whh0"], params["b0"])
        h1, c1 = cell(h0, h1, c1, params["wih1"], params["whh1"], params["b1"])
        return (h0, c0, h1, c1), h1

    _, out = jax.lax.scan(step, (zeros, zeros, zeros, zeros), inputs)
    return out


if __name__ == "__main__":
    # Small shapes consistent with the module's forward: (seq, batch, input)
    T, B, D, H = 8, 8, 16, 32

    key = jax.random.PRNGKey(0)
    k_x, k_p = jax.random.split(key)
    inputs = jax.random.normal(k_x, (T, B, D), jnp.float32)
    params = init_lstm_params(k_p, D, H)

    out = jax.block_until_ready(sequential_context_forward(inputs, params))
    assert out.shape == (T, B, H)

    ref = jax.block_until_ready(lstm2_reference(inputs, params))
    # bf16 matmul operands + bf16 gate slab (f32 accumulation) drift slightly
    # from the pure-f32 reference over T steps.
    np.testing.assert_allclose(np.asarray(out), np.asarray(ref),
                               rtol=4e-2, atol=4e-2)

    # Exercise the T/B/H padding paths (T=13, B=5 -> padded to 16, 8; H=32 ->
    # Hp=128) with f32 matmuls: padded rows/steps/lanes must not leak.
    T2, B2 = 13, 5
    inputs2 = jax.random.normal(jax.random.PRNGKey(1), (T2, B2, D), jnp.float32)
    out2 = jax.block_until_ready(
        sequential_context_forward(inputs2, params, mm_dtype=jnp.float32,
                                   time_block=4))
    assert out2.shape == (T2, B2, H)
    ref2 = jax.block_until_ready(lstm2_reference(inputs2, params))
    np.testing.assert_allclose(np.asarray(out2), np.asarray(ref2),
                               rtol=1e-4, atol=1e-4)

    print("KERNEL_OK")
</pallas_src>

<mosaic_0001>
module attributes {stable_mosaic.version = 11 : i64} {
  func.func @kernel(%arg0: i32, %arg1: i32, %arg2: memref<8x8x16xbf16, #tpu.memory_space<vmem>>, %arg3: memref<16x512xbf16, #tpu.memory_space<vmem>>, %arg4: memref<128x512xbf16, #tpu.memory_space<vmem>>, %arg5: memref<1x512xf32, #tpu.memory_space<vmem>>, %arg6: memref<256x512xbf16, #tpu.memory_space<vmem>>, %arg7: memref<1x512xf32, #tpu.memory_space<vmem>>, %arg8: memref<8x8x128xf32, #tpu.memory_space<vmem>>, %arg9: memref<8x128xf32, #tpu.memory_space<vmem>>, %arg10: memref<8x128xf32, #tpu.memory_space<vmem>>, %arg11: memref<8x128xf32, #tpu.memory_space<vmem>>, %arg12: memref<8x128xf32, #tpu.memory_space<vmem>>, %arg13: memref<8x8x512xbf16, #tpu.memory_space<vmem>>) attributes {dimension_semantics = [#tpu.dimension_semantics<parallel>, #tpu.dimension_semantics<arbitrary>], iteration_bounds = array<i64: 1, 1>, scalar_prefetch = 0 : i64, scratch_operands = 5 : i64, tpu.core_type = #tpu.core_type<tc>, window_params = [{transform_indices = @transform_0, window_bounds = array<i64: 8, 8, 16>}, {pipeline_mode = #tpu.pipeline_mode<synchronous>, transform_indices = @transform_1, window_bounds = array<i64: 16, 512>}, {pipeline_mode = #tpu.pipeline_mode<synchronous>, transform_indices = @transform_2, window_bounds = array<i64: 128, 512>}, {pipeline_mode = #tpu.pipeline_mode<synchronous>, transform_indices = @transform_3, window_bounds = array<i64: 1, 512>}, {pipeline_mode = #tpu.pipeline_mode<synchronous>, transform_indices = @transform_4, window_bounds = array<i64: 256, 512>}, {pipeline_mode = #tpu.pipeline_mode<synchronous>, transform_indices = @transform_5, window_bounds = array<i64: 1, 512>}, {transform_indices = @transform_6, window_bounds = array<i64: 8, 8, 128>}]} {
    %c0_i32 = arith.constant 0 : i32
    %0 = arith.cmpi eq, %arg1, %c0_i32 : i32
    %1 = arith.extui %0 : i1 to i32
    %c0_i32_0 = arith.constant 0 : i32
    %2 = arith.cmpi ne, %1, %c0_i32_0 : i32
    scf.if %2 {
      %cst_225 = arith.constant 0.000000e+00 : f32
      %651 = vector.broadcast %cst_225 : f32 to vector<8x128xf32>
      %c0_226 = arith.constant 0 : index
      %c0_227 = arith.constant 0 : index
      %652 = vector.load %arg9[%c0_226, %c0_227] : memref<8x128xf32, #tpu.memory_space<vmem>>, vector<8x128xf32>
      tpu.vector_store %arg9[%c0_226, %c0_227], %651 {strides = array<i32>} : memref<8x128xf32, #tpu.memory_space<vmem>>, vector<8x128xf32>,
      %cst_228 = arith.constant 0.000000e+00 : f32
      %653 = vector.broadcast %cst_228 : f32 to vector<8x128xf32>
      %c0_229 = arith.constant 0 : index
      %c0_230 = arith.constant 0 : index
      %654 = vector.load %arg10[%c0_229, %c0_230] : memref<8x128xf32, #tpu.memory_space<vmem>>, vector<8x128xf32>
      tpu.vector_store %arg10[%c0_229, %c0_230], %653 {strides = array<i32>} : memref<8x128xf32, #tpu.memory_space<vmem>>, vector<8x128xf32>,
      %cst_231 = arith.constant 0.000000e+00 : f32
      %655 = vector.broadcast %cst_231 : f32 to vector<8x128xf32>
      %c0_232 = arith.constant 0 : index
      %c0_233 = arith.constant 0 : index
      %656 = vector.load %arg11[%c0_232, %c0_233] : memref<8x128xf32, #tpu.memory_space<vmem>>, vector<8x128xf32>
      tpu.vector_store %arg11[%c0_232, %c0_233], %655 {strides = array<i32>} : memref<8x128xf32, #tpu.memory_space<vmem>>, vector<8x128xf32>,
      %cst_234 = arith.constant 0.000000e+00 : f32
      %657 = vector.broadcast %cst_234 : f32 to vector<8x128xf32>
      %c0_235 = arith.constant 0 : index
      %c0_236 = arith.constant 0 : index
      %658 = vector.load %arg12[%c0_235, %c0_236] : memref<8x128xf32, #tpu.memory_space<vmem>>, vector<8x128xf32>
      tpu.vector_store %arg12[%c0_235, %c0_236], %657 {strides = array<i32>} : memref<8x128xf32, #tpu.memory_space<vmem>>, vector<8x128xf32>,
    } else {
    }
    %c0 = arith.constant 0 : index
    %c0_1 = arith.constant 0 : index
    %c0_2 = arith.constant 0 : index
    %3 = vector.load %arg2[%c0, %c0_1, %c0_2] : memref<8x8x16xbf16, #tpu.memory_space<vmem>>, vector<8x8x16xbf16>
    %4 = vector.shape_cast %3 : vector<8x8x16xbf16> to vector<64x16xbf16>
    %c0_3 = arith.constant 0 : index
    %c0_4 = arith.constant 0 : index
    %5 = vector.load %arg3[%c0_3, %c0_4] : memref<16x512xbf16, #tpu.memory_space<vmem>>, vector<16x512xbf16>
    %cst = arith.constant dense<0.000000e+00> : vector<64x512xf32>
    %6 = tpu.matmul %4, %5, %cst {dimension_numbers = #tpu.dot_dimension_numbers<[1], [0], [0], [1], [0, 0, 1, 1], [], []>} : vector<64x16xbf16>, vector<16x512xbf16>, vector<64x512xf32> -> vector<64x512xf32>
    %7 = vector.shape_cast %6 : vector<64x512xf32> to vector<8x8x512xf32>
    %c0_5 = arith.constant 0 : index
    %c0_6 = arith.constant 0 : index
    %8 = vector.load %arg5[%c0_5, %c0_6] : memref<1x512xf32, #tpu.memory_space<vmem>>, vector<1x512xf32>
    %9 = vector.shape_cast %8 : vector<1x512xf32> to vector<1x1x512xf32>
    %10 = vector.broadcast %9 : vector<1x1x512xf32> to vector<8x8x512xf32>
    %11 = arith.addf %7, %10 : vector<8x8x512xf32>
    %12 = arith.truncf %11 : vector<8x8x512xf32> to vector<8x8x512xbf16>
    %c0_7 = arith.constant 0 : index
    %c0_8 = arith.constant 0 : index
    %c0_9 = arith.constant 0 : index
    %13 = vector.load %arg13[%c0_7, %c0_8, %c0_9] : memref<8x8x512xbf16, #tpu.memory_space<vmem>>, vector<8x8x512xbf16>
    tpu.vector_store %arg13[%c0_7, %c0_8, %c0_9], %12 {strides = array<i32>} : memref<8x8x512xbf16, #tpu.memory_space<vmem>>, vector<8x8x512xbf16>,
    %c0_10 = arith.constant 0 : index
    %c0_11 = arith.constant 0 : index
    %14 = vector.load %arg4[%c0_10, %c0_11] : memref<128x512xbf16, #tpu.memory_space<vmem>>, vector<128x512xbf16>
    %c0_12 = arith.constant 0 : index
    %c0_13 = arith.constant 0 : index
    %15 = vector.load %arg6[%c0_12, %c0_13] : memref<256x512xbf16, #tpu.memory_space<vmem>>, vector<256x512xbf16>
    %c0_14 = arith.constant 0 : index
    %c0_15 = arith.constant 0 : index
    %16 = vector.load %arg7[%c0_14, %c0_15] : memref<1x512xf32, #tpu.memory_space<vmem>>, vector<1x512xf32>
    %17 = vector.shape_cast %16 : vector<1x512xf32> to vector<1x512xf32>
    %18 = vector.broadcast %17 : vector<1x512xf32> to vector<8x512xf32>
    %c0_16 = arith.constant 0 : index
    %c0_17 = arith.constant 0 : index
    %19 = vector.load %arg9[%c0_16, %c0_17] : memref<8x128xf32, #tpu.memory_space<vmem>>, vector<8x128xf32>
    %c0_18 = arith.constant 0 : index
    %c0_19 = arith.constant 0 : index
    %20 = vector.load %arg10[%c0_18, %c0_19] : memref<8x128xf32, #tpu.memory_space<vmem>>, vector<8x128xf32>
    %c0_20 = arith.constant 0 : index
    %c0_21 = arith.constant 0 : index
    %21 = vector.load %arg11[%c0_20, %c0_21] : memref<8x128xf32, #tpu.memory_space<vmem>>, vector<8x128xf32>
    %c0_22 = arith.constant 0 : index
    %c0_23 = arith.constant 0 : index
    %22 = vector.load %arg12[%c0_22, %c0_23] : memref<8x128xf32, #tpu.memory_space<vmem>>, vector<8x128xf32>
    %c0_i32_24 = arith.constant 0 : i32
    %23 = arith.index_cast %c0_i32_24 : i32 to index
    %c0_25 = arith.constant 0 : index
    %c0_26 = arith.constant 0 : index
    %24 = vector.load %arg13[%23, %c0_25, %c0_26] : memref<8x8x512xbf16, #tpu.memory_space<vmem>>, vector<1x8x512xbf16>
    %25 = vector.shape_cast %24 : vector<1x8x512xbf16> to vector<8x512xbf16>
    %26 = arith.extf %25 : vector<8x512xbf16> to vector<8x512xf32>
    %27 = arith.truncf %19 : vector<8x128xf32> to vector<8x128xbf16>
    %cst_27 = arith.constant dense<0.000000e+00> : vector<8x512xf32>
    %28 = tpu.matmul %27, %14, %cst_27 {dimension_numbers = #tpu.dot_dimension_numbers<[1], [0], [0], [1], [0, 0, 1, 1], [], []>} : vector<8x128xbf16>, vector<128x512xbf16>, vector<8x512xf32> -> vector<8x512xf32>
    %29 = arith.addf %26, %28 : vector<8x512xf32>
    %30 = vector.extract_strided_slice %29 {offsets = [0, 0], sizes = [8, 128], strides = [1, 1]} : vector<8x512xf32> to vector<8x128xf32>
    %cst_28 = arith.constant 5.000000e-01 : f32
    %31 = vector.broadcast %cst_28 : f32 to vector<8x128xf32>
    %32 = arith.mulf %31, %30 : vector<8x128xf32>
    %33 = math.tanh %32 : vector<8x128xf32>
    %cst_29 = arith.constant 5.000000e-01 : f32
    %34 = vector.broadcast %cst_29 : f32 to vector<8x128xf32>
    %35 = arith.mulf %34, %33 : vector<8x128xf32>
    %cst_30 = arith.constant 5.000000e-01 : f32
    %36 = vector.broadcast %cst_30 : f32 to vector<8x128xf32>
    %37 = arith.addf %35, %36 : vector<8x128xf32>
    %38 = vector.extract_strided_slice %29 {offsets = [0, 128], sizes = [8, 128], strides = [1, 1]} : vector<8x512xf32> to vector<8x128xf32>
    %cst_31 = arith.constant 5.000000e-01 : f32
    %39 = vector.broadcast %cst_31 : f32 to vector<8x128xf32>
    %40 = arith.mulf %39, %38 : vector<8x128xf32>
    %41 = math.tanh %40 : vector<8x128xf32>
    %cst_32 = arith.constant 5.000000e-01 : f32
    %42 = vector.broadcast %cst_32 : f32 to vector<8x128xf32>
    %43 = arith.mulf %42, %41 : vector<8x128xf32>
    %cst_33 = arith.constant 5.000000e-01 : f32
    %44 = vector.broadcast %cst_33 : f32 to vector<8x128xf32>
    %45 = arith.addf %43, %44 : vector<8x128xf32>
    %46 = vector.extract_strided_slice %29 {offsets = [0, 256], sizes = [8, 128], strides = [1, 1]} : vector<8x512xf32> to vector<8x128xf32>
    %47 = math.tanh %46 : vector<8x128xf32>
    %48 = vector.extract_strided_slice %29 {offsets = [0, 384], sizes = [8, 128], strides = [1, 1]} : vector<8x512xf32> to vector<8x128xf32>
    %cst_34 = arith.constant 5.000000e-01 : f32
    %49 = vector.broadcast %cst_34 : f32 to vector<8x128xf32>
    %50 = arith.mulf %49, %48 : vector<8x128xf32>
    %51 = math.tanh %50 : vector<8x128xf32>
    %cst_35 = arith.constant 5.000000e-01 : f32
    %52 = vector.broadcast %cst_35 : f32 to vector<8x128xf32>
    %53 = arith.mulf %52, %51 : vector<8x128xf32>
    %cst_36 = arith.constant 5.000000e-01 : f32
    %54 = vector.broadcast %cst_36 : f32 to vector<8x128xf32>
    %55 = arith.addf %53, %54 : vector<8x128xf32>
    %56 = arith.mulf %45, %20 : vector<8x128xf32>
    %57 = arith.mulf %37, %47 : vector<8x128xf32>
    %58 = arith.addf %56, %57 : vector<8x128xf32>
    %59 = math.tanh %58 : vector<8x128xf32>
    %60 = arith.mulf %55, %59 : vector<8x128xf32>
    %61 = arith.truncf %60 : vector<8x128xf32> to vector<8x128xbf16>
    %62 = arith.truncf %21 : vector<8x128xf32> to vector<8x128xbf16>
    %63 = tpu.concatenate %61, %62 in 1 : vector<8x128xbf16>, vector<8x128xbf16> -> vector<8x256xbf16>
    %cst_37 = arith.constant dense<0.000000e+00> : vector<8x512xf32>
    %64 = tpu.matmul %63, %15, %cst_37 {dimension_numbers = #tpu.dot_dimension_numbers<[1], [0], [0], [1], [0, 0, 1, 1], [], []>} : vector<8x256xbf16>, vector<256x512xbf16>, vector<8x512xf32> -> vector<8x512xf32>
    %65 = arith.addf %64, %18 : vector<8x512xf32>
    %66 = vector.extract_strided_slice %65 {offsets = [0, 0], sizes = [8, 128], strides = [1, 1]} : vector<8x512xf32> to vector<8x128xf32>
    %cst_38 = arith.constant 5.000000e-01 : f32
    %67 = vector.broadcast %cst_38 : f32 to vector<8x128xf32>
    %68 = arith.mulf %67, %66 : vector<8x128xf32>
    %69 = math.tanh %68 : vector<8x128xf32>
    %cst_39 = arith.constant 5.000000e-01 : f32
    %70 = vector.broadcast %cst_39 : f32 to vector<8x128xf32>
    %71 = arith.mulf %70, %69 : vector<8x128xf32>
    %cst_40 = arith.constant 5.000000e-01 : f32
    %72 = vector.broadcast %cst_40 : f32 to vector<8x128xf32>
    %73 = arith.addf %71, %72 : vector<8x128xf32>
    %74 = vector.extract_strided_slice %65 {offsets = [0, 128], sizes = [8, 128], strides = [1, 1]} : vector<8x512xf32> to vector<8x128xf32>
    %cst_41 = arith.constant 5.000000e-01 : f32
    %75 = vector.broadcast %cst_41 : f32 to vector<8x128xf32>
    %76 = arith.mulf %75, %74 : vector<8x128xf32>
    %77 = math.tanh %76 : vector<8x128xf32>
    %cst_42 = arith.constant 5.000000e-01 : f32
    %78 = vector.broadcast %cst_42 : f32 to vector<8x128xf32>
    %79 = arith.mulf %78, %77 : vector<8x128xf32>
    %cst_43 = arith.constant 5.000000e-01 : f32
    %80 = vector.broadcast %cst_43 : f32 to vector<8x128xf32>
    %81 = arith.addf %79, %80 : vector<8x128xf32>
    %82 = vector.extract_strided_slice %65 {offsets = [0, 256], sizes = [8, 128], strides = [1, 1]} : vector<8x512xf32> to vector<8x128xf32>
    %83 = math.tanh %82 : vector<8x128xf32>
    %84 = vector.extract_strided_slice %65 {offsets = [0, 384], sizes = [8, 128], strides = [1, 1]} : vector<8x512xf32> to vector<8x128xf32>
    %cst_44 = arith.constant 5.000000e-01 : f32
    %85 = vector.broadcast %cst_44 : f32 to vector<8x128xf32>
    %86 = arith.mulf %85, %84 : vector<8x128xf32>
    %87 = math.tanh %86 : vector<8x128xf32>
    %cst_45 = arith.constant 5.000000e-01 : f32
    %88 = vector.broadcast %cst_45 : f32 to vector<8x128xf32>
    %89 = arith.mulf %88, %87 : vector<8x128xf32>
    %cst_46 = arith.constant 5.000000e-01 : f32
    %90 = vector.broadcast %cst_46 : f32 to vector<8x128xf32>
    %91 = arith.addf %89, %90 : vector<8x128xf32>
    %92 = arith.mulf %81, %22 : vector<8x128xf32>
    %93 = arith.mulf %73, %83 : vector<8x128xf32>
    %94 = arith.addf %92, %93 : vector<8x128xf32>
    %95 = math.tanh %94 : vector<8x128xf32>
    %96 = arith.mulf %91, %95 : vector<8x128xf32>
    %97 = arith.index_cast %c0_i32_24 : i32 to index
    %c0_47 = arith.constant 0 : index
    %c0_48 = arith.constant 0 : index
    %98 = vector.load %arg8[%97, %c0_47, %c0_48] : memref<8x8x128xf32, #tpu.memory_space<vmem>>, vector<1x8x128xf32>
    %99 = vector.shape_cast %98 : vector<1x8x128xf32> to vector<8x128xf32>
    %100 = vector.shape_cast %96 : vector<8x128xf32> to vector<1x8x128xf32>
    tpu.vector_store %arg8[%97, %c0_47, %c0_48], %100 {strides = array<i32>} : memref<8x8x128xf32, #tpu.memory_space<vmem>>, vector<1x8x128xf32>,
    %c1_i32 = arith.constant 1 : i32
    %101 = arith.index_cast %c1_i32 : i32 to index
    %c0_49 = arith.constant 0 : index
    %c0_50 = arith.constant 0 : index
    %102 = vector.load %arg13[%101, %c0_49, %c0_50] : memref<8x8x512xbf16, #tpu.memory_space<vmem>>, vector<1x8x512xbf16>
    %103 = vector.shape_cast %102 : vector<1x8x512xbf16> to vector<8x512xbf16>
    %104 = arith.extf %103 : vector<8x512xbf16> to vector<8x512xf32>
    %105 = arith.truncf %60 : vector<8x128xf32> to vector<8x128xbf16>
    %cst_51 = arith.constant dense<0.000000e+00> : vector<8x512xf32>
    %106 = tpu.matmul %105, %14, %cst_51 {dimension_numbers = #tpu.dot_dimension_numbers<[1], [0], [0], [1], [0, 0, 1, 1], [], []>} : vector<8x128xbf16>, vector<128x512xbf16>, vector<8x512xf32> -> vector<8x512xf32>
    %107 = arith.addf %104, %106 : vector<8x512xf32>
    %108 = vector.extract_strided_slice %107 {offsets = [0, 0], sizes = [8, 128], strides = [1, 1]} : vector<8x512xf32> to vector<8x128xf32>
    %cst_52 = arith.constant 5.000000e-01 : f32
    %109 = vector.broadcast %cst_52 : f32 to vector<8x128xf32>
    %110 = arith.mulf %109, %108 : vector<8x128xf32>
    %111 = math.tanh %110 : vector<8x128xf32>
    %cst_53 = arith.constant 5.000000e-01 : f32
    %112 = vector.broadcast %cst_53 : f32 to vector<8x128xf32>
    %113 = arith.mulf %112, %111 : vector<8x128xf32>
    %cst_54 = arith.constant 5.000000e-01 : f32
    %114 = vector.broadcast %cst_54 : f32 to vector<8x128xf32>
    %115 = arith.addf %113, %114 : vector<8x128xf32>
    %116 = vector.extract_strided_slice %107 {offsets = [0, 128], sizes = [8, 128], strides = [1, 1]} : vector<8x512xf32> to vector<8x128xf32>
    %cst_55 = arith.constant 5.000000e-01 : f32
    %117 = vector.broadcast %cst_55 : f32 to vector<8x128xf32>
    %118 = arith.mulf %117, %116 : vector<8x128xf32>
    %119 = math.tanh %118 : vector<8x128xf32>
    %cst_56 = arith.constant 5.000000e-01 : f32
    %120 = vector.broadcast %cst_56 : f32 to vector<8x128xf32>
    %121 = arith.mulf %120, %119 : vector<8x128xf32>
    %cst_57 = arith.constant 5.000000e-01 : f32
    %122 = vector.broadcast %cst_57 : f32 to vector<8x128xf32>
    %123 = arith.addf %121, %122 : vector<8x128xf32>
    %124 = vector.extract_strided_slice %107 {offsets = [0, 256], sizes = [8, 128], strides = [1, 1]} : vector<8x512xf32> to vector<8x128xf32>
    %125 = math.tanh %124 : vector<8x128xf32>
    %126 = vector.extract_strided_slice %107 {offsets = [0, 384], sizes = [8, 128], strides = [1, 1]} : vector<8x512xf32> to vector<8x128xf32>
    %cst_58 = arith.constant 5.000000e-01 : f32
    %127 = vector.broadcast %cst_58 : f32 to vector<8x128xf32>
    %128 = arith.mulf %127, %126 : vector<8x128xf32>
    %129 = math.tanh %128 : vector<8x128xf32>
    %cst_59 = arith.constant 5.000000e-01 : f32
    %130 = vector.broadcast %cst_59 : f32 to vector<8x128xf32>
    %131 = arith.mulf %130, %129 : vector<8x128xf32>
    %cst_60 = arith.constant 5.000000e-01 : f32
    %132 = vector.broadcast %cst_60 : f32 to vector<8x128xf32>
    %133 = arith.addf %131, %132 : vector<8x128xf32>
    %134 = arith.mulf %123, %58 : vector<8x128xf32>
    %135 = arith.mulf %115, %125 : vector<8x128xf32>
    %136 = arith.addf %134, %135 : vector<8x128xf32>
    %137 = math.tanh %136 : vector<8x128xf32>
    %138 = arith.mulf %133, %137 : vector<8x128xf32>
    %139 = arith.truncf %138 : vector<8x128xf32> to vector<8x128xbf16>
    %140 = arith.truncf %96 : vector<8x128xf32> to vector<8x128xbf16>
    %141 = tpu.concatenate %139, %140 in 1 : vector<8x128xbf16>, vector<8x128xbf16> -> vector<8x256xbf16>
    %cst_61 = arith.constant dense<0.000000e+00> : vector<8x512xf32>
    %142 = tpu.matmul %141, %15, %cst_61 {dimension_numbers = #tpu.dot_dimension_numbers<[1], [0], [0], [1], [0, 0, 1, 1], [], []>} : vector<8x256xbf16>, vector<256x512xbf16>, vector<8x512xf32> -> vector<8x512xf32>
    %143 = arith.addf %142, %18 : vector<8x512xf32>
    %144 = vector.extract_strided_slice %143 {offsets = [0, 0], sizes = [8, 128], strides = [1, 1]} : vector<8x512xf32> to vector<8x128xf32>
    %cst_62 = arith.constant 5.000000e-01 : f32
    %145 = vector.broadcast %cst_62 : f32 to vector<8x128xf32>
    %146 = arith.mulf %145, %144 : vector<8x128xf32>
    %147 = math.tanh %146 : vector<8x128xf32>
    %cst_63 = arith.constant 5.000000e-01 : f32
    %148 = vector.broadcast %cst_63 : f32 to vector<8x128xf32>
    %149 = arith.mulf %148, %147 : vector<8x128xf32>
    %cst_64 = arith.constant 5.000000e-01 : f32
    %150 = vector.broadcast %cst_64 : f32 to vector<8x128xf32>
    %151 = arith.addf %149, %150 : vector<8x128xf32>
    %152 = vector.extract_strided_slice %143 {offsets = [0, 128], sizes = [8, 128], strides = [1, 1]} : vector<8x512xf32> to vector<8x128xf32>
    %cst_65 = arith.constant 5.000000e-01 : f32
    %153 = vector.broadcast %cst_65 : f32 to vector<8x128xf32>
    %154 = arith.mulf %153, %152 : vector<8x128xf32>
    %155 = math.tanh %154 : vector<8x128xf32>
    %cst_66 = arith.constant 5.000000e-01 : f32
    %156 = vector.broadcast %cst_66 : f32 to vector<8x128xf32>
    %157 = arith.mulf %156, %155 : vector<8x128xf32>
    %cst_67 = arith.constant 5.000000e-01 : f32
    %158 = vector.broadcast %cst_67 : f32 to vector<8x128xf32>
    %159 = arith.addf %157, %158 : vector<8x128xf32>
    %160 = vector.extract_strided_slice %143 {offsets = [0, 256], sizes = [8, 128], strides = [1, 1]} : vector<8x512xf32> to vector<8x128xf32>
    %161 = math.tanh %160 : vector<8x128xf32>
    %162 = vector.extract_strided_slice %143 {offsets = [0, 384], sizes = [8, 128], strides = [1, 1]} : vector<8x512xf32> to vector<8x128xf32>
    %cst_68 = arith.constant 5.000000e-01 : f32
    %163 = vector.broadcast %cst_68 : f32 to vector<8x128xf32>
    %164 = arith.mulf %163, %162 : vector<8x128xf32>
    %165 = math.tanh %164 : vector<8x128xf32>
    %cst_69 = arith.constant 5.000000e-01 : f32
    %166 = vector.broadcast %cst_69 : f32 to vector<8x128xf32>
    %167 = arith.mulf %166, %165 : vector<8x128xf32>
    %cst_70 = arith.constant 5.000000e-01 : f32
    %168 = vector.broadcast %cst_70 : f32 to vector<8x128xf32>
    %169 = arith.addf %167, %168 : vector<8x128xf32>
    %170 = arith.mulf %159, %94 : vector<8x128xf32>
    %171 = arith.mulf %151, %161 : vector<8x128xf32>
    %172 = arith.addf %170, %171 : vector<8x128xf32>
    %173 = math.tanh %172 : vector<8x128xf32>
    %174 = arith.mulf %169, %173 : vector<8x128xf32>
    %175 = arith.index_cast %c1_i32 : i32 to index
    %c0_71 = arith.constant 0 : index
    %c0_72 = arith.constant 0 : index
    %176 = vector.load %arg8[%175, %c0_71, %c0_72] : memref<8x8x128xf32, #tpu.memory_space<vmem>>, vector<1x8x128xf32>
    %177 = vector.shape_cast %176 : vector<1x8x128xf32> to vector<8x128xf32>
    %178 = vector.shape_cast %174 : vector<8x128xf32> to vector<1x8x128xf32>
    tpu.vector_store %arg8[%175, %c0_71, %c0_72], %178 {strides = array<i32>} : memref<8x8x128xf32, #tpu.memory_space<vmem>>, vector<1x8x128xf32>,
    %c2_i32 = arith.constant 2 : i32
    %179 = arith.index_cast %c2_i32 : i32 to index
    %c0_73 = arith.constant 0 : index
    %c0_74 = arith.constant 0 : index
    %180 = vector.load %arg13[%179, %c0_73, %c0_74] : memref<8x8x512xbf16, #tpu.memory_space<vmem>>, vector<1x8x512xbf16>
    %181 = vector.shape_cast %180 : vector<1x8x512xbf16> to vector<8x512xbf16>
    %182 = arith.extf %181 : vector<8x512xbf16> to vector<8x512xf32>
    %183 = arith.truncf %138 : vector<8x128xf32> to vector<8x128xbf16>
    %cst_75 = arith.constant dense<0.000000e+00> : vector<8x512xf32>
    %184 = tpu.matmul %183, %14, %cst_75 {dimension_numbers = #tpu.dot_dimension_numbers<[1], [0], [0], [1], [0, 0, 1, 1], [], []>} : vector<8x128xbf16>, vector<128x512xbf16>, vector<8x512xf32> -> vector<8x512xf32>
    %185 = arith.addf %182, %184 : vector<8x512xf32>
    %186 = vector.extract_strided_slice %185 {offsets = [0, 0], sizes = [8, 128], strides = [1, 1]} : vector<8x512xf32> to vector<8x128xf32>
    %cst_76 = arith.constant 5.000000e-01 : f32
    %187 = vector.broadcast %cst_76 : f32 to vector<8x128xf32>
    %188 = arith.mulf %187, %186 : vector<8x128xf32>
    %189 = math.tanh %188 : vector<8x128xf32>
    %cst_77 = arith.constant 5.000000e-01 : f32
    %190 = vector.broadcast %cst_77 : f32 to vector<8x128xf32>
    %191 = arith.mulf %190, %189 : vector<8x128xf32>
    %cst_78 = arith.constant 5.000000e-01 : f32
    %192 = vector.broadcast %cst_78 : f32 to vector<8x128xf32>
    %193 = arith.addf %191, %192 : vector<8x128xf32>
    %194 = vector.extract_strided_slice %185 {offsets = [0, 128], sizes = [8, 128], strides = [1, 1]} : vector<8x512xf32> to vector<8x128xf32>
    %cst_79 = arith.constant 5.000000e-01 : f32
    %195 = vector.broadcast %cst_79 : f32 to vector<8x128xf32>
    %196 = arith.mulf %195, %194 : vector<8x128xf32>
    %197 = math.tanh %196 : vector<8x128xf32>
    %cst_80 = arith.constant 5.000000e-01 : f32
    %198 = vector.broadcast %cst_80 : f32 to vector<8x128xf32>
    %199 = arith.mulf %198, %197 : vector<8x128xf32>
    %cst_81 = arith.constant 5.000000e-01 : f32
    %200 = vector.broadcast %cst_81 : f32 to vector<8x128xf32>
    %201 = arith.addf %199, %200 : vector<8x128xf32>
    %202 = vector.extract_strided_slice %185 {offsets = [0, 256], sizes = [8, 128], strides = [1, 1]} : vector<8x512xf32> to vector<8x128xf32>
    %203 = math.tanh %202 : vector<8x128xf32>
    %204 = vector.extract_strided_slice %185 {offsets = [0, 384], sizes = [8, 128], strides = [1, 1]} : vector<8x512xf32> to vector<8x128xf32>
    %cst_82 = arith.constant 5.000000e-01 : f32
    %205 = vector.broadcast %cst_82 : f32 to vector<8x128xf32>
    %206 = arith.mulf %205, %204 : vector<8x128xf32>
    %207 = math.tanh %206 : vector<8x128xf32>
    %cst_83 = arith.constant 5.000000e-01 : f32
    %208 = vector.broadcast %cst_83 : f32 to vector<8x128xf32>
    %209 = arith.mulf %208, %207 : vector<8x128xf32>
    %cst_84 = arith.constant 5.000000e-01 : f32
    %210 = vector.broadcast %cst_84 : f32 to vector<8x128xf32>
    %211 = arith.addf %209, %210 : vector<8x128xf32>
    %212 = arith.mulf %201, %136 : vector<8x128xf32>
    %213 = arith.mulf %193, %203 : vector<8x128xf32>
    %214 = arith.addf %212, %213 : vector<8x128xf32>
    %215 = math.tanh %214 : vector<8x128xf32>
    %216 = arith.mulf %211, %215 : vector<8x128xf32>
    %217 = arith.truncf %216 : vector<8x128xf32> to vector<8x128xbf16>
    %218 = arith.truncf %174 : vector<8x128xf32> to vector<8x128xbf16>
    %219 = tpu.concatenate %217, %218 in 1 : vector<8x128xbf16>, vector<8x128xbf16> -> vector<8x256xbf16>
    %cst_85 = arith.constant dense<0.000000e+00> : vector<8x512xf32>
    %220 = tpu.matmul %219, %15, %cst_85 {dimension_numbers = #tpu.dot_dimension_numbers<[1], [0], [0], [1], [0, 0, 1, 1], [], []>} : vector<8x256xbf16>, vector<256x512xbf16>, vector<8x512xf32> -> vector<8x512xf32>
    %221 = arith.addf %220, %18 : vector<8x512xf32>
    %222 = vector.extract_strided_slice %221 {offsets = [0, 0], sizes = [8, 128], strides = [1, 1]} : vector<8x512xf32> to vector<8x128xf32>
    %cst_86 = arith.constant 5.000000e-01 : f32
    %223 = vector.broadcast %cst_86 : f32 to vector<8x128xf32>
    %224 = arith.mulf %223, %222 : vector<8x128xf32>
    %225 = math.tanh %224 : vector<8x128xf32>
    %cst_87 = arith.constant 5.000000e-01 : f32
    %226 = vector.broadcast %cst_87 : f32 to vector<8x128xf32>
    %227 = arith.mulf %226, %225 : vector<8x128xf32>
    %cst_88 = arith.constant 5.000000e-01 : f32
    %228 = vector.broadcast %cst_88 : f32 to vector<8x128xf32>
    %229 = arith.addf %227, %228 : vector<8x128xf32>
    %230 = vector.extract_strided_slice %221 {offsets = [0, 128], sizes = [8, 128], strides = [1, 1]} : vector<8x512xf32> to vector<8x128xf32>
    %cst_89 = arith.constant 5.000000e-01 : f32
    %231 = vector.broadcast %cst_89 : f32 to vector<8x128xf32>
    %232 = arith.mulf %231, %230 : vector<8x128xf32>
    %233 = math.tanh %232 : vector<8x128xf32>
    %cst_90 = arith.constant 5.000000e-01 : f32
    %234 = vector.broadcast %cst_90 : f32 to vector<8x128xf32>
    %235 = arith.mulf %234, %233 : vector<8x128xf32>
    %cst_91 = arith.constant 5.000000e-01 : f32
    %236 = vector.broadcast %cst_91 : f32 to vector<8x128xf32>
    %237 = arith.addf %235, %236 : vector<8x128xf32>
    %238 = vector.extract_strided_slice %221 {offsets = [0, 256], sizes = [8, 128], strides = [1, 1]} : vector<8x512xf32> to vector<8x128xf32>
    %239 = math.tanh %238 : vector<8x128xf32>
    %240 = vector.extract_strided_slice %221 {offsets = [0, 384], sizes = [8, 128], strides = [1, 1]} : vector<8x512xf32> to vector<8x128xf32>
    %cst_92 = arith.constant 5.000000e-01 : f32
    %241 = vector.broadcast %cst_92 : f32 to vector<8x128xf32>
    %242 = arith.mulf %241, %240 : vector<8x128xf32>
    %243 = math.tanh %242 : vector<8x128xf32>
    %cst_93 = arith.constant 5.000000e-01 : f32
    %244 = vector.broadcast %cst_93 : f32 to vector<8x128xf32>
    %245 = arith.mulf %244, %243 : vector<8x128xf32>
    %cst_94 = arith.constant 5.000000e-01 : f32
    %246 = vector.broadcast %cst_94 : f32 to vector<8x128xf32>
    %247 = arith.addf %245, %246 : vector<8x128xf32>
    %248 = arith.mulf %237, %172 : vector<8x128xf32>
    %249 = arith.mulf %229, %239 : vector<8x128xf32>
    %250 = arith.addf %248, %249 : vector<8x128xf32>
    %251 = math.tanh %250 : vector<8x128xf32>
    %252 = arith.mulf %247, %251 : vector<8x128xf32>
    %253 = arith.index_cast %c2_i32 : i32 to index
    %c0_95 = arith.constant 0 : index
    %c0_96 = arith.constant 0 : index
    %254 = vector.load %arg8[%253, %c0_95, %c0_96] : memref<8x8x128xf32, #tpu.memory_space<vmem>>, vector<1x8x128xf32>
    %255 = vector.shape_cast %254 : vector<1x8x128xf32> to vector<8x128xf32>
    %256 = vector.shape_cast %252 : vector<8x128xf32> to vector<1x8x128xf32>
    tpu.vector_store %arg8[%253, %c0_95, %c0_96], %256 {strides = array<i32>} : memref<8x8x128xf32, #tpu.memory_space<vmem>>, vector<1x8x128xf32>,
    %c3_i32 = arith.constant 3 : i32
    %257 = arith.index_cast %c3_i32 : i32 to index
    %c0_97 = arith.constant 0 : index
    %c0_98 = arith.constant 0 : index
    %258 = vector.load %arg13[%257, %c0_97, %c0_98] : memref<8x8x512xbf16, #tpu.memory_space<vmem>>, vector<1x8x512xbf16>
    %259 = vector.shape_cast %258 : vector<1x8x512xbf16> to vector<8x512xbf16>
    %260 = arith.extf %259 : vector<8x512xbf16> to vector<8x512xf32>
    %261 = arith.truncf %216 : vector<8x128xf32> to vector<8x128xbf16>
    %cst_99 = arith.constant dense<0.000000e+00> : vector<8x512xf32>
    %262 = tpu.matmul %261, %14, %cst_99 {dimension_numbers = #tpu.dot_dimension_numbers<[1], [0], [0], [1], [0, 0, 1, 1], [], []>} : vector<8x128xbf16>, vector<128x512xbf16>, vector<8x512xf32> -> vector<8x512xf32>
    %263 = arith.addf %260, %262 : vector<8x512xf32>
    %264 = vector.extract_strided_slice %263 {offsets = [0, 0], sizes = [8, 128], strides = [1, 1]} : vector<8x512xf32> to vector<8x128xf32>
    %cst_100 = arith.constant 5.000000e-01 : f32
    %265 = vector.broadcast %cst_100 : f32 to vector<8x128xf32>
    %266 = arith.mulf %265, %264 : vector<8x128xf32>
    %267 = math.tanh %266 : vector<8x128xf32>
    %cst_101 = arith.constant 5.000000e-01 : f32
    %268 = vector.broadcast %cst_101 : f32 to vector<8x128xf32>
    %269 = arith.mulf %268, %267 : vector<8x128xf32>
    %cst_102 = arith.constant 5.000000e-01 : f32
    %270 = vector.broadcast %cst_102 : f32 to vector<8x128xf32>
    %271 = arith.addf %269, %270 : vector<8x128xf32>
    %272 = vector.extract_strided_slice %263 {offsets = [0, 128], sizes = [8, 128], strides = [1, 1]} : vector<8x512xf32> to vector<8x128xf32>
    %cst_103 = arith.constant 5.000000e-01 : f32
    %273 = vector.broadcast %cst_103 : f32 to vector<8x128xf32>
    %274 = arith.mulf %273, %272 : vector<8x128xf32>
    %275 = math.tanh %274 : vector<8x128xf32>
    %cst_104 = arith.constant 5.000000e-01 : f32
    %276 = vector.broadcast %cst_104 : f32 to vector<8x128xf32>
    %277 = arith.mulf %276, %275 : vector<8x128xf32>
    %cst_105 = arith.constant 5.000000e-01 : f32
    %278 = vector.broadcast %cst_105 : f32 to vector<8x128xf32>
    %279 = arith.addf %277, %278 : vector<8x128xf32>
    %280 = vector.extract_strided_slice %263 {offsets = [0, 256], sizes = [8, 128], strides = [1, 1]} : vector<8x512xf32> to vector<8x128xf32>
    %281 = math.tanh %280 : vector<8x128xf32>
    %282 = vector.extract_strided_slice %263 {offsets = [0, 384], sizes = [8, 128], strides = [1, 1]} : vector<8x512xf32> to vector<8x128xf32>
    %cst_106 = arith.constant 5.000000e-01 : f32
    %283 = vector.broadcast %cst_106 : f32 to vector<8x128xf32>
    %284 = arith.mulf %283, %282 : vector<8x128xf32>
    %285 = math.tanh %284 : vector<8x128xf32>
    %cst_107 = arith.constant 5.000000e-01 : f32
    %286 = vector.broadcast %cst_107 : f32 to vector<8x128xf32>
    %287 = arith.mulf %286, %285 : vector<8x128xf32>
    %cst_108 = arith.constant 5.000000e-01 : f32
    %288 = vector.broadcast %cst_108 : f32 to vector<8x128xf32>
    %289 = arith.addf %287, %288 : vector<8x128xf32>
    %290 = arith.mulf %279, %214 : vector<8x128xf32>
    %291 = arith.mulf %271, %281 : vector<8x128xf32>
    %292 = arith.addf %290, %291 : vector<8x128xf32>
    %293 = math.tanh %292 : vector<8x128xf32>
    %294 = arith.mulf %289, %293 : vector<8x128xf32>
    %295 = arith.truncf %294 : vector<8x128xf32> to vector<8x128xbf16>
    %296 = arith.truncf %252 : vector<8x128xf32> to vector<8x128xbf16>
    %297 = tpu.concatenate %295, %296 in 1 : vector<8x128xbf16>, vector<8x128xbf16> -> vector<8x256xbf16>
    %cst_109 = arith.constant dense<0.000000e+00> : vector<8x512xf32>
    %298 = tpu.matmul %297, %15, %cst_109 {dimension_numbers = #tpu.dot_dimension_numbers<[1], [0], [0], [1], [0, 0, 1, 1], [], []>} : vector<8x256xbf16>, vector<256x512xbf16>, vector<8x512xf32> -> vector<8x512xf32>
    %299 = arith.addf %298, %18 : vector<8x512xf32>
    %300 = vector.extract_strided_slice %299 {offsets = [0, 0], sizes = [8, 128], strides = [1, 1]} : vector<8x512xf32> to vector<8x128xf32>
    %cst_110 = arith.constant 5.000000e-01 : f32
    %301 = vector.broadcast %cst_110 : f32 to vector<8x128xf32>
    %302 = arith.mulf %301, %300 : vector<8x128xf32>
    %303 = math.tanh %302 : vector<8x128xf32>
    %cst_111 = arith.constant 5.000000e-01 : f32
    %304 = vector.broadcast %cst_111 : f32 to vector<8x128xf32>
    %305 = arith.mulf %304, %303 : vector<8x128xf32>
    %cst_112 = arith.constant 5.000000e-01 : f32
    %306 = vector.broadcast %cst_112 : f32 to vector<8x128xf32>
    %307 = arith.addf %305, %306 : vector<8x128xf32>
    %308 = vector.extract_strided_slice %299 {offsets = [0, 128], sizes = [8, 128], strides = [1, 1]} : vector<8x512xf32> to vector<8x128xf32>
    %cst_113 = arith.constant 5.000000e-01 : f32
    %309 = vector.broadcast %cst_113 : f32 to vector<8x128xf32>
    %310 = arith.mulf %309, %308 : vector<8x128xf32>
    %311 = math.tanh %310 : vector<8x128xf32>
    %cst_114 = arith.constant 5.000000e-01 : f32
    %312 = vector.broadcast %cst_114 : f32 to vector<8x128xf32>
    %313 = arith.mulf %312, %311 : vector<8x128xf32>
    %cst_115 = arith.constant 5.000000e-01 : f32
    %314 = vector.broadcast %cst_115 : f32 to vector<8x128xf32>
    %315 = arith.addf %313, %314 : vector<8x128xf32>
    %316 = vector.extract_strided_slice %299 {offsets = [0, 256], sizes = [8, 128], strides = [1, 1]} : vector<8x512xf32> to vector<8x128xf32>
    %317 = math.tanh %316 : vector<8x128xf32>
    %318 = vector.extract_strided_slice %299 {offsets = [0, 384], sizes = [8, 128], strides = [1, 1]} : vector<8x512xf32> to vector<8x128xf32>
    %cst_116 = arith.constant 5.000000e-01 : f32
    %319 = vector.broadcast %cst_116 : f32 to vector<8x128xf32>
    %320 = arith.mulf %319, %318 : vector<8x128xf32>
    %321 = math.tanh %320 : vector<8x128xf32>
    %cst_117 = arith.constant 5.000000e-01 : f32
    %322 = vector.broadcast %cst_117 : f32 to vector<8x128xf32>
    %323 = arith.mulf %322, %321 : vector<8x128xf32>
    %cst_118 = arith.constant 5.000000e-01 : f32
    %324 = vector.broadcast %cst_118 : f32 to vector<8x128xf32>
    %325 = arith.addf %323, %324 : vector<8x128xf32>
    %326 = arith.mulf %315, %250 : vector<8x128xf32>
    %327 = arith.mulf %307, %317 : vector<8x128xf32>
    %328 = arith.addf %326, %327 : vector<8x128xf32>
    %329 = math.tanh %328 : vector<8x128xf32>
    %330 = arith.mulf %325, %329 : vector<8x128xf32>
    %331 = arith.index_cast %c3_i32 : i32 to index
    %c0_119 = arith.constant 0 : index
    %c0_120 = arith.constant 0 : index
    %332 = vector.load %arg8[%331, %c0_119, %c0_120] : memref<8x8x128xf32, #tpu.memory_space<vmem>>, vector<1x8x128xf32>
    %333 = vector.shape_cast %332 : vector<1x8x128xf32> to vector<8x128xf32>
    %334 = vector.shape_cast %330 : vector<8x128xf32> to vector<1x8x128xf32>
    tpu.vector_store %arg8[%331, %c0_119, %c0_120], %334 {strides = array<i32>} : memref<8x8x128xf32, #tpu.memory_space<vmem>>, vector<1x8x128xf32>,
    %c4_i32 = arith.constant 4 : i32
    %335 = arith.index_cast %c4_i32 : i32 to index
    %c0_121 = arith.constant 0 : index
    %c0_122 = arith.constant 0 : index
    %336 = vector.load %arg13[%335, %c0_121, %c0_122] : memref<8x8x512xbf16, #tpu.memory_space<vmem>>, vector<1x8x512xbf16>
    %337 = vector.shape_cast %336 : vector<1x8x512xbf16> to vector<8x512xbf16>
    %338 = arith.extf %337 : vector<8x512xbf16> to vector<8x512xf32>
    %339 = arith.truncf %294 : vector<8x128xf32> to vector<8x128xbf16>
    %cst_123 = arith.constant dense<0.000000e+00> : vector<8x512xf32>
    %340 = tpu.matmul %339, %14, %cst_123 {dimension_numbers = #tpu.dot_dimension_numbers<[1], [0], [0], [1], [0, 0, 1, 1], [], []>} : vector<8x128xbf16>, vector<128x512xbf16>, vector<8x512xf32> -> vector<8x512xf32>
    %341 = arith.addf %338, %340 : vector<8x512xf32>
    %342 = vector.extract_strided_slice %341 {offsets = [0, 0], sizes = [8, 128], strides = [1, 1]} : vector<8x512xf32> to vector<8x128xf32>
    %cst_124 = arith.constant 5.000000e-01 : f32
    %343 = vector.broadcast %cst_124 : f32 to vector<8x128xf32>
    %344 = arith.mulf %343, %342 : vector<8x128xf32>
    %345 = math.tanh %344 : vector<8x128xf32>
    %cst_125 = arith.constant 5.000000e-01 : f32
    %346 = vector.broadcast %cst_125 : f32 to vector<8x128xf32>
    %347 = arith.mulf %346, %345 : vector<8x128xf32>
    %cst_126 = arith.constant 5.000000e-01 : f32
    %348 = vector.broadcast %cst_126 : f32 to vector<8x128xf32>
    %349 = arith.addf %347, %348 : vector<8x128xf32>
    %350 = vector.extract_strided_slice %341 {offsets = [0, 128], sizes = [8, 128], strides = [1, 1]} : vector<8x512xf32> to vector<8x128xf32>
    %cst_127 = arith.constant 5.000000e-01 : f32
    %351 = vector.broadcast %cst_127 : f32 to vector<8x128xf32>
    %352 = arith.mulf %351, %350 : vector<8x128xf32>
    %353 = math.tanh %352 : vector<8x128xf32>
    %cst_128 = arith.constant 5.000000e-01 : f32
    %354 = vector.broadcast %cst_128 : f32 to vector<8x128xf32>
    %355 = arith.mulf %354, %353 : vector<8x128xf32>
    %cst_129 = arith.constant 5.000000e-01 : f32
    %356 = vector.broadcast %cst_129 : f32 to vector<8x128xf32>
    %357 = arith.addf %355, %356 : vector<8x128xf32>
    %358 = vector.extract_strided_slice %341 {offsets = [0, 256], sizes = [8, 128], strides = [1, 1]} : vector<8x512xf32> to vector<8x128xf32>
    %359 = math.tanh %358 : vector<8x128xf32>
    %360 = vector.extract_strided_slice %341 {offsets = [0, 384], sizes = [8, 128], strides = [1, 1]} : vector<8x512xf32> to vector<8x128xf32>
    %cst_130 = arith.constant 5.000000e-01 : f32
    %361 = vector.broadcast %cst_130 : f32 to vector<8x128xf32>
    %362 = arith.mulf %361, %360 : vector<8x128xf32>
    %363 = math.tanh %362 : vector<8x128xf32>
    %cst_131 = arith.constant 5.000000e-01 : f32
    %364 = vector.broadcast %cst_131 : f32 to vector<8x128xf32>
    %365 = arith.mulf %364, %363 : vector<8x128xf32>
    %cst_132 = arith.constant 5.000000e-01 : f32
    %366 = vector.broadcast %cst_132 : f32 to vector<8x128xf32>
    %367 = arith.addf %365, %366 : vector<8x128xf32>
    %368 = arith.mulf %357, %292 : vector<8x128xf32>
    %369 = arith.mulf %349, %359 : vector<8x128xf32>
    %370 = arith.addf %368, %369 : vector<8x128xf32>
    %371 = math.tanh %370 : vector<8x128xf32>
    %372 = arith.mulf %367, %371 : vector<8x128xf32>
    %373 = arith.truncf %372 : vector<8x128xf32> to vector<8x128xbf16>
    %374 = arith.truncf %330 : vector<8x128xf32> to vector<8x128xbf16>
    %375 = tpu.concatenate %373, %374 in 1 : vector<8x128xbf16>, vector<8x128xbf16> -> vector<8x256xbf16>
    %cst_133 = arith.constant dense<0.000000e+00> : vector<8x512xf32>
    %376 = tpu.matmul %375, %15, %cst_133 {dimension_numbers = #tpu.dot_dimension_numbers<[1], [0], [0], [1], [0, 0, 1, 1], [], []>} : vector<8x256xbf16>, vector<256x512xbf16>, vector<8x512xf32> -> vector<8x512xf32>
    %377 = arith.addf %376, %18 : vector<8x512xf32>
    %378 = vector.extract_strided_slice %377 {offsets = [0, 0], sizes = [8, 128], strides = [1, 1]} : vector<8x512xf32> to vector<8x128xf32>
    %cst_134 = arith.constant 5.000000e-01 : f32
    %379 = vector.broadcast %cst_134 : f32 to vector<8x128xf32>
    %380 = arith.mulf %379, %378 : vector<8x128xf32>
    %381 = math.tanh %380 : vector<8x128xf32>
    %cst_135 = arith.constant 5.000000e-01 : f32
    %382 = vector.broadcast %cst_135 : f32 to vector<8x128xf32>
    %383 = arith.mulf %382, %381 : vector<8x128xf32>
    %cst_136 = arith.constant 5.000000e-01 : f32
    %384 = vector.broadcast %cst_136 : f32 to vector<8x128xf32>
    %385 = arith.addf %383, %384 : vector<8x128xf32>
    %386 = vector.extract_strided_slice %377 {offsets = [0, 128], sizes = [8, 128], strides = [1, 1]} : vector<8x512xf32> to vector<8x128xf32>
    %cst_137 = arith.constant 5.000000e-01 : f32
    %387 = vector.broadcast %cst_137 : f32 to vector<8x128xf32>
    %388 = arith.mulf %387, %386 : vector<8x128xf32>
    %389 = math.tanh %388 : vector<8x128xf32>
    %cst_138 = arith.constant 5.000000e-01 : f32
    %390 = vector.broadcast %cst_138 : f32 to vector<8x128xf32>
    %391 = arith.mulf %390, %389 : vector<8x128xf32>
    %cst_139 = arith.constant 5.000000e-01 : f32
    %392 = vector.broadcast %cst_139 : f32 to vector<8x128xf32>
    %393 = arith.addf %391, %392 : vector<8x128xf32>
    %394 = vector.extract_strided_slice %377 {offsets = [0, 256], sizes = [8, 128], strides = [1, 1]} : vector<8x512xf32> to vector<8x128xf32>
    %395 = math.tanh %394 : vector<8x128xf32>
    %396 = vector.extract_strided_slice %377 {offsets = [0, 384], sizes = [8, 128], strides = [1, 1]} : vector<8x512xf32> to vector<8x128xf32>
    %cst_140 = arith.constant 5.000000e-01 : f32
    %397 = vector.broadcast %cst_140 : f32 to vector<8x128xf32>
    %398 = arith.mulf %397, %396 : vector<8x128xf32>
    %399 = math.tanh %398 : vector<8x128xf32>
    %cst_141 = arith.constant 5.000000e-01 : f32
    %400 = vector.broadcast %cst_141 : f32 to vector<8x128xf32>
    %401 = arith.mulf %400, %399 : vector<8x128xf32>
    %cst_142 = arith.constant 5.000000e-01 : f32
    %402 = vector.broadcast %cst_142 : f32 to vector<8x128xf32>
    %403 = arith.addf %401, %402 : vector<8x128xf32>
    %404 = arith.mulf %393, %328 : vector<8x128xf32>
    %405 = arith.mulf %385, %395 : vector<8x128xf32>
    %406 = arith.addf %404, %405 : vector<8x128xf32>
    %407 = math.tanh %406 : vector<8x128xf32>
    %408 = arith.mulf %403, %407 : vector<8x128xf32>
    %409 = arith.index_cast %c4_i32 : i32 to index
    %c0_143 = arith.constant 0 : index
    %c0_144 = arith.constant 0 : index
    %410 = vector.load %arg8[%409, %c0_143, %c0_144] : memref<8x8x128xf32, #tpu.memory_space<vmem>>, vector<1x8x128xf32>
    %411 = vector.shape_cast %410 : vector<1x8x128xf32> to vector<8x128xf32>
    %412 = vector.shape_cast %408 : vector<8x128xf32> to vector<1x8x128xf32>
    tpu.vector_store %arg8[%409, %c0_143, %c0_144], %412 {strides = array<i32>} : memref<8x8x128xf32, #tpu.memory_space<vmem>>, vector<1x8x128xf32>,
    %c5_i32 = arith.constant 5 : i32
    %413 = arith.index_cast %c5_i32 : i32 to index
    %c0_145 = arith.constant 0 : index
    %c0_146 = arith.constant 0 : index
    %414 = vector.load %arg13[%413, %c0_145, %c0_146] : memref<8x8x512xbf16, #tpu.memory_space<vmem>>, vector<1x8x512xbf16>
    %415 = vector.shape_cast %414 : vector<1x8x512xbf16> to vector<8x512xbf16>
    %416 = arith.extf %415 : vector<8x512xbf16> to vector<8x512xf32>
    %417 = arith.truncf %372 : vector<8x128xf32> to vector<8x128xbf16>
    %cst_147 = arith.constant dense<0.000000e+00> : vector<8x512xf32>
    %418 = tpu.matmul %417, %14, %cst_147 {dimension_numbers = #tpu.dot_dimension_numbers<[1], [0], [0], [1], [0, 0, 1, 1], [], []>} : vector<8x128xbf16>, vector<128x512xbf16>, vector<8x512xf32> -> vector<8x512xf32>
    %419 = arith.addf %416, %418 : vector<8x512xf32>
    %420 = vector.extract_strided_slice %419 {offsets = [0, 0], sizes = [8, 128], strides = [1, 1]} : vector<8x512xf32> to vector<8x128xf32>
    %cst_148 = arith.constant 5.000000e-01 : f32
    %421 = vector.broadcast %cst_148 : f32 to vector<8x128xf32>
    %422 = arith.mulf %421, %420 : vector<8x128xf32>
    %423 = math.tanh %422 : vector<8x128xf32>
    %cst_149 = arith.constant 5.000000e-01 : f32
    %424 = vector.broadcast %cst_149 : f32 to vector<8x128xf32>
    %425 = arith.mulf %424, %423 : vector<8x128xf32>
    %cst_150 = arith.constant 5.000000e-01 : f32
    %426 = vector.broadcast %cst_150 : f32 to vector<8x128xf32>
    %427 = arith.addf %425, %426 : vector<8x128xf32>
    %428 = vector.extract_strided_slice %419 {offsets = [0, 128], sizes = [8, 128], strides = [1, 1]} : vector<8x512xf32> to vector<8x128xf32>
    %cst_151 = arith.constant 5.000000e-01 : f32
    %429 = vector.broadcast %cst_151 : f32 to vector<8x128xf32>
    %430 = arith.mulf %429, %428 : vector<8x128xf32>
    %431 = math.tanh %430 : vector<8x128xf32>
    %cst_152 = arith.constant 5.000000e-01 : f32
    %432 = vector.broadcast %cst_152 : f32 to vector<8x128xf32>
    %433 = arith.mulf %432, %431 : vector<8x128xf32>
    %cst_153 = arith.constant 5.000000e-01 : f32
    %434 = vector.broadcast %cst_153 : f32 to vector<8x128xf32>
    %435 = arith.addf %433, %434 : vector<8x128xf32>
    %436 = vector.extract_strided_slice %419 {offsets = [0, 256], sizes = [8, 128], strides = [1, 1]} : vector<8x512xf32> to vector<8x128xf32>
    %437 = math.tanh %436 : vector<8x128xf32>
    %438 = vector.extract_strided_slice %419 {offsets = [0, 384], sizes = [8, 128], strides = [1, 1]} : vector<8x512xf32> to vector<8x128xf32>
    %cst_154 = arith.constant 5.000000e-01 : f32
    %439 = vector.broadcast %cst_154 : f32 to vector<8x128xf32>
    %440 = arith.mulf %439, %438 : vector<8x128xf32>
    %441 = math.tanh %440 : vector<8x128xf32>
    %cst_155 = arith.constant 5.000000e-01 : f32
    %442 = vector.broadcast %cst_155 : f32 to vector<8x128xf32>
    %443 = arith.mulf %442, %441 : vector<8x128xf32>
    %cst_156 = arith.constant 5.000000e-01 : f32
    %444 = vector.broadcast %cst_156 : f32 to vector<8x128xf32>
    %445 = arith.addf %443, %444 : vector<8x128xf32>
    %446 = arith.mulf %435, %370 : vector<8x128xf32>
    %447 = arith.mulf %427, %437 : vector<8x128xf32>
    %448 = arith.addf %446, %447 : vector<8x128xf32>
    %449 = math.tanh %448 : vector<8x128xf32>
    %450 = arith.mulf %445, %449 : vector<8x128xf32>
    %451 = arith.truncf %450 : vector<8x128xf32> to vector<8x128xbf16>
    %452 = arith.truncf %408 : vector<8x128xf32> to vector<8x128xbf16>
    %453 = tpu.concatenate %451, %452 in 1 : vector<8x128xbf16>, vector<8x128xbf16> -> vector<8x256xbf16>
    %cst_157 = arith.constant dense<0.000000e+00> : vector<8x512xf32>
    %454 = tpu.matmul %453, %15, %cst_157 {dimension_numbers = #tpu.dot_dimension_numbers<[1], [0], [0], [1], [0, 0, 1, 1], [], []>} : vector<8x256xbf16>, vector<256x512xbf16>, vector<8x512xf32> -> vector<8x512xf32>
    %455 = arith.addf %454, %18 : vector<8x512xf32>
    %456 = vector.extract_strided_slice %455 {offsets = [0, 0], sizes = [8, 128], strides = [1, 1]} : vector<8x512xf32> to vector<8x128xf32>
    %cst_158 = arith.constant 5.000000e-01 : f32
    %457 = vector.broadcast %cst_158 : f32 to vector<8x128xf32>
    %458 = arith.mulf %457, %456 : vector<8x128xf32>
    %459 = math.tanh %458 : vector<8x128xf32>
    %cst_159 = arith.constant 5.000000e-01 : f32
    %460 = vector.broadcast %cst_159 : f32 to vector<8x128xf32>
    %461 = arith.mulf %460, %459 : vector<8x128xf32>
    %cst_160 = arith.constant 5.000000e-01 : f32
    %462 = vector.broadcast %cst_160 : f32 to vector<8x128xf32>
    %463 = arith.addf %461, %462 : vector<8x128xf32>
    %464 = vector.extract_strided_slice %455 {offsets = [0, 128], sizes = [8, 128], strides = [1, 1]} : vector<8x512xf32> to vector<8x128xf32>
    %cst_161 = arith.constant 5.000000e-01 : f32
    %465 = vector.broadcast %cst_161 : f32 to vector<8x128xf32>
    %466 = arith.mulf %465, %464 : vector<8x128xf32>
    %467 = math.tanh %466 : vector<8x128xf32>
    %cst_162 = arith.constant 5.000000e-01 : f32
    %468 = vector.broadcast %cst_162 : f32 to vector<8x128xf32>
    %469 = arith.mulf %468, %467 : vector<8x128xf32>
    %cst_163 = arith.constant 5.000000e-01 : f32
    %470 = vector.broadcast %cst_163 : f32 to vector<8x128xf32>
    %471 = arith.addf %469, %470 : vector<8x128xf32>
    %472 = vector.extract_strided_slice %455 {offsets = [0, 256], sizes = [8, 128], strides = [1, 1]} : vector<8x512xf32> to vector<8x128xf32>
    %473 = math.tanh %472 : vector<8x128xf32>
    %474 = vector.extract_strided_slice %455 {offsets = [0, 384], sizes = [8, 128], strides = [1, 1]} : vector<8x512xf32> to vector<8x128xf32>
    %cst_164 = arith.constant 5.000000e-01 : f32
    %475 = vector.broadcast %cst_164 : f32 to vector<8x128xf32>
    %476 = arith.mulf %475, %474 : vector<8x128xf32>
    %477 = math.tanh %476 : vector<8x128xf32>
    %cst_165 = arith.constant 5.000000e-01 : f32
    %478 = vector.broadcast %cst_165 : f32 to vector<8x128xf32>
    %479 = arith.mulf %478, %477 : vector<8x128xf32>
    %cst_166 = arith.constant 5.000000e-01 : f32
    %480 = vector.broadcast %cst_166 : f32 to vector<8x128xf32>
    %481 = arith.addf %479, %480 : vector<8x128xf32>
    %482 = arith.mulf %471, %406 : vector<8x128xf32>
    %483 = arith.mulf %463, %473 : vector<8x128xf32>
    %484 = arith.addf %482, %483 : vector<8x128xf32>
    %485 = math.tanh %484 : vector<8x128xf32>
    %486 = arith.mulf %481, %485 : vector<8x128xf32>
    %487 = arith.index_cast %c5_i32 : i32 to index
    %c0_167 = arith.constant 0 : index
    %c0_168 = arith.constant 0 : index
    %488 = vector.load %arg8[%487, %c0_167, %c0_168] : memref<8x8x128xf32, #tpu.memory_space<vmem>>, vector<1x8x128xf32>
    %489 = vector.shape_cast %488 : vector<1x8x128xf32> to vector<8x128xf32>
    %490 = vector.shape_cast %486 : vector<8x128xf32> to vector<1x8x128xf32>
    tpu.vector_store %arg8[%487, %c0_167, %c0_168], %490 {strides = array<i32>} : memref<8x8x128xf32, #tpu.memory_space<vmem>>, vector<1x8x128xf32>,
    %c6_i32 = arith.constant 6 : i32
    %491 = arith.index_cast %c6_i32 : i32 to index
    %c0_169 = arith.constant 0 : index
    %c0_170 = arith.constant 0 : index
    %492 = vector.load %arg13[%491, %c0_169, %c0_170] : memref<8x8x512xbf16, #tpu.memory_space<vmem>>, vector<1x8x512xbf16>
    %493 = vector.shape_cast %492 : vector<1x8x512xbf16> to vector<8x512xbf16>
    %494 = arith.extf %493 : vector<8x512xbf16> to vector<8x512xf32>
    %495 = arith.truncf %450 : vector<8x128xf32> to vector<8x128xbf16>
    %cst_171 = arith.constant dense<0.000000e+00> : vector<8x512xf32>
    %496 = tpu.matmul %495, %14, %cst_171 {dimension_numbers = #tpu.dot_dimension_numbers<[1], [0], [0], [1], [0, 0, 1, 1], [], []>} : vector<8x128xbf16>, vector<128x512xbf16>, vector<8x512xf32> -> vector<8x512xf32>
    %497 = arith.addf %494, %496 : vector<8x512xf32>
    %498 = vector.extract_strided_slice %497 {offsets = [0, 0], sizes = [8, 128], strides = [1, 1]} : vector<8x512xf32> to vector<8x128xf32>
    %cst_172 = arith.constant 5.000000e-01 : f32
    %499 = vector.broadcast %cst_172 : f32 to vector<8x128xf32>
    %500 = arith.mulf %499, %498 : vector<8x128xf32>
    %501 = math.tanh %500 : vector<8x128xf32>
    %cst_173 = arith.constant 5.000000e-01 : f32
    %502 = vector.broadcast %cst_173 : f32 to vector<8x128xf32>
    %503 = arith.mulf %502, %501 : vector<8x128xf32>
    %cst_174 = arith.constant 5.000000e-01 : f32
    %504 = vector.broadcast %cst_174 : f32 to vector<8x128xf32>
    %505 = arith.addf %503, %504 : vector<8x128xf32>
    %506 = vector.extract_strided_slice %497 {offsets = [0, 128], sizes = [8, 128], strides = [1, 1]} : vector<8x512xf32> to vector<8x128xf32>
    %cst_175 = arith.constant 5.000000e-01 : f32
    %507 = vector.broadcast %cst_175 : f32 to vector<8x128xf32>
    %508 = arith.mulf %507, %506 : vector<8x128xf32>
    %509 = math.tanh %508 : vector<8x128xf32>
    %cst_176 = arith.constant 5.000000e-01 : f32
    %510 = vector.broadcast %cst_176 : f32 to vector<8x128xf32>
    %511 = arith.mulf %510, %509 : vector<8x128xf32>
    %cst_177 = arith.constant 5.000000e-01 : f32
    %512 = vector.broadcast %cst_177 : f32 to vector<8x128xf32>
    %513 = arith.addf %511, %512 : vector<8x128xf32>
    %514 = vector.extract_strided_slice %497 {offsets = [0, 256], sizes = [8, 128], strides = [1, 1]} : vector<8x512xf32> to vector<8x128xf32>
    %515 = math.tanh %514 : vector<8x128xf32>
    %516 = vector.extract_strided_slice %497 {offsets = [0, 384], sizes = [8, 128], strides = [1, 1]} : vector<8x512xf32> to vector<8x128xf32>
    %cst_178 = arith.constant 5.000000e-01 : f32
    %517 = vector.broadcast %cst_178 : f32 to vector<8x128xf32>
    %518 = arith.mulf %517, %516 : vector<8x128xf32>
    %519 = math.tanh %518 : vector<8x128xf32>
    %cst_179 = arith.constant 5.000000e-01 : f32
    %520 = vector.broadcast %cst_179 : f32 to vector<8x128xf32>
    %521 = arith.mulf %520, %519 : vector<8x128xf32>
    %cst_180 = arith.constant 5.000000e-01 : f32
    %522 = vector.broadcast %cst_180 : f32 to vector<8x128xf32>
    %523 = arith.addf %521, %522 : vector<8x128xf32>
    %524 = arith.mulf %513, %448 : vector<8x128xf32>
    %525 = arith.mulf %505, %515 : vector<8x128xf32>
    %526 = arith.addf %524, %525 : vector<8x128xf32>
    %527 = math.tanh %526 : vector<8x128xf32>
    %528 = arith.mulf %523, %527 : vector<8x128xf32>
    %529 = arith.truncf %528 : vector<8x128xf32> to vector<8x128xbf16>
    %530 = arith.truncf %486 : vector<8x128xf32> to vector<8x128xbf16>
    %531 = tpu.concatenate %529, %530 in 1 : vector<8x128xbf16>, vector<8x128xbf16> -> vector<8x256xbf16>
    %cst_181 = arith.constant dense<0.000000e+00> : vector<8x512xf32>
    %532 = tpu.matmul %531, %15, %cst_181 {dimension_numbers = #tpu.dot_dimension_numbers<[1], [0], [0], [1], [0, 0, 1, 1], [], []>} : vector<8x256xbf16>, vector<256x512xbf16>, vector<8x512xf32> -> vector<8x512xf32>
    %533 = arith.addf %532, %18 : vector<8x512xf32>
    %534 = vector.extract_strided_slice %533 {offsets = [0, 0], sizes = [8, 128], strides = [1, 1]} : vector<8x512xf32> to vector<8x128xf32>
    %cst_182 = arith.constant 5.000000e-01 : f32
    %535 = vector.broadcast %cst_182 : f32 to vector<8x128xf32>
    %536 = arith.mulf %535, %534 : vector<8x128xf32>
    %537 = math.tanh %536 : vector<8x128xf32>
    %cst_183 = arith.constant 5.000000e-01 : f32
    %538 = vector.broadcast %cst_183 : f32 to vector<8x128xf32>
    %539 = arith.mulf %538, %537 : vector<8x128xf32>
    %cst_184 = arith.constant 5.000000e-01 : f32
    %540 = vector.broadcast %cst_184 : f32 to vector<8x128xf32>
    %541 = arith.addf %539, %540 : vector<8x128xf32>
    %542 = vector.extract_strided_slice %533 {offsets = [0, 128], sizes = [8, 128], strides = [1, 1]} : vector<8x512xf32> to vector<8x128xf32>
    %cst_185 = arith.constant 5.000000e-01 : f32
    %543 = vector.broadcast %cst_185 : f32 to vector<8x128xf32>
    %544 = arith.mulf %543, %542 : vector<8x128xf32>
    %545 = math.tanh %544 : vector<8x128xf32>
    %cst_186 = arith.constant 5.000000e-01 : f32
    %546 = vector.broadcast %cst_186 : f32 to vector<8x128xf32>
    %547 = arith.mulf %546, %545 : vector<8x128xf32>
    %cst_187 = arith.constant 5.000000e-01 : f32
    %548 = vector.broadcast %cst_187 : f32 to vector<8x128xf32>
    %549 = arith.addf %547, %548 : vector<8x128xf32>
    %550 = vector.extract_strided_slice %533 {offsets = [0, 256], sizes = [8, 128], strides = [1, 1]} : vector<8x512xf32> to vector<8x128xf32>
    %551 = math.tanh %550 : vector<8x128xf32>
    %552 = vector.extract_strided_slice %533 {offsets = [0, 384], sizes = [8, 128], strides = [1, 1]} : vector<8x512xf32> to vector<8x128xf32>
    %cst_188 = arith.constant 5.000000e-01 : f32
    %553 = vector.broadcast %cst_188 : f32 to vector<8x128xf32>
    %554 = arith.mulf %553, %552 : vector<8x128xf32>
    %555 = math.tanh %554 : vector<8x128xf32>
    %cst_189 = arith.constant 5.000000e-01 : f32
    %556 = vector.broadcast %cst_189 : f32 to vector<8x128xf32>
    %557 = arith.mulf %556, %555 : vector<8x128xf32>
    %cst_190 = arith.constant 5.000000e-01 : f32
    %558 = vector.broadcast %cst_190 : f32 to vector<8x128xf32>
    %559 = arith.addf %557, %558 : vector<8x128xf32>
    %560 = arith.mulf %549, %484 : vector<8x128xf32>
    %561 = arith.mulf %541, %551 : vector<8x128xf32>
    %562 = arith.addf %560, %561 : vector<8x128xf32>
    %563 = math.tanh %562 : vector<8x128xf32>
    %564 = arith.mulf %559, %563 : vector<8x128xf32>
    %565 = arith.index_cast %c6_i32 : i32 to index
    %c0_191 = arith.constant 0 : index
    %c0_192 = arith.constant 0 : index
    %566 = vector.load %arg8[%565, %c0_191, %c0_192] : memref<8x8x128xf32, #tpu.memory_space<vmem>>, vector<1x8x128xf32>
    %567 = vector.shape_cast %566 : vector<1x8x128xf32> to vector<8x128xf32>
    %568 = vector.shape_cast %564 : vector<8x128xf32> to vector<1x8x128xf32>
    tpu.vector_store %arg8[%565, %c0_191, %c0_192], %568 {strides = array<i32>} : memref<8x8x128xf32, #tpu.memory_space<vmem>>, vector<1x8x128xf32>,
    %c7_i32 = arith.constant 7 : i32
    %569 = arith.index_cast %c7_i32 : i32 to index
    %c0_193 = arith.constant 0 : index
    %c0_194 = arith.constant 0 : index
    %570 = vector.load %arg13[%569, %c0_193, %c0_194] : memref<8x8x512xbf16, #tpu.memory_space<vmem>>, vector<1x8x512xbf16>
    %571 = vector.shape_cast %570 : vector<1x8x512xbf16> to vector<8x512xbf16>
    %572 = arith.extf %571 : vector<8x512xbf16> to vector<8x512xf32>
    %573 = arith.truncf %528 : vector<8x128xf32> to vector<8x128xbf16>
    %cst_195 = arith.constant dense<0.000000e+00> : vector<8x512xf32>
    %574 = tpu.matmul %573, %14, %cst_195 {dimension_numbers = #tpu.dot_dimension_numbers<[1], [0], [0], [1], [0, 0, 1, 1], [], []>} : vector<8x128xbf16>, vector<128x512xbf16>, vector<8x512xf32> -> vector<8x512xf32>
    %575 = arith.addf %572, %574 : vector<8x512xf32>
    %576 = vector.extract_strided_slice %575 {offsets = [0, 0], sizes = [8, 128], strides = [1, 1]} : vector<8x512xf32> to vector<8x128xf32>
    %cst_196 = arith.constant 5.000000e-01 : f32
    %577 = vector.broadcast %cst_196 : f32 to vector<8x128xf32>
    %578 = arith.mulf %577, %576 : vector<8x128xf32>
    %579 = math.tanh %578 : vector<8x128xf32>
    %cst_197 = arith.constant 5.000000e-01 : f32
    %580 = vector.broadcast %cst_197 : f32 to vector<8x128xf32>
    %581 = arith.mulf %580, %579 : vector<8x128xf32>
    %cst_198 = arith.constant 5.000000e-01 : f32
    %582 = vector.broadcast %cst_198 : f32 to vector<8x128xf32>
    %583 = arith.addf %581, %582 : vector<8x128xf32>
    %584 = vector.extract_strided_slice %575 {offsets = [0, 128], sizes = [8, 128], strides = [1, 1]} : vector<8x512xf32> to vector<8x128xf32>
    %cst_199 = arith.constant 5.000000e-01 : f32
    %585 = vector.broadcast %cst_199 : f32 to vector<8x128xf32>
    %586 = arith.mulf %585, %584 : vector<8x128xf32>
    %587 = math.tanh %586 : vector<8x128xf32>
    %cst_200 = arith.constant 5.000000e-01 : f32
    %588 = vector.broadcast %cst_200 : f32 to vector<8x128xf32>
    %589 = arith.mulf %588, %587 : vector<8x128xf32>
    %cst_201 = arith.constant 5.000000e-01 : f32
    %590 = vector.broadcast %cst_201 : f32 to vector<8x128xf32>
    %591 = arith.addf %589, %590 : vector<8x128xf32>
    %592 = vector.extract_strided_slice %575 {offsets = [0, 256], sizes = [8, 128], strides = [1, 1]} : vector<8x512xf32> to vector<8x128xf32>
    %593 = math.tanh %592 : vector<8x128xf32>
    %594 = vector.extract_strided_slice %575 {offsets = [0, 384], sizes = [8, 128], strides = [1, 1]} : vector<8x512xf32> to vector<8x128xf32>
    %cst_202 = arith.constant 5.000000e-01 : f32
    %595 = vector.broadcast %cst_202 : f32 to vector<8x128xf32>
    %596 = arith.mulf %595, %594 : vector<8x128xf32>
    %597 = math.tanh %596 : vector<8x128xf32>
    %cst_203 = arith.constant 5.000000e-01 : f32
    %598 = vector.broadcast %cst_203 : f32 to vector<8x128xf32>
    %599 = arith.mulf %598, %597 : vector<8x128xf32>
    %cst_204 = arith.constant 5.000000e-01 : f32
    %600 = vector.broadcast %cst_204 : f32 to vector<8x128xf32>
    %601 = arith.addf %599, %600 : vector<8x128xf32>
    %602 = arith.mulf %591, %526 : vector<8x128xf32>
    %603 = arith.mulf %583, %593 : vector<8x128xf32>
    %604 = arith.addf %602, %603 : vector<8x128xf32>
    %605 = math.tanh %604 : vector<8x128xf32>
    %606 = arith.mulf %601, %605 : vector<8x128xf32>
    %607 = arith.truncf %606 : vector<8x128xf32> to vector<8x128xbf16>
    %608 = arith.truncf %564 : vector<8x128xf32> to vector<8x128xbf16>
    %609 = tpu.concatenate %607, %608 in 1 : vector<8x128xbf16>, vector<8x128xbf16> -> vector<8x256xbf16>
    %cst_205 = arith.constant dense<0.000000e+00> : vector<8x512xf32>
    %610 = tpu.matmul %609, %15, %cst_205 {dimension_numbers = #tpu.dot_dimension_numbers<[1], [0], [0], [1], [0, 0, 1, 1], [], []>} : vector<8x256xbf16>, vector<256x512xbf16>, vector<8x512xf32> -> vector<8x512xf32>
    %611 = arith.addf %610, %18 : vector<8x512xf32>
    %612 = vector.extract_strided_slice %611 {offsets = [0, 0], sizes = [8, 128], strides = [1, 1]} : vector<8x512xf32> to vector<8x128xf32>
    %cst_206 = arith.constant 5.000000e-01 : f32
    %613 = vector.broadcast %cst_206 : f32 to vector<8x128xf32>
    %614 = arith.mulf %613, %612 : vector<8x128xf32>
    %615 = math.tanh %614 : vector<8x128xf32>
    %cst_207 = arith.constant 5.000000e-01 : f32
    %616 = vector.broadcast %cst_207 : f32 to vector<8x128xf32>
    %617 = arith.mulf %616, %615 : vector<8x128xf32>
    %cst_208 = arith.constant 5.000000e-01 : f32
    %618 = vector.broadcast %cst_208 : f32 to vector<8x128xf32>
    %619 = arith.addf %617, %618 : vector<8x128xf32>
    %620 = vector.extract_strided_slice %611 {offsets = [0, 128], sizes = [8, 128], strides = [1, 1]} : vector<8x512xf32> to vector<8x128xf32>
    %cst_209 = arith.constant 5.000000e-01 : f32
    %621 = vector.broadcast %cst_209 : f32 to vector<8x128xf32>
    %622 = arith.mulf %621, %620 : vector<8x128xf32>
    %623 = math.tanh %622 : vector<8x128xf32>
    %cst_210 = arith.constant 5.000000e-01 : f32
    %624 = vector.broadcast %cst_210 : f32 to vector<8x128xf32>
    %625 = arith.mulf %624, %623 : vector<8x128xf32>
    %cst_211 = arith.constant 5.000000e-01 : f32
    %626 = vector.broadcast %cst_211 : f32 to vector<8x128xf32>
    %627 = arith.addf %625, %626 : vector<8x128xf32>
    %628 = vector.extract_strided_slice %611 {offsets = [0, 256], sizes = [8, 128], strides = [1, 1]} : vector<8x512xf32> to vector<8x128xf32>
    %629 = math.tanh %628 : vector<8x128xf32>
    %630 = vector.extract_strided_slice %611 {offsets = [0, 384], sizes = [8, 128], strides = [1, 1]} : vector<8x512xf32> to vector<8x128xf32>
    %cst_212 = arith.constant 5.000000e-01 : f32
    %631 = vector.broadcast %cst_212 : f32 to vector<8x128xf32>
    %632 = arith.mulf %631, %630 : vector<8x128xf32>
    %633 = math.tanh %632 : vector<8x128xf32>
    %cst_213 = arith.constant 5.000000e-01 : f32
    %634 = vector.broadcast %cst_213 : f32 to vector<8x128xf32>
    %635 = arith.mulf %634, %633 : vector<8x128xf32>
    %cst_214 = arith.constant 5.000000e-01 : f32
    %636 = vector.broadcast %cst_214 : f32 to vector<8x128xf32>
    %637 = arith.addf %635, %636 : vector<8x128xf32>
    %638 = arith.mulf %627, %562 : vector<8x128xf32>
    %639 = arith.mulf %619, %629 : vector<8x128xf32>
    %640 = arith.addf %638, %639 : vector<8x128xf32>
    %641 = math.tanh %640 : vector<8x128xf32>
    %642 = arith.mulf %637, %641 : vector<8x128xf32>
    %643 = arith.index_cast %c7_i32 : i32 to index
    %c0_215 = arith.constant 0 : index
    %c0_216 = arith.constant 0 : index
    %644 = vector.load %arg8[%643, %c0_215, %c0_216] : memref<8x8x128xf32, #tpu.memory_space<vmem>>, vector<1x8x128xf32>
    %645 = vector.shape_cast %644 : vector<1x8x128xf32> to vector<8x128xf32>
    %646 = vector.shape_cast %642 : vector<8x128xf32> to vector<1x8x128xf32>
    tpu.vector_store %arg8[%643, %c0_215, %c0_216], %646 {strides = array<i32>} : memref<8x8x128xf32, #tpu.memory_space<vmem>>, vector<1x8x128xf32>,
    %c8_i32 = arith.constant 8 : i32
    %c0_217 = arith.constant 0 : index
    %c0_218 = arith.constant 0 : index
    %647 = vector.load %arg9[%c0_217, %c0_218] : memref<8x128xf32, #tpu.memory_space<vmem>>, vector<8x128xf32>
    tpu.vector_store %arg9[%c0_217, %c0_218], %606 {strides = array<i32>} : memref<8x128xf32, #tpu.memory_space<vmem>>, vector<8x128xf32>,
    %c0_219 = arith.constant 0 : index
    %c0_220 = arith.constant 0 : index
    %648 = vector.load %arg10[%c0_219, %c0_220] : memref<8x128xf32, #tpu.memory_space<vmem>>, vector<8x128xf32>
    tpu.vector_store %arg10[%c0_219, %c0_220], %604 {strides = array<i32>} : memref<8x128xf32, #tpu.memory_space<vmem>>, vector<8x128xf32>,
    %c0_221 = arith.constant 0 : index
    %c0_222 = arith.constant 0 : index
    %649 = vector.load %arg11[%c0_221, %c0_222] : memref<8x128xf32, #tpu.memory_space<vmem>>, vector<8x128xf32>
    tpu.vector_store %arg11[%c0_221, %c0_222], %642 {strides = array<i32>} : memref<8x128xf32, #tpu.memory_space<vmem>>, vector<8x128xf32>,
    %c0_223 = arith.constant 0 : index
    %c0_224 = arith.constant 0 : index
    %650 = vector.load %arg12[%c0_223, %c0_224] : memref<8x128xf32, #tpu.memory_space<vmem>>, vector<8x128xf32>
    tpu.vector_store %arg12[%c0_223, %c0_224], %640 {strides = array<i32>} : memref<8x128xf32, #tpu.memory_space<vmem>>, vector<8x128xf32>,
    return
  }
  func.func @transform_0(%arg0: i32, %arg1: i32) -> (i32, i32, i32) {
    %c0_i32 = arith.constant 0 : i32
    %c0_i32_0 = arith.constant 0 : i32
    return %arg1, %arg0, %c0_i32 : i32, i32, i32
  }
  func.func @transform_1(%arg0: i32, %arg1: i32) -> (i32, i32) {
    %c0_i32 = arith.constant 0 : i32
    %c0_i32_0 = arith.constant 0 : i32
    %c0_i32_1 = arith.constant 0 : i32
    return %c0_i32, %c0_i32_0 : i32, i32
  }
  func.func @transform_2(%arg0: i32, %arg1: i32) -> (i32, i32) {
    %c0_i32 = arith.constant 0 : i32
    %c0_i32_0 = arith.constant 0 : i32
    %c0_i32_1 = arith.constant 0 : i32
    return %c0_i32, %c0_i32_0 : i32, i32
  }
  func.func @transform_3(%arg0: i32, %arg1: i32) -> (i32, i32) {
    %c0_i32 = arith.constant 0 : i32
    %c0_i32_0 = arith.constant 0 : i32
    %c0_i32_1 = arith.constant 0 : i32
    return %c0_i32, %c0_i32_0 : i32, i32
  }
  func.func @transform_4(%arg0: i32, %arg1: i32) -> (i32, i32) {
    %c0_i32 = arith.constant 0 : i32
    %c0_i32_0 = arith.constant 0 : i32
    %c0_i32_1 = arith.constant 0 : i32
    return %c0_i32, %c0_i32_0 : i32, i32
  }
  func.func @transform_5(%arg0: i32, %arg1: i32) -> (i32, i32) {
    %c0_i32 = arith.constant 0 : i32
    %c0_i32_0 = arith.constant 0 : i32
    %c0_i32_1 = arith.constant 0 : i32
    return %c0_i32, %c0_i32_0 : i32, i32
  }
  func.func @transform_6(%arg0: i32, %arg1: i32) -> (i32, i32, i32) {
    %c0_i32 = arith.constant 0 : i32
    %c0_i32_0 = arith.constant 0 : i32
    return %arg1, %arg0, %c0_i32 : i32, i32, i32
  }
}

</mosaic_0001>

<bundles_post_ra>
// kernel: tpu_custom_call.1
= control target key start
LH: loop header
LB: loop body
LE: loop exit
PB: predicated region body
PF: predicated region fallthrough
CT: control target
= control target key end

     0   :  { %11 = vsyncpa [#allocation8], 0  ;;  %s4761_s0 = inlined_call_operand.hbm [shape: bf16[8,8,16], index: 0, kind: input, shape index: {}]   ;;  %s4762_s1 = inlined_call_operand.hbm [shape: bf16[16,512], index: 1, kind: input, shape index: {}]   ;;  %s4763_s2 = inlined_call_operand.hbm [shape: bf16[128,512], index: 2, kind: input, shape index: {}]   ;;  %s4764_s3 = inlined_call_operand.hbm [shape: f32[1,512], index: 3, kind: input, shape index: {}]   ;;  %s4765_s4 = inlined_call_operand.hbm [shape: bf16[256,512], index: 4, kind: input, shape index: {}]   ;;  %s4766_s5 = inlined_call_operand.vmem [shape: f32[1,512], index: 5, kind: input, shape index: {}]   ;;  %s4767_s6 = inlined_call_operand.hbm [shape: f32[8,8,128], index: 6, kind: output, shape index: {}]  }
   0x1   :  { %12 = vsyncpa [#allocation11], 0 }
   0x2   :  { %13 = vsyncpa [#allocation14], 0  ;;  %s32_s23 = sshll.u32 %s4762_s1, 4  ;;  %s33_s23 = int_to_ptr.hbm [resolvable:$true] %s32_s23 }
   0x3   :  { %14 = vsyncpa [#allocation9], 0  ;;  %s3495_s24 = smov [#allocation10]   ;;  %s59_s28 = sshll.u32 %s4764_s3, 4  ;;  %s60_s28 = int_to_ptr.hbm [resolvable:$true] %s59_s28 }
   0x4   :  { %s34_s25 = sshll.u32 %s3495_s24, 4  ;;  %s3496_s29 = smov 256   ;;  %s35_s25 = int_to_ptr.vmem [resolvable:$true] %s34_s25 }
   0x5   :  { %s3497_s30 = smov 16   ;;  %s3498_s7 = smov [#allocation13]  }
   0x6   :  { %40 = dma.hbm_to_vmem [thread:$0]  %s33_s23, 512, %s35_s25, [#allocation11], %s3496_s29, %s3496_s29, %s3497_s30  }
   0x7   :  { %s61_s8 = sshll.u32 %s3498_s7, 4  ;;  %s19_s10 = sshll.u32 %s4761_s0, 4  ;;  %s62_s8 = int_to_ptr.vmem [resolvable:$true] %s61_s8  ;;  %s20_s10 = int_to_ptr.hbm [resolvable:$true] %s19_s10 }
   0x8   :  { %64 = dma.hbm_to_vmem [thread:$0]  %s60_s28, 64, %s62_s8, [#allocation14]  }
   0x9   :  { %s3499_s11 = smov [#allocation7]   ;;  %s45_s14 = sshll.u32 %s4763_s2, 4  ;;  %s46_s14 = int_to_ptr.hbm [resolvable:$true] %s45_s14 }
   0xa   :  { %s21_s12 = sshll.u32 %s3499_s11, 4  ;;  %s3500_s15 = smov 64   ;;  %s22_s12 = int_to_ptr.vmem [resolvable:$true] %s21_s12 }
   0xb   :  { %s3501_s16 = smov 4   ;;  %s3502_s17 = smov [#allocation12]  }
   0xc   :  { %27 = dma.hbm_to_vmem [thread:$0]  %s20_s10, 512, %s22_s12, [#allocation8], %s3500_s15, %s3500_s15, %s3501_s16  }
   0xd   :  { %s47_s18 = sshll.u32 %s3502_s17, 4  ;;  %s69_s0 = sshll.u32 %s4765_s4, 4  ;;  %s48_s18 = int_to_ptr.vmem [resolvable:$true] %s47_s18  ;;  %s70_s0 = int_to_ptr.hbm [resolvable:$true] %s69_s0 }
   0xe   :  { %53 = dma.hbm_to_vmem [thread:$0]  %s46_s14, 4096, %s48_s18, [#allocation11], %s3496_s29, %s3496_s29, %s3497_s30  }
   0xf   :  { %s3503_s21 = smov [#allocation15]  }
  0x10   :  { %s71_s22 = sshll.u32 %s3503_s21, 4  ;;  %s72_s22 = int_to_ptr.vmem [resolvable:$true] %s71_s22 }
  0x11   :  { %77 = dma.hbm_to_vmem [thread:$0]  %s70_s0, 8192, %s72_s22, [#allocation14], %s3496_s29, %s3496_s29, %s3497_s30  }
  0x12   :  { %3487 = dma.done.wait [#allocation8], 512  }
  0x13   :  { %3488 = vsyncadd [#allocation8], 4294966784 }
  0x14   :  { %3489 = dma.done.wait [#allocation11], 4608  }
  0x15   :  { %3490 = vsyncadd [#allocation11], 4294962688 }
  0x16   :  { %3491 = dma.done.wait [#allocation14], 8256  }
  0x17   :  { %3492 = vsyncadd [#allocation14], 4294959040  ;;  %v2652_v0 = vld [vmem:[#allocation10] sm:$0xf]  ;;  %v3072_v1 = vld [vmem:[#allocation10 + $0xc] sm:$0xf0] }
  0x18   :  { %v3070_v2 = vld [vmem:[#allocation10 + $0x4] sm:$0xf]  ;;  %v2653_v3 = vor.u32 %v3072_v1, %v2652_v0  ;;  %v2654_v4 = vld [vmem:[#allocation10 + $0x10] sm:$0xf0]  ;;  %v2660_v5 = vld [vmem:[#allocation10 + $0x8] sm:$0xf] }
  0x19   :  { %v3073_v6 = vld [vmem:[#allocation10 + $0x14] sm:$0xf0]  ;;  %v2657_v7 = vor.u32 %v3070_v2, %v2654_v4  ;;  %v3071_v9 = vld [vmem:[#allocation10 + $0xc] sm:$0xf]  ;;  %v2662_v10 = vld [vmem:[#allocation10 + $0x18] sm:$0xf0] }
  0x1a   :  { %v2661_v8 = vor.u32 %v3073_v6, %v2660_v5  ;;  %v3066_v11 = vld [vmem:[#allocation7] sm:$0xff]  ;;  %vm161_vm0 = vcmask 130048   ;;  %181 = vmatpush.bf16.msra.mxu0 %v2653_v3  ;;  %v2665_v12 = vor.u32 %v3071_v9, %v2662_v10  ;;  %v3104_v14 = vld [vmem:[#allocation12 + $0xec] sm:$0xf0]  ;;  %v2798_v17 = vld [vmem:[#allocation12 + $0xf0] sm:$0xf0] }
  0x1b   :  { %v2796_v13 = vld [vmem:[#allocation12 + $0xe0] sm:$0xf]  ;;  %v3102_v15 = vld [vmem:[#allocation12 + $0xe4] sm:$0xf]  ;;  %210 = vmatpush.bf16.msra.mxu1 %v2657_v7  ;;  %v2804_v18 = vld [vmem:[#allocation12 + $0xe8] sm:$0xf] }
  0x1c   :  { %239 = vmatpush.bf16.msra.mxu2 %v2661_v8  ;;  %v3567_v16 = vor.u32 %v3104_v14, %v2796_v13  ;;  %v3105_v19 = vld [vmem:[#allocation12 + $0xf4] sm:$0xf0]  ;;  %268 = vmatpush.bf16.msra.mxu3 %v2665_v12  ;;  %v3569_v20 = vor.u32 %v3102_v15, %v2798_v17  ;;  %v3103_v22 = vld [vmem:[#allocation12 + $0xec] sm:$0xf]  ;;  %v2806_v23 = vld [vmem:[#allocation12 + $0xf8] sm:$0xf0] }
  0x1d   :  { %v3571_v21 = vor.u32 %v3105_v19, %v2804_v18  ;;  %v2780_v24 = vld [vmem:[#allocation12 + $0xc0] sm:$0xf]  ;;  %2666 = vmatmul.msk.bf16.vlgmr.msra.gmra.mxu0 %vm161_vm0, %v3066_v11  ;;  %v3574_v25 = vor.u32 %v3103_v22, %v2806_v23  ;;  %v3100_v26 = vld [vmem:[#allocation12 + $0xcc] sm:$0xf0]  ;;  %v3098_v27 = vld [vmem:[#allocation12 + $0xc4] sm:$0xf] }
  0x1e   :  { %4962 = vst [vmem:[#allocation21_spill] sm:$0xff] %v3569_v20  ;;  %v2782_v28 = vld [vmem:[#allocation12 + $0xd0] sm:$0xf0]  ;;  %2670 = vmatmul.msk.bf16.vlgmr.msra.gmra.mxu1 %vm161_vm0, %v3066_v11  ;;  %v2788_v29 = vld [vmem:[#allocation12 + $0xc8] sm:$0xf]  ;;  %641 = vmatpush.bf16.msrb.mxu0 %v3567_v16  ;;  %v3580_v32 = vor.u32 %v3100_v26, %v2780_v24  ;;  %s2619_s26 = sshll.u32 %s4767_s6, 4  ;;  %s2620_s26 = int_to_ptr.hbm [resolvable:$true] %s2619_s26 }
  0x1f   :  { %2674 = vmatmul.msk.bf16.vlgmr.msra.gmra.mxu2 %vm161_vm0, %v3066_v11  ;;  %v3101_v30 = vld [vmem:[#allocation12 + $0xd4] sm:$0xf0]  ;;  %v3099_v31 = vld [vmem:[#allocation12 + $0xcc] sm:$0xf]  ;;  %2678 = vmatmul.msk.bf16.vlgmr.msra.gmra.mxu3 %vm161_vm0, %v3066_v11  ;;  %v2790_v33 = vld [vmem:[#allocation12 + $0xd8] sm:$0xf0]  ;;  %v3584_v34 = vor.u32 %v3098_v27, %v2782_v28 }
  0x20   :  { %4963 = vst [vmem:[#allocation22_spill] sm:$0xff] %v3580_v32  ;;  %654 = vmatpush.bf16.msrb.mxu1 %v3569_v20  ;;  %667 = vmatpush.bf16.msrb.mxu2 %v3571_v21  ;;  %v3586_v35 = vor.u32 %v3101_v30, %v2788_v29  ;;  %v2764_v36 = vld [vmem:[#allocation12 + $0xa0] sm:$0xf]  ;;  %v3096_v37 = vld [vmem:[#allocation12 + $0xac] sm:$0xf0]  ;;  %v3589_v39 = vor.u32 %v3099_v31, %v2790_v33  ;;  %v3067_v57 = vld [vmem:[#allocation7 + $0x8] sm:$0xff] }
  0x21   :  { %v3094_v38 = vld [vmem:[#allocation12 + $0xa4] sm:$0xf]  ;;  %680 = vmatpush.bf16.msrb.mxu3 %v3574_v25  ;;  %v2766_v40 = vld [vmem:[#allocation12 + $0xb0] sm:$0xf0]  ;;  %v2772_v41 = vld [vmem:[#allocation12 + $0xa8] sm:$0xf]  ;;  %v3592_v45 = vor.u32 %v3096_v37, %v2764_v36 }
  0x22   :  { %4964 = vst [vmem:[#allocation23_spill] sm:$0xff] %v3586_v35  ;;  %v3097_v42 = vld [vmem:[#allocation12 + $0xb4] sm:$0xf0]  ;;  %v3095_v43 = vld [vmem:[#allocation12 + $0xac] sm:$0xf]  ;;  %642 = vmatpush.bf16.msrb.mxu0 %v3580_v32  ;;  %v3596_v46 = vor.u32 %v3094_v38, %v2766_v40  ;;  %s3506_s27 = smov 128  }
  0x23   :  { %4965 = vst [vmem:[#allocation24_spill] sm:$0xff] %v3589_v39  ;;  %v2774_v44 = vld [vmem:[#allocation12 + $0xb8] sm:$0xf0]  ;;  %v3598_v47 = vor.u32 %v3097_v42, %v2772_v41  ;;  %v2748_v48 = vld [vmem:[#allocation12 + $0x80] sm:$0xf]  ;;  %s3507_s28 = smov 8  }
  0x24   :  { %4966 = vst [vmem:[#allocation25_spill] sm:$0xff] %v3592_v45  ;;  %655 = vmatpush.bf16.msrb.mxu1 %v3584_v34  ;;  %668 = vmatpush.bf16.msrb.mxu2 %v3586_v35  ;;  %v3092_v49 = vld [vmem:[#allocation12 + $0x8c] sm:$0xf0]  ;;  %v3090_v50 = vld [vmem:[#allocation12 + $0x84] sm:$0xf]  ;;  %v3601_v51 = vor.u32 %v3095_v43, %v2774_v44 }
  0x25   :  { %4967 = vst [vmem:[#allocation26_spill] sm:$0xff] %v3596_v46  ;;  %681 = vmatpush.bf16.msrb.mxu3 %v3589_v39  ;;  %v2750_v52 = vld [vmem:[#allocation12 + $0x90] sm:$0xf0]  ;;  %v2756_v53 = vld [vmem:[#allocation12 + $0x88] sm:$0xf]  ;;  %v3604_v58 = vor.u32 %v3092_v49, %v2748_v48 }
  0x26   :  { %4968 = vst [vmem:[#allocation27_spill] sm:$0xff] %v3598_v47  ;;  %v3093_v54 = vld [vmem:[#allocation12 + $0x94] sm:$0xf0]  ;;  %v3091_v55 = vld [vmem:[#allocation12 + $0x8c] sm:$0xf]  ;;  %643 = vmatpush.bf16.msrb.mxu0 %v3592_v45  ;;  %v3608_v59 = vor.u32 %v3090_v50, %v2750_v52 }
  0x27   :  { %4969 = vst [vmem:[#allocation28_spill] sm:$0xff] %v3601_v51  ;;  %v2758_v56 = vld [vmem:[#allocation12 + $0x98] sm:$0xf0]  ;;  %v3610_v60 = vor.u32 %v3093_v54, %v2756_v53  ;;  %v2732_v61 = vld [vmem:[#allocation12 + $0x60] sm:$0xf] }
  0x28   :  { %4970 = vst [vmem:[#allocation29_spill] sm:$0xff] %v3604_v58  ;;  %656 = vmatpush.bf16.msrb.mxu1 %v3596_v46  ;;  %669 = vmatpush.bf16.msrb.mxu2 %v3598_v47  ;;  %v3088_v62 = vld [vmem:[#allocation12 + $0x6c] sm:$0xf0]  ;;  %v3086_v63 = vld [vmem:[#allocation12 + $0x64] sm:$0xf]  ;;  %v3613_v0 = vor.u32 %v3091_v55, %v2758_v56 }
  0x29   :  { %4971 = vst [vmem:[#allocation30_spill] sm:$0xff] %v3608_v59  ;;  %682 = vmatpush.bf16.msrb.mxu3 %v3601_v51  ;;  %v2734_v1 = vld [vmem:[#allocation12 + $0x70] sm:$0xf0]  ;;  %v2740_v2 = vld [vmem:[#allocation12 + $0x68] sm:$0xf]  ;;  %v3616_v6 = vor.u32 %v3088_v62, %v2732_v61  ;;  %v3069_v62 = vld [vmem:[#allocation7 + $0x18] sm:$0xff] }
  0x2a   :  { %4972 = vst [vmem:[#allocation31_spill] sm:$0xff] %v3610_v60  ;;  %v3089_v3 = vld [vmem:[#allocation12 + $0x74] sm:$0xf0]  ;;  %v3087_v4 = vld [vmem:[#allocation12 + $0x6c] sm:$0xf]  ;;  %644 = vmatpush.bf16.msrb.mxu0 %v3604_v58  ;;  %v3620_v7 = vor.u32 %v3086_v63, %v2734_v1  ;;  %v4768_v63 = vmov 0.0|0.0  }
  0x2b   :  { %4973 = vst [vmem:[#allocation32_spill] sm:$0xff] %v3613_v0  ;;  %v2742_v5 = vld [vmem:[#allocation12 + $0x78] sm:$0xf0]  ;;  %v3622_v8 = vor.u32 %v3089_v3, %v2740_v2  ;;  %v2716_v9 = vld [vmem:[#allocation12 + $0x40] sm:$0xf] }
  0x2c   :  { %4974 = vst [vmem:[#allocation33_spill] sm:$0xff] %v3616_v6  ;;  %657 = vmatpush.bf16.msrb.mxu1 %v3608_v59  ;;  %670 = vmatpush.bf16.msrb.mxu2 %v3610_v60  ;;  %v3084_v10 = vld [vmem:[#allocation12 + $0x4c] sm:$0xf0]  ;;  %v3082_v11 = vld [vmem:[#allocation12 + $0x44] sm:$0xf]  ;;  %v3626_v12 = vor.u32 %v3087_v4, %v2742_v5 }
  0x2d   :  { %4975 = vst [vmem:[#allocation34_spill] sm:$0xff] %v3620_v7  ;;  %2667 = vmatmul.msk.bf16.gmra.mxu0 %vm161_vm0, %v3067_v57  ;;  %683 = vmatpush.bf16.msrb.mxu3 %v3613_v0  ;;  %v2718_v13 = vld [vmem:[#allocation12 + $0x50] sm:$0xf0]  ;;  %v2724_v14 = vld [vmem:[#allocation12 + $0x48] sm:$0xf]  ;;  %v3632_v19 = vor.u32 %v3084_v10, %v2716_v9 }
  0x2e   :  { %4976 = vst [vmem:[#allocation35_spill] sm:$0xff] %v3622_v8  ;;  %v3085_v15 = vld [vmem:[#allocation12 + $0x54] sm:$0xf0]  ;;  %2671 = vmatmul.msk.bf16.gmra.mxu1 %vm161_vm0, %v3067_v57  ;;  %v3083_v17 = vld [vmem:[#allocation12 + $0x4c] sm:$0xf]  ;;  %645 = vmatpush.bf16.msrb.mxu0 %v3616_v6  ;;  %v3636_v22 = vor.u32 %v3082_v11, %v2718_v13 }
  0x2f   :  { %4977 = vst [vmem:[#allocation36_spill] sm:$0xff] %v3626_v12  ;;  %2675 = vmatmul.msk.bf16.gmra.mxu2 %vm161_vm0, %v3067_v57  ;;  %v2726_v18 = vld [vmem:[#allocation12 + $0x58] sm:$0xf0]  ;;  %2679 = vmatmul.msk.bf16.gmra.mxu3 %vm161_vm0, %v3067_v57  ;;  %v3638_v23 = vor.u32 %v3085_v15, %v2724_v14  ;;  %v2700_v24 = vld [vmem:[#allocation12 + $0x20] sm:$0xf]  ;;  %v3068_v57 = vld [vmem:[#allocation7 + $0x10] sm:$0xff] }
  0x30   :  { %4978 = vst [vmem:[#allocation37_spill] sm:$0xff] %v3632_v19  ;;  %658 = vmatpush.bf16.msrb.mxu1 %v3620_v7  ;;  %671 = vmatpush.bf16.msrb.mxu2 %v3622_v8  ;;  %v3080_v26 = vld [vmem:[#allocation12 + $0x2c] sm:$0xf0]  ;;  %v3078_v27 = vld [vmem:[#allocation12 + $0x24] sm:$0xf]  ;;  %v3641_v28 = vor.u32 %v3083_v17, %v2726_v18 }
  0x31   :  { %4979 = vst [vmem:[#allocation38_spill] sm:$0xff] %v3636_v22  ;;  %684 = vmatpush.bf16.msrb.mxu3 %v3626_v12  ;;  %v2702_v29 = vld [vmem:[#allocation12 + $0x30] sm:$0xf0]  ;;  %v2708_v30 = vld [vmem:[#allocation12 + $0x28] sm:$0xf]  ;;  %v3644_v37 = vor.u32 %v3080_v26, %v2700_v24 }
  0x32   :  { %4980 = vst [vmem:[#allocation39_spill] sm:$0xff] %v3638_v23  ;;  %v3081_v31 = vld [vmem:[#allocation12 + $0x34] sm:$0xf0]  ;;  %v3079_v33 = vld [vmem:[#allocation12 + $0x2c] sm:$0xf]  ;;  %646 = vmatpush.bf16.msrb.mxu0 %v3632_v19  ;;  %v3648_v38 = vor.u32 %v3078_v27, %v2702_v29 }
  0x33   :  { %4981 = vst [vmem:[#allocation40_spill] sm:$0xff] %v3641_v28  ;;  %v2710_v36 = vld [vmem:[#allocation12 + $0x38] sm:$0xf0]  ;;  %v3650_v40 = vor.u32 %v3081_v31, %v2708_v30  ;;  %v2684_v41 = vld [vmem:[#allocation12] sm:$0xf] }
  0x34   :  { %4982 = vst [vmem:[#allocation41_spill] sm:$0xff] %v3644_v37  ;;  %659 = vmatpush.bf16.msrb.mxu1 %v3636_v22  ;;  %672 = vmatpush.bf16.msrb.mxu2 %v3638_v23  ;;  %v3076_v42 = vld [vmem:[#allocation12 + $0xc] sm:$0xf0]  ;;  %v3074_v43 = vld [vmem:[#allocation12 + $0x4] sm:$0xf]  ;;  %v3653_v44 = vor.u32 %v3079_v33, %v2710_v36 }
  0x35   :  { %4983 = vst [vmem:[#allocation42_spill] sm:$0xff] %v3650_v40  ;;  %685 = vmatpush.bf16.msrb.mxu3 %v3641_v28  ;;  %v2686_v48 = vld [vmem:[#allocation12 + $0x10] sm:$0xf0]  ;;  %v2692_v49 = vld [vmem:[#allocation12 + $0x8] sm:$0xf]  ;;  %v3656_v54 = vor.u32 %v3076_v42, %v2684_v41 }
  0x36   :  { %v3077_v50 = vld [vmem:[#allocation12 + $0x14] sm:$0xf0]  ;;  %v3075_v52 = vld [vmem:[#allocation12 + $0xc] sm:$0xf]  ;;  %v2694_v53 = vld [vmem:[#allocation12 + $0x18] sm:$0xf0]  ;;  %647 = vmatpush.bf16.msrb.mxu0 %v3644_v37  ;;  %v3660_v55 = vor.u32 %v3074_v43, %v2686_v48 }
  0x37   :  { %4984 = vst [vmem:[#allocation43_spill] sm:$0xff] %v3656_v54  ;;  %v3662_v56 = vor.u32 %v3077_v50, %v2692_v49  ;;  %v3665_v61 = vor.u32 %v3075_v52, %v2694_v53  ;;  %v3052_v1 = vld [vmem:[#allocation15 + $0x1e0] sm:$0xf]  ;;  %v3168_v2 = vld [vmem:[#allocation15 + $0x1ec] sm:$0xf0] }
  0x38   :  { %660 = vmatpush.bf16.msrb.mxu1 %v3648_v38  ;;  %673 = vmatpush.bf16.msrb.mxu2 %v3650_v40  ;;  %v3166_v3 = vld [vmem:[#allocation15 + $0x1e4] sm:$0xf]  ;;  %v3683_v4 = vor.u32 %v3168_v2, %v3052_v1  ;;  %v3054_v5 = vld [vmem:[#allocation15 + $0x1f0] sm:$0xf0]  ;;  %v3036_v10 = vld [vmem:[#allocation15 + $0x1c0] sm:$0xf] }
  0x39   :  { %4985 = vst [vmem:[#allocation44_spill] sm:$0xff] %v3662_v56  ;;  %686 = vmatpush.bf16.msrb.mxu3 %v3653_v44  ;;  %v3685_v9 = vor.u32 %v3166_v3, %v3054_v5  ;;  %v3164_v11 = vld [vmem:[#allocation15 + $0x1cc] sm:$0xf0]  ;;  %v3162_v13 = vld [vmem:[#allocation15 + $0x1c4] sm:$0xf]  ;;  %v5000_v40 = vmov 0.0|0.0  }
  0x3a   :  { %648 = vmatpush.bf16.msrb.mxu0 %v3656_v54  ;;  %4986 = vst [vmem:[#allocation45_spill] sm:$0xff] %v3683_v4  ;;  %v3689_v14 = vor.u32 %v3164_v11, %v3036_v10  ;;  %v3038_v15 = vld [vmem:[#allocation15 + $0x1d0] sm:$0xf0]  ;;  %v3020_v18 = vld [vmem:[#allocation15 + $0x1a0] sm:$0xf] }
  0x3b   :  { %v3691_v17 = vor.u32 %v3162_v13, %v3038_v15  ;;  %v3160_v24 = vld [vmem:[#allocation15 + $0x1ac] sm:$0xf0]  ;;  %v3158_v26 = vld [vmem:[#allocation15 + $0x1a4] sm:$0xf]  ;;  %v3022_v29 = vld [vmem:[#allocation15 + $0x1b0] sm:$0xf0] }
  0x3c   :  { %661 = vmatpush.bf16.msrb.mxu1 %v3660_v55  ;;  %674 = vmatpush.bf16.msrb.mxu2 %v3662_v56  ;;  %v3695_v27 = vor.u32 %v3160_v24, %v3020_v18  ;;  %v3697_v30 = vor.u32 %v3158_v26, %v3022_v29  ;;  %v3004_v31 = vld [vmem:[#allocation15 + $0x180] sm:$0xf]  ;;  %v3156_v33 = vld [vmem:[#allocation15 + $0x18c] sm:$0xf0]  ;;  %v3154_v36 = vld [vmem:[#allocation15 + $0x184] sm:$0xf] }
  0x3d   :  { %2668 = vmatmul.msk.bf16.gmra.mxu0 %vm161_vm0, %v3068_v57  ;;  %687 = vmatpush.bf16.msrb.mxu3 %v3665_v61  ;;  %v3701_v41 = vor.u32 %v3156_v33, %v3004_v31  ;;  %v3006_v42 = vld [vmem:[#allocation15 + $0x190] sm:$0xf0]  ;;  %v2988_v48 = vld [vmem:[#allocation15 + $0x160] sm:$0xf]  ;;  %v3152_v49 = vld [vmem:[#allocation15 + $0x16c] sm:$0xf0] }
  0x3e   :  { %2672 = vmatmul.msk.bf16.gmra.mxu1 %vm161_vm0, %v3068_v57  ;;  %v3703_v43 = vor.u32 %v3154_v36, %v3006_v42  ;;  %v3150_v50 = vld [vmem:[#allocation15 + $0x164] sm:$0xf]  ;;  %v3707_v52 = vor.u32 %v3152_v49, %v2988_v48  ;;  %v2990_v53 = vld [vmem:[#allocation15 + $0x170] sm:$0xf0]  ;;  %v3148_v1 = vld [vmem:[#allocation15 + $0x14c] sm:$0xf0] }
  0x3f   :  { %2676 = vmatmul.msk.bf16.gmra.mxu2 %vm161_vm0, %v3068_v57  ;;  %2680 = vmatmul.msk.bf16.gmra.mxu3 %vm161_vm0, %v3068_v57  ;;  %v3709_v57 = vor.u32 %v3150_v50, %v2990_v53  ;;  %v3146_v2 = vld [vmem:[#allocation15 + $0x144] sm:$0xf]  ;;  %v2974_v5 = vld [vmem:[#allocation15 + $0x150] sm:$0xf0]  ;;  %v2956_v11 = vld [vmem:[#allocation15 + $0x120] sm:$0xf] }
  0x40   :  { %1050 = vmatpush.bf16.msra.mxu1 %v3683_v4  ;;  %4987 = vst [vmem:[#allocation46_spill] sm:$0xff] %v3707_v52  ;;  %v3715_v10 = vor.u32 %v3146_v2, %v2974_v5  ;;  %v3144_v13 = vld [vmem:[#allocation15 + $0x12c] sm:$0xf0]  ;;  %v3142_v15 = vld [vmem:[#allocation15 + $0x124] sm:$0xf] }
  0x41   :  { %1076 = vmatpush.bf16.msra.mxu3 %v3685_v9  ;;  %4988 = vst [vmem:[#allocation47_spill] sm:$0xff] %v3709_v57  ;;  %v3719_v18 = vor.u32 %v3144_v13, %v2956_v11  ;;  %v2958_v24 = vld [vmem:[#allocation15 + $0x130] sm:$0xf0]  ;;  %v2940_v33 = vld [vmem:[#allocation15 + $0x100] sm:$0xf] }
  0x42   :  { %4990 = vst [vmem:[#allocation49_spill] sm:$0xff] %v3715_v10  ;;  %v3721_v26 = vor.u32 %v3142_v15, %v2958_v24  ;;  %v3140_v36 = vld [vmem:[#allocation15 + $0x10c] sm:$0xf0]  ;;  %v3138_v42 = vld [vmem:[#allocation15 + $0x104] sm:$0xf] }
  0x43   :  { %4991 = vst [vmem:[#allocation50_spill] sm:$0xff] %v3719_v18  ;;  %v3729_v48 = vor.u32 %v3140_v36, %v2940_v33  ;;  %v2942_v49 = vld [vmem:[#allocation15 + $0x110] sm:$0xf0]  ;;  %v3060_v50 = vld [vmem:[#allocation15 + $0x1e8] sm:$0xf] }
  0x44   :  { %1051 = vmatpush.bf16.msra.mxu1 %v3689_v14  ;;  %4992 = vst [vmem:[#allocation51_spill] sm:$0xff] %v3721_v26  ;;  %v3169_v53 = vld [vmem:[#allocation15 + $0x1f4] sm:$0xf0]  ;;  %v3167_v2 = vld [vmem:[#allocation15 + $0x1ec] sm:$0xf] }
  0x45   :  { %1077 = vmatpush.bf16.msra.mxu3 %v3691_v17  ;;  %4993 = vst [vmem:[#allocation52_spill] sm:$0xff] %v3729_v48  ;;  %v3062_v5 = vld [vmem:[#allocation15 + $0x1f8] sm:$0xf0]  ;;  %v2924_v15 = vld [vmem:[#allocation15 + $0xe0] sm:$0xf] }
  0x46   :  { %v290_v11 = vld [vmem:[#allocation13] sm:$0xf]  ;;  %v3736_v13 = vor.u32 %v3167_v2, %v3062_v5  ;;  %v3136_v24 = vld [vmem:[#allocation15 + $0xec] sm:$0xf0]  ;;  %v3134_v33 = vld [vmem:[#allocation15 + $0xe4] sm:$0xf] }
  0x47   :  { %v3741_v36 = vor.u32 %v3136_v24, %v2924_v15  ;;  %v3163_v56 = vld [vmem:[#allocation15 + $0x1cc] sm:$0xf]  ;;  %v3046_v54 = vld [vmem:[#allocation15 + $0x1d8] sm:$0xf0]  ;;  %v3752_v37 = vperm.slane %v290_v11, 1  ;;  %v3771_v47 = vperm.slane %v290_v11, 2 }
  0x48   :  { %1052 = vmatpush.bf16.msra.mxu1 %v3695_v27  ;;  %4996 = vst [vmem:[#allocation55_spill] sm:$0xff] %v3736_v13  ;;  %v3757_v24 = vor.u32 %v3163_v56, %v3046_v54  ;;  %v3130_v19 = vld [vmem:[#allocation15 + $0xc4] sm:$0xf]  ;;  %v2910_v54 = vld [vmem:[#allocation15 + $0xd0] sm:$0xf0] }
  0x49   :  { %1078 = vmatpush.bf16.msra.mxu3 %v3697_v30  ;;  %4997 = vst [vmem:[#allocation56_spill] sm:$0xff] %v3741_v36  ;;  %1037 = vmatpush.bf16.msra.mxu0 %v3741_v36  ;;  %v3028_v56 = vld [vmem:[#allocation15 + $0x1a8] sm:$0xf]  ;;  %v3161_v36 = vld [vmem:[#allocation15 + $0x1b4] sm:$0xf0]  ;;  %v3767_v60 = vor.u32 %v3130_v19, %v2910_v54 }
  0x4a   :  { %5001 = vst [vmem:[#allocation59_spill] sm:$0xff] %v3757_v24  ;;  %v3159_v58 = vld [vmem:[#allocation15 + $0x1ac] sm:$0xf]  ;;  %v3126_v19 = vld [vmem:[#allocation15 + $0xa4] sm:$0xf] }
  0x4b   :  { %5003 = vst [vmem:[#allocation61_spill] sm:$0xff] %v3767_v60  ;;  %v2894_v54 = vld [vmem:[#allocation15 + $0xb0] sm:$0xf0] }
  0x4c   :  { %1053 = vmatpush.bf16.msra.mxu1 %v3701_v41 }
  0x4d   :  { %2669 = vmatmul.msk.bf16.gmra.mxu0 %vm161_vm0, %v3069_v62  ;;  %1079 = vmatpush.bf16.msra.mxu3 %v3703_v43 }
  0x4e   :  { %2673 = vmatmul.msk.bf16.gmra.mxu1 %vm161_vm0, %v3069_v62 }
  0x4f   :  { %2677 = vmatmul.msk.bf16.gmra.mxu2 %vm161_vm0, %v3069_v62  ;;  %2681 = vmatmul.msk.bf16.gmra.mxu3 %vm161_vm0, %v3069_v62  ;;  %v2972_v62 = vld [vmem:[#allocation15 + $0x140] sm:$0xf] }
  0x50   :  { %1054 = vmatpush.bf16.msra.mxu1 %v3707_v52  ;;  %v3713_v3 = vor.u32 %v3148_v1, %v2972_v62  ;;  %v3731_v62 = vor.u32 %v3138_v42, %v2942_v49  ;;  %v3733_v1 = vor.u32 %v3169_v53, %v3060_v50  ;;  %v2926_v42 = vld [vmem:[#allocation15 + $0xf0] sm:$0xf0]  ;;  %v3044_v49 = vld [vmem:[#allocation15 + $0x1c8] sm:$0xf]  ;;  %v3165_v50 = vld [vmem:[#allocation15 + $0x1d4] sm:$0xf0] }
  0x51   :  { %1080 = vmatpush.bf16.msra.mxu3 %v3709_v57  ;;  %v3743_v53 = vperm.slane %v290_v11, 0  ;;  %v3747_v2 = vor.u32 %v3134_v33, %v2926_v42  ;;  %v3749_v5 = vor.u32 %v3165_v50, %v3044_v49  ;;  %v2908_v49 = vld [vmem:[#allocation15 + $0xc0] sm:$0xf]  ;;  %v3132_v50 = vld [vmem:[#allocation15 + $0xcc] sm:$0xf0] }
  0x52   :  { %4989 = vst [vmem:[#allocation48_spill] sm:$0xff] %v3713_v3  ;;  %v3765_v6 = vor.u32 %v3132_v50, %v2908_v49  ;;  %v2892_v49 = vld [vmem:[#allocation15 + $0xa0] sm:$0xf]  ;;  %v3128_v50 = vld [vmem:[#allocation15 + $0xac] sm:$0xf0] }
  0x53   :  { %4994 = vst [vmem:[#allocation53_spill] sm:$0xff] %v3731_v62  ;;  %1063 = vmatpush.bf16.msra.mxu2 %v3747_v2 }
  0x54   :  { %1055 = vmatpush.bf16.msra.mxu1 %v3713_v3  ;;  %4995 = vst [vmem:[#allocation54_spill] sm:$0xff] %v3733_v1  ;;  %1038 = vmatpush.bf16.msra.mxu0 %v3765_v6 }
  0x55   :  { %1081 = vmatpush.bf16.msra.mxu3 %v3715_v10  ;;  %4998 = vst [vmem:[#allocation57_spill] sm:$0xff] %v3747_v2  ;;  %v3030_v2 = vld [vmem:[#allocation15 + $0x1b8] sm:$0xf0] }
  0x56   :  { %4999 = vst [vmem:[#allocation58_spill] sm:$0xff] %v3749_v5 }
  0x57   :  { %5002 = vst [vmem:[#allocation60_spill] sm:$0xff] %v3765_v6  ;;  %1064 = vmatpush.bf16.msra.mxu2 %v3767_v60  ;;  %v3014_v60 = vld [vmem:[#allocation15 + $0x198] sm:$0xf0] }
  0x58   :  { %1056 = vmatpush.bf16.msra.mxu1 %v3719_v18 }
  0x59   :  { %1082 = vmatpush.bf16.msra.mxu3 %v3721_v26 }
  0x5c   :  { %1057 = vmatpush.bf16.msra.mxu1 %v3729_v48 }
  0x5d   :  { %649 = vmatmul.bf16.vlgmr.msrb.gmra.mxu0 %v4768_v63  ;;  %1083 = vmatpush.bf16.msra.mxu3 %v3731_v62 }
  0x5e   :  { %662 = vmatmul.bf16.vlgmr.msrb.gmra.mxu1 %v4768_v63 }
  0x5f   :  { %675 = vmatmul.bf16.vlgmr.msrb.gmra.mxu2 %v4768_v63  ;;  %688 = vmatmul.bf16.vlgmr.msrb.gmra.mxu3 %v4768_v63 }
  0x60   :  { %1102 = vmatpush.bf16.msrb.mxu1 %v3733_v1 }
  0x61   :  { %1128 = vmatpush.bf16.msrb.mxu3 %v3736_v13 }
  0x64   :  { %1103 = vmatpush.bf16.msrb.mxu1 %v3749_v5 }
  0x65   :  { %1129 = vmatpush.bf16.msrb.mxu3 %v3757_v24  ;;  %v3157_v24 = vld [vmem:[#allocation15 + $0x194] sm:$0xf0] }
  0x6e   :  { %1058 = vmatmul.bf16.vlgmr.msra.gmra.mxu1 %v5000_v40 }
  0x6f   :  { %1084 = vmatmul.bf16.vlgmr.msra.gmra.mxu3 %v5000_v40 }
  0x9a   :  { %v3723_v29 = vpop.f32.mrf.mxu0 }
  0x9b   :  { %v3726_v31 = vpop.f32.mrf.mxu1 }
  0xa2   :  { %v3745_v63 = vpop.f32.mrf.mxu2  ;;  %v3754_v23 = vpop.f32.mrf.mxu3 }
  0xa3   :  { %v185_v15 = vpop.f32.mrf.mxu0  ;;  %v214_v42 = vpop.f32.mrf.mxu1 }
  0xa4   :  { %v304_v33 = vadd.f32 %v3743_v53, %v185_v15  ;;  %v305_v8 = vadd.f32 %v3752_v37, %v214_v42  ;;  %v3769_v15 = vor.u32 %v3161_v36, %v3028_v56  ;;  %v3776_v42 = vor.u32 %v3159_v58, %v3030_v2  ;;  %v3012_v56 = vld [vmem:[#allocation15 + $0x188] sm:$0xf]  ;;  %v3155_v2 = vld [vmem:[#allocation15 + $0x18c] sm:$0xf] }
  0xa5   :  { %v3781_v36 = vor.u32 %v3128_v50, %v2892_v49  ;;  %v3787_v58 = vor.u32 %v3157_v24, %v3012_v56  ;;  %v3791_v49 = vor.u32 %v3155_v2, %v3014_v60  ;;  %v2876_v24 = vld [vmem:[#allocation15 + $0x80] sm:$0xf]  ;;  %v2878_v60 = vld [vmem:[#allocation15 + $0x90] sm:$0xf0]  ;;  %v2996_v2 = vld [vmem:[#allocation15 + $0x168] sm:$0xf] }
  0xa6   :  { %5004 = vst [vmem:[#allocation62_spill] sm:$0xff] %v3769_v15  ;;  %v3773_v45 = vpack.c.bf16 %v305_v8, %v304_v33  ;;  %1104 = vmatpush.bf16.msrb.mxu1 %v3769_v15  ;;  %1130 = vmatpush.bf16.msrb.mxu3 %v3776_v42  ;;  %v3783_v8 = vperm.slane %v290_v11, 3 }
  0xa7   :  { %5006 = vst [vmem:[#allocation64_spill] sm:$0xff] %v3776_v42  ;;  %1039 = vmatpush.bf16.msra.mxu0 %v3781_v36 }
  0xa8   :  { %5005 = vst [vmem:[#allocation63_spill] sm:$0xff] %v3773_v45  ;;  %v3785_v45 = vor.u32 %v3126_v19, %v2894_v54  ;;  %v3124_v19 = vld [vmem:[#allocation15 + $0x8c] sm:$0xf0]  ;;  %v3122_v54 = vld [vmem:[#allocation15 + $0x84] sm:$0xf] }
  0xa9   :  { %5007 = vst [vmem:[#allocation65_spill] sm:$0xff] %v3781_v36  ;;  %v3153_v36 = vld [vmem:[#allocation15 + $0x174] sm:$0xf0] }
  0xaa   :  { %v243_v33 = vpop.f32.mrf.mxu2  ;;  %5008 = vst [vmem:[#allocation66_spill] sm:$0xff] %v3785_v45  ;;  %v272_v15 = vpop.f32.mrf.mxu3  ;;  %1065 = vmatpush.bf16.msra.mxu2 %v3785_v45  ;;  %1105 = vmatpush.bf16.msrb.mxu1 %v3787_v58  ;;  %v3805_v35 = vor.u32 %v3153_v36, %v2996_v2  ;;  %v3151_v45 = vld [vmem:[#allocation15 + $0x16c] sm:$0xf]  ;;  %v2862_v36 = vld [vmem:[#allocation15 + $0x70] sm:$0xf0] }
  0xab   :  { %5009 = vst [vmem:[#allocation67_spill] sm:$0xff] %v3787_v58  ;;  %v306_v6 = vadd.f32 %v3771_v47, %v243_v33  ;;  %v188_v5 = vpop.f32.mrf.mxu0  ;;  %v307_v50 = vadd.f32 %v3783_v8, %v272_v15  ;;  %v217_v42 = vpop.f32.mrf.mxu1  ;;  %1131 = vmatpush.bf16.msrb.mxu3 %v3791_v49  ;;  %v3799_v33 = vor.u32 %v3124_v19, %v2876_v24  ;;  %v2998_v58 = vld [vmem:[#allocation15 + $0x178] sm:$0xf0]  ;;  %v2860_v24 = vld [vmem:[#allocation15 + $0x60] sm:$0xf] }
  0xac   :  { %5010 = vst [vmem:[#allocation68_spill] sm:$0xff] %v3791_v49  ;;  %v308_v11 = vadd.f32 %v3743_v53, %v188_v5  ;;  %v309_v56 = vadd.f32 %v3752_v37, %v217_v42  ;;  %v3803_v5 = vor.u32 %v3122_v54, %v2878_v60  ;;  %v3810_v42 = vor.u32 %v3151_v45, %v2998_v58  ;;  %v3120_v19 = vld [vmem:[#allocation15 + $0x6c] sm:$0xf0]  ;;  %v2980_v54 = vld [vmem:[#allocation15 + $0x148] sm:$0xf] }
  0xad   :  { %5011 = vst [vmem:[#allocation69_spill] sm:$0xff] %v3799_v33  ;;  %v3801_v15 = vpack.c.bf16 %v307_v50, %v306_v6  ;;  %1040 = vmatpush.bf16.msra.mxu0 %v3799_v33  ;;  %v3118_v6 = vld [vmem:[#allocation15 + $0x64] sm:$0xf]  ;;  %v3815_v50 = vor.u32 %v3120_v19, %v2860_v24  ;;  %v3149_v60 = vld [vmem:[#allocation15 + $0x154] sm:$0xf0] }
  0xae   :  { %5013 = vst [vmem:[#allocation71_spill] sm:$0xff] %v3803_v5  ;;  %v3807_v32 = vpack.c.bf16 %v309_v56, %v308_v11  ;;  %1066 = vmatpush.bf16.msra.mxu2 %v3803_v5  ;;  %1106 = vmatpush.bf16.msrb.mxu1 %v3805_v35  ;;  %v3817_v56 = vor.u32 %v3118_v6, %v2862_v36  ;;  %v3147_v45 = vld [vmem:[#allocation15 + $0x14c] sm:$0xf]  ;;  %v2982_v58 = vld [vmem:[#allocation15 + $0x158] sm:$0xf0] }
  0xaf   :  { %5012 = vst [vmem:[#allocation70_spill] sm:$0xff] %v3801_v15  ;;  %1132 = vmatpush.bf16.msrb.mxu3 %v3810_v42  ;;  %v3819_v2 = vor.u32 %v3149_v60, %v2980_v54  ;;  %v3823_v33 = vor.u32 %v3147_v45, %v2982_v58  ;;  %v2844_v6 = vld [vmem:[#allocation15 + $0x40] sm:$0xf]  ;;  %v3116_v36 = vld [vmem:[#allocation15 + $0x4c] sm:$0xf0] }
  0xb0   :  { %5014 = vst [vmem:[#allocation72_spill] sm:$0xff] %v3805_v35  ;;  %v3114_v54 = vld [vmem:[#allocation15 + $0x44] sm:$0xf]  ;;  %v2846_v45 = vld [vmem:[#allocation15 + $0x50] sm:$0xf0] }
  0xb1   :  { %5015 = vst [vmem:[#allocation73_spill] sm:$0xff] %v3807_v32  ;;  %1041 = vmatpush.bf16.msra.mxu0 %v3815_v50  ;;  %v2964_v58 = vld [vmem:[#allocation15 + $0x128] sm:$0xf] }
  0xb2   :  { %5016 = vst [vmem:[#allocation74_spill] sm:$0xff] %v3810_v42  ;;  %v246_v11 = vpop.f32.mrf.mxu2  ;;  %v275_v15 = vpop.f32.mrf.mxu3  ;;  %1067 = vmatpush.bf16.msra.mxu2 %v3817_v56  ;;  %1107 = vmatpush.bf16.msrb.mxu1 %v3819_v2 }
  0xb3   :  { %5017 = vst [vmem:[#allocation75_spill] sm:$0xff] %v3815_v50  ;;  %v310_v32 = vadd.f32 %v3771_v47, %v246_v11  ;;  %v190_v5 = vpop.f32.mrf.mxu0  ;;  %v311_v24 = vadd.f32 %v3783_v8, %v275_v15  ;;  %v219_v42 = vpop.f32.mrf.mxu1  ;;  %1133 = vmatpush.bf16.msrb.mxu3 %v3823_v33  ;;  %v3831_v11 = vor.u32 %v3116_v36, %v2844_v6  ;;  %v3145_v50 = vld [vmem:[#allocation15 + $0x134] sm:$0xf0]  ;;  %v2828_v6 = vld [vmem:[#allocation15 + $0x20] sm:$0xf] }
  0xb4   :  { %5018 = vst [vmem:[#allocation76_spill] sm:$0xff] %v3817_v56  ;;  %v312_v19 = vadd.f32 %v3743_v53, %v190_v5  ;;  %v313_v60 = vadd.f32 %v3752_v37, %v219_v42  ;;  %v3835_v5 = vor.u32 %v3114_v54, %v2846_v45  ;;  %v3837_v35 = vor.u32 %v3145_v50, %v2964_v58  ;;  %v3143_v56 = vld [vmem:[#allocation15 + $0x12c] sm:$0xf]  ;;  %v3112_v36 = vld [vmem:[#allocation15 + $0x2c] sm:$0xf0] }
  0xb5   :  { %5019 = vst [vmem:[#allocation77_spill] sm:$0xff] %v3819_v2  ;;  %v3833_v15 = vpack.c.bf16 %v311_v24, %v310_v32  ;;  %v2966_v2 = vld [vmem:[#allocation15 + $0x138] sm:$0xf0]  ;;  %1042 = vmatpush.bf16.msra.mxu0 %v3831_v11  ;;  %v3110_v32 = vld [vmem:[#allocation15 + $0x24] sm:$0xf]  ;;  %v3847_v24 = vor.u32 %v3112_v36, %v2828_v6 }
  0xb6   :  { %5020 = vst [vmem:[#allocation78_spill] sm:$0xff] %v3823_v33  ;;  %v3839_v49 = vpack.c.bf16 %v313_v60, %v312_v19  ;;  %v3842_v42 = vor.u32 %v3143_v56, %v2966_v2  ;;  %1068 = vmatpush.bf16.msra.mxu2 %v3835_v5  ;;  %1108 = vmatpush.bf16.msrb.mxu1 %v3837_v35  ;;  %v2830_v50 = vld [vmem:[#allocation15 + $0x30] sm:$0xf0]  ;;  %v2948_v54 = vld [vmem:[#allocation15 + $0x108] sm:$0xf] }
  0xb7   :  { %5021 = vst [vmem:[#allocation79_spill] sm:$0xff] %v3831_v11  ;;  %v3141_v45 = vld [vmem:[#allocation15 + $0x114] sm:$0xf0]  ;;  %v3849_v60 = vor.u32 %v3110_v32, %v2830_v50  ;;  %v3139_v56 = vld [vmem:[#allocation15 + $0x10c] sm:$0xf] }
  0xb8   :  { %5022 = vst [vmem:[#allocation80_spill] sm:$0xff] %v3833_v15  ;;  %1134 = vmatpush.bf16.msrb.mxu3 %v3842_v42  ;;  %v3851_v58 = vor.u32 %v3141_v45, %v2948_v54  ;;  %v2950_v2 = vld [vmem:[#allocation15 + $0x118] sm:$0xf0]  ;;  %v2812_v32 = vld [vmem:[#allocation15] sm:$0xf] }
  0xb9   :  { %5023 = vst [vmem:[#allocation81_spill] sm:$0xff] %v3835_v5  ;;  %1043 = vmatpush.bf16.msra.mxu0 %v3847_v24  ;;  %v3855_v11 = vor.u32 %v3139_v56, %v2950_v2  ;;  %v3108_v50 = vld [vmem:[#allocation15 + $0xc] sm:$0xf0]  ;;  %v3106_v54 = vld [vmem:[#allocation15 + $0x4] sm:$0xf] }
  0xba   :  { %5024 = vst [vmem:[#allocation82_spill] sm:$0xff] %v3837_v35  ;;  %v248_v19 = vpop.f32.mrf.mxu2  ;;  %v277_v15 = vpop.f32.mrf.mxu3  ;;  %1069 = vmatpush.bf16.msra.mxu2 %v3849_v60  ;;  %1109 = vmatpush.bf16.msrb.mxu1 %v3851_v58  ;;  %v2814_v56 = vld [vmem:[#allocation15 + $0x10] sm:$0xf0]  ;;  %v3137_v2 = vld [vmem:[#allocation15 + $0xf4] sm:$0xf0] }
  0xbb   :  { %5025 = vst [vmem:[#allocation83_spill] sm:$0xff] %v3839_v49  ;;  %v314_v49 = vadd.f32 %v3771_v47, %v248_v19  ;;  %v193_v5 = vpop.f32.mrf.mxu0  ;;  %v315_v6 = vadd.f32 %v3783_v8, %v277_v15  ;;  %v3864_v19 = vor.u32 %v3108_v50, %v2812_v32  ;;  %v2932_v15 = vld [vmem:[#allocation15 + $0xe8] sm:$0xf]  ;;  %v2934_v35 = vld [vmem:[#allocation15 + $0xf8] sm:$0xf0] }
  0xbc   :  { %5026 = vst [vmem:[#allocation84_spill] sm:$0xff] %v3842_v42  ;;  %v316_v36 = vadd.f32 %v3743_v53, %v193_v5  ;;  %v222_v42 = vpop.f32.mrf.mxu1  ;;  %1135 = vmatpush.bf16.msrb.mxu3 %v3855_v11  ;;  %v3131_v32 = vld [vmem:[#allocation15 + $0xcc] sm:$0xf] }
  0xbd   :  { %5027 = vst [vmem:[#allocation85_spill] sm:$0xff] %v3847_v24  ;;  %v317_v45 = vadd.f32 %v3752_v37, %v222_v42  ;;  %v3866_v5 = vpack.c.bf16 %v315_v6, %v314_v49  ;;  %v3871_v24 = vor.u32 %v3137_v2, %v2932_v15  ;;  %1044 = vmatpush.bf16.msra.mxu0 %v3864_v19  ;;  %v2916_v49 = vld [vmem:[#allocation15 + $0xc8] sm:$0xf]  ;;  %v3133_v6 = vld [vmem:[#allocation15 + $0xd4] sm:$0xf0] }
  0xbe   :  { %5028 = vst [vmem:[#allocation86_spill] sm:$0xff] %v3849_v60  ;;  %1180 = vmatpush.bf16.msra.mxu1 %v3569_v20  ;;  %v3869_v60 = vor.u32 %v3106_v54, %v2814_v56 }
  0xbf   :  { %5029 = vst [vmem:[#allocation87_spill] sm:$0xff] %v3851_v58  ;;  %v3135_v58 = vld [vmem:[#allocation15 + $0xec] sm:$0xf]  ;;  %v3873_v42 = vpack.c.bf16 %v317_v45, %v316_v36  ;;  %1110 = vmatmul.bf16.vlgmr.msrb.gmra.mxu1 %v5000_v40  ;;  %v3884_v36 = vor.u32 %v3133_v6, %v2916_v49  ;;  %1136 = vmatmul.bf16.vlgmr.msrb.gmra.mxu3 %v5000_v40  ;;  %v2900_v49 = vld [vmem:[#allocation15 + $0xa8] sm:$0xf] }
  0xc0   :  { %5030 = vst [vmem:[#allocation88_spill] sm:$0xff] %v3855_v11  ;;  %1206 = vmatpush.bf16.msra.mxu3 %v3574_v25  ;;  %v3876_v20 = vor.u32 %v3135_v58, %v2934_v35  ;;  %1070 = vmatpush.bf16.msra.mxu2 %v3869_v60  ;;  %v2918_v35 = vld [vmem:[#allocation15 + $0xd8] sm:$0xf0]  ;;  %v3129_v6 = vld [vmem:[#allocation15 + $0xb4] sm:$0xf0] }
  0xc1   :  { %5031 = vst [vmem:[#allocation89_spill] sm:$0xff] %v3864_v19  ;;  %1089 = vmatpush.bf16.msrb.mxu0 %v3871_v24  ;;  %v3887_v56 = vor.u32 %v3131_v32, %v2918_v35  ;;  %v3899_v40 = vor.u32 %v3129_v6, %v2900_v49  ;;  %v2902_v35 = vld [vmem:[#allocation15 + $0xb8] sm:$0xf0] }
  0xc2   :  { %5032 = vst [vmem:[#allocation90_spill] sm:$0xff] %v3866_v5  ;;  %1181 = vmatpush.bf16.msra.mxu1 %v3584_v34  ;;  %v251_v50 = vpop.f32.mrf.mxu2  ;;  %v280_v54 = vpop.f32.mrf.mxu3  ;;  %v2886_v49 = vld [vmem:[#allocation15 + $0x98] sm:$0xf0] }
  0xc3   :  { %5033 = vst [vmem:[#allocation91_spill] sm:$0xff] %v3869_v60  ;;  %v318_v58 = vadd.f32 %v3771_v47, %v251_v50  ;;  %v195_v45 = vpop.f32.mrf.mxu0  ;;  %v319_v15 = vadd.f32 %v3783_v8, %v280_v54  ;;  %v3127_v50 = vld [vmem:[#allocation15 + $0xac] sm:$0xf] }
  0xc4   :  { %5034 = vst [vmem:[#allocation92_spill] sm:$0xff] %v3871_v24  ;;  %1115 = vmatpush.bf16.msrb.mxu2 %v3876_v20  ;;  %1207 = vmatpush.bf16.msra.mxu3 %v3589_v39  ;;  %v320_v2 = vadd.f32 %v3743_v53, %v195_v45  ;;  %v3903_v45 = vor.u32 %v3127_v50, %v2902_v35  ;;  %v3123_v39 = vld [vmem:[#allocation15 + $0x8c] sm:$0xf] }
  0xc5   :  { %5035 = vst [vmem:[#allocation93_spill] sm:$0xff] %v3873_v42  ;;  %v224_v42 = vpop.f32.mrf.mxu1  ;;  %1090 = vmatpush.bf16.msrb.mxu0 %v3884_v36  ;;  %v3896_v32 = vpack.c.bf16 %v319_v15, %v318_v58  ;;  %v3912_v50 = vor.u32 %v3123_v39, %v2886_v49  ;;  %v2870_v49 = vld [vmem:[#allocation15 + $0x78] sm:$0xf0] }
  0xc6   :  { %5036 = vst [vmem:[#allocation94_spill] sm:$0xff] %v3876_v20  ;;  %v321_v5 = vadd.f32 %v3752_v37, %v224_v42  ;;  %1182 = vmatpush.bf16.msra.mxu1 %v3596_v46  ;;  %v2884_v42 = vld [vmem:[#allocation15 + $0x88] sm:$0xf]  ;;  %v3125_v46 = vld [vmem:[#allocation15 + $0x94] sm:$0xf0] }
  0xc7   :  { %5037 = vst [vmem:[#allocation95_spill] sm:$0xff] %v3884_v36  ;;  %v3909_v15 = vor.u32 %v3125_v46, %v2884_v42  ;;  %v2868_v46 = vld [vmem:[#allocation15 + $0x68] sm:$0xf]  ;;  %v3121_v42 = vld [vmem:[#allocation15 + $0x74] sm:$0xf0] }
  0xc8   :  { %5038 = vst [vmem:[#allocation96_spill] sm:$0xff] %v3887_v56  ;;  %1116 = vmatpush.bf16.msrb.mxu2 %v3887_v56  ;;  %1208 = vmatpush.bf16.msra.mxu3 %v3601_v51  ;;  %v3901_v54 = vpack.c.bf16 %v321_v5, %v320_v2  ;;  %v3923_v39 = vor.u32 %v3121_v42, %v2868_v46  ;;  %v3115_v51 = vld [vmem:[#allocation15 + $0x4c] sm:$0xf] }
  0xc9   :  { %5039 = vst [vmem:[#allocation97_spill] sm:$0xff] %v3896_v32  ;;  %1091 = vmatpush.bf16.msrb.mxu0 %v3899_v40 }
  0xca   :  { %5040 = vst [vmem:[#allocation98_spill] sm:$0xff] %v3899_v40  ;;  %1183 = vmatpush.bf16.msra.mxu1 %v3608_v59  ;;  %v253_v58 = vpop.f32.mrf.mxu2  ;;  %v282_v2 = vpop.f32.mrf.mxu3 }
  0xcb   :  { %5041 = vst [vmem:[#allocation99_spill] sm:$0xff] %v3901_v54  ;;  %v322_v5 = vadd.f32 %v3771_v47, %v253_v58  ;;  %v198_v6 = vpop.f32.mrf.mxu0  ;;  %v323_v35 = vadd.f32 %v3783_v8, %v282_v2  ;;  %v3119_v58 = vld [vmem:[#allocation15 + $0x6c] sm:$0xf] }
  0xcc   :  { %5042 = vst [vmem:[#allocation100_spill] sm:$0xff] %v3903_v45  ;;  %1117 = vmatpush.bf16.msrb.mxu2 %v3903_v45  ;;  %1209 = vmatpush.bf16.msra.mxu3 %v3613_v0  ;;  %v324_v54 = vadd.f32 %v3743_v53, %v198_v6  ;;  %v3927_v6 = vor.u32 %v3119_v58, %v2870_v49 }
  0xcd   :  { %5043 = vst [vmem:[#allocation101_spill] sm:$0xff] %v3909_v15  ;;  %v227_v32 = vpop.f32.mrf.mxu1  ;;  %1092 = vmatpush.bf16.msrb.mxu0 %v3909_v15  ;;  %v3920_v0 = vpack.c.bf16 %v323_v35, %v322_v5  ;;  %v300_v5 = vadd.f32 %v3743_v53, %v3723_v29  ;;  %v301_v35 = vadd.f32 %v3752_v37, %v3726_v31 }
  0xce   :  { %5044 = vst [vmem:[#allocation102_spill] sm:$0xff] %v3912_v50  ;;  %v325_v59 = vadd.f32 %v3752_v37, %v227_v32  ;;  %1184 = vmatpush.bf16.msra.mxu1 %v3620_v7  ;;  %v2852_v32 = vld [vmem:[#allocation15 + $0x48] sm:$0xf]  ;;  %v3117_v7 = vld [vmem:[#allocation15 + $0x54] sm:$0xf0] }
  0xcf   :  { %5045 = vst [vmem:[#allocation103_spill] sm:$0xff] %v3920_v0 }
  0xd0   :  { %1118 = vmatpush.bf16.msrb.mxu2 %v3912_v50  ;;  %1210 = vmatpush.bf16.msra.mxu3 %v3626_v12  ;;  %5046 = vst [vmem:[#allocation104_spill] sm:$0xff] %v3923_v39  ;;  %v3925_v2 = vpack.c.bf16 %v325_v59, %v324_v54  ;;  %v3937_v59 = vor.u32 %v3117_v7, %v2852_v32  ;;  %v2854_v54 = vld [vmem:[#allocation15 + $0x58] sm:$0xf0]  ;;  %v2836_v7 = vld [vmem:[#allocation15 + $0x28] sm:$0xf] }
  0xd1   :  { %5048 = vst [vmem:[#allocation106_spill] sm:$0xff] %v3927_v6  ;;  %1093 = vmatpush.bf16.msrb.mxu0 %v3923_v39  ;;  %v3113_v32 = vld [vmem:[#allocation15 + $0x34] sm:$0xf0] }
  0xd2   :  { %5047 = vst [vmem:[#allocation105_spill] sm:$0xff] %v3925_v2  ;;  %1185 = vmatpush.bf16.msra.mxu1 %v3636_v22  ;;  %v256_v46 = vpop.f32.mrf.mxu2  ;;  %v285_v58 = vpop.f32.mrf.mxu3  ;;  %v3940_v2 = vor.u32 %v3115_v51, %v2854_v54  ;;  %v3951_v51 = vor.u32 %v3113_v32, %v2836_v7 }
  0xd3   :  { %5049 = vst [vmem:[#allocation107_spill] sm:$0xff] %v3937_v59  ;;  %v326_v42 = vadd.f32 %v3771_v47, %v256_v46  ;;  %v200_v49 = vpop.f32.mrf.mxu0  ;;  %v327_v0 = vadd.f32 %v3783_v8, %v285_v58  ;;  %v3111_v46 = vld [vmem:[#allocation15 + $0x2c] sm:$0xf] }
  0xd4   :  { %1119 = vmatpush.bf16.msrb.mxu2 %v3927_v6  ;;  %1211 = vmatpush.bf16.msra.mxu3 %v3641_v28  ;;  %5050 = vst [vmem:[#allocation108_spill] sm:$0xff] %v3940_v2  ;;  %v328_v22 = vadd.f32 %v3743_v53, %v200_v49  ;;  %v332_v28 = vpack.c.bf16 %v301_v35, %v300_v5  ;;  %v2838_v53 = vld [vmem:[#allocation15 + $0x38] sm:$0xf0]  ;;  %v3109_v5 = vld [vmem:[#allocation15 + $0x14] sm:$0xf0] }
  0xd5   :  { %v229_v29 = vpop.f32.mrf.mxu1  ;;  %1094 = vmatpush.bf16.msrb.mxu0 %v3937_v59  ;;  %v3948_v12 = vpack.c.bf16 %v327_v0, %v326_v42  ;;  %5052 = vst [vmem:[#allocation110_spill] sm:$0xff] %v3951_v51  ;;  %v3955_v58 = vor.u32 %v3111_v46, %v2838_v53  ;;  %v303_v49 = vadd.f32 %v3783_v8, %v3754_v23  ;;  %v2820_v0 = vld [vmem:[#allocation15 + $0x8] sm:$0xf]  ;;  %v3107_v35 = vld [vmem:[#allocation15 + $0xc] sm:$0xf] }
  0xd6   :  { %v329_v31 = vadd.f32 %v3752_v37, %v229_v29  ;;  %1186 = vmatpush.bf16.msra.mxu1 %v3648_v38  ;;  %v302_v37 = vadd.f32 %v3771_v47, %v3745_v63  ;;  %v3965_v29 = vor.u32 %v3109_v5, %v2820_v0  ;;  %v477_v32 = vunpack.c.h.bf16 %v332_v28 }
  0xd7   :  { %5051 = vst [vmem:[#allocation109_spill] sm:$0xff] %v3948_v12 }
  0xd8   :  { %1120 = vmatpush.bf16.msrb.mxu2 %v3940_v2  ;;  %1212 = vmatpush.bf16.msra.mxu3 %v3653_v44  ;;  %v3953_v54 = vpack.c.bf16 %v329_v31, %v328_v22  ;;  %5054 = vst [vmem:[#allocation112_spill] sm:$0xff] %v3955_v58  ;;  %v476_v22 = vunpack.c.l.bf16 %v332_v28  ;;  %v2822_v31 = vld [vmem:[#allocation15 + $0x18] sm:$0xf0]  ;;  %v333_v0 = vpack.c.bf16 %v303_v49, %v302_v37 }
  0xd9   :  { %1095 = vmatpush.bf16.msrb.mxu0 %v3951_v51  ;;  %5055 = vst [vmem:[#allocation113_spill] sm:$0xff] %v3965_v29  ;;  %v3969_v46 = vor.u32 %v3107_v35, %v2822_v31 }
  0xda   :  { %5053 = vst [vmem:[#allocation111_spill] sm:$0xff] %v3953_v54  ;;  %1187 = vmatpush.bf16.msra.mxu1 %v3660_v55  ;;  %v258_v42 = vpop.f32.mrf.mxu2  ;;  %v287_v7 = vpop.f32.mrf.mxu3  ;;  %v478_v35 = vunpack.c.l.bf16 %v333_v0 }
  0xdb   :  { %v330_v63 = vadd.f32 %v3771_v47, %v258_v42  ;;  %v650_v23 = vpop.f32.mrf.mxu0  ;;  %5056 = vst [vmem:[#allocation114_spill] sm:$0xff] %v3969_v46  ;;  %v331_v53 = vadd.f32 %v3783_v8, %v287_v7  ;;  %v479_v42 = vunpack.c.h.bf16 %v333_v0 }
  0xdc   :  { %1121 = vmatpush.bf16.msrb.mxu2 %v3955_v58  ;;  %1213 = vmatpush.bf16.msra.mxu3 %v3665_v61  ;;  %v693_v54 = vadd.f32 %v650_v23, %v476_v22 }
  0xdd   :  { %v663_v12 = vpop.f32.mrf.mxu1  ;;  %1096 = vmatpush.bf16.msrb.mxu0 %v3965_v29 }
  0xde   :  { %1256 = vmatpush.bf16.msrb.mxu1 %v3683_v4  ;;  %v694_v5 = vadd.f32 %v663_v12, %v477_v32  ;;  %v3975_v4 = vpack.c.bf16 %v331_v53, %v330_v63  ;;  %v697_v47 = vmul.f32 0.5, %v693_v54 }
  0xe0   :  { %1282 = vmatpush.bf16.msrb.mxu3 %v3685_v9  ;;  %1122 = vmatpush.bf16.msrb.mxu2 %v3969_v46  ;;  %5057 = vst [vmem:[#allocation115_spill] sm:$0xff] %v3975_v4  ;;  %v701_v28 = vmul.f32 0.5, %v694_v5  ;;  %3183 = vtanh.f32 %v697_v47  ;;  %v5074_v4 = vld [vmem:[#allocation37_spill] sm:$0xff] }
  0xe2   :  { %1257 = vmatpush.bf16.msrb.mxu1 %v3689_v14  ;;  %3185 = vtanh.f32 %v701_v28  ;;  %v676_v8 = vpop.f32.mrf.mxu2  ;;  %v689_v37 = vpop.f32.mrf.mxu3 }
  0xe3   :  { %v695_v22 = vadd.f32 %v676_v8, %v478_v35  ;;  %v652_v12 = vpop.f32.mrf.mxu0  ;;  %v696_v49 = vadd.f32 %v689_v37, %v479_v42 }
  0xe4   :  { %1283 = vmatpush.bf16.msrb.mxu3 %v3691_v17 }
  0xe5   :  { %v665_v31 = vpop.f32.mrf.mxu1  ;;  %3187 = vtanh.f32 %v695_v22  ;;  %v706_v63 = vmul.f32 0.5, %v696_v49 }
  0xe6   :  { %1258 = vmatpush.bf16.msrb.mxu1 %v3695_v27  ;;  %v3184_v54 = vpop.eup %3183 }
  0xe7   :  { %v699_v23 = vmul.f32 0.5, %v3184_v54  ;;  %3189 = vtanh.f32 %v706_v63  ;;  %v5058_v63 = vld [vmem:[#allocation22_spill] sm:$0xff] }
  0xe8   :  { %1284 = vmatpush.bf16.msrb.mxu3 %v3697_v30  ;;  %v3186_v7 = vpop.eup %3185 }
  0xe9   :  { %v703_v32 = vmul.f32 0.5, %v3186_v7  ;;  %v700_v53 = vadd.f32 0.5, %v699_v23  ;;  %v5059_v7 = vld [vmem:[#allocation23_spill] sm:$0xff]  ;;  %v5060_v23 = vld [vmem:[#allocation58_spill] sm:$0xff] }
  0xea   :  { %1259 = vmatpush.bf16.msrb.mxu1 %v3701_v41  ;;  %v678_v5 = vpop.f32.mrf.mxu2  ;;  %v691_v28 = vpop.f32.mrf.mxu3 }
  0xeb   :  { %v704_v0 = vadd.f32 0.5, %v703_v32  ;;  %v3188_v47 = vpop.eup %3187  ;;  %v5061_v32 = vld [vmem:[#allocation59_spill] sm:$0xff]  ;;  %v5064_v5 = vld [vmem:[#allocation62_spill] sm:$0xff]  ;;  %v5066_v28 = vld [vmem:[#allocation29_spill] sm:$0xff] }
  0xec   :  { %1285 = vmatpush.bf16.msrb.mxu3 %v3703_v43  ;;  %v711_v8 = vmul.f32 %v3188_v47, %v700_v53  ;;  %v5062_v53 = vld [vmem:[#allocation25_spill] sm:$0xff]  ;;  %v5065_v47 = vld [vmem:[#allocation64_spill] sm:$0xff] }
  0xed   :  { %v710_v35 = vmul.f32 0.0, %v704_v0  ;;  %v3190_v42 = vpop.eup %3189  ;;  %v5063_v0 = vld [vmem:[#allocation27_spill] sm:$0xff] }
  0xee   :  { %1260 = vmatpush.bf16.msrb.mxu1 %v3707_v52  ;;  %v708_v37 = vmul.f32 0.5, %v3190_v42  ;;  %v5069_v42 = vld [vmem:[#allocation68_spill] sm:$0xff] }
  0xef   :  { %v3985_v22 = vadd.f32 %v711_v8, %v710_v35  ;;  %v5067_v35 = vld [vmem:[#allocation31_spill] sm:$0xff] }
  0xf0   :  { %1286 = vmatpush.bf16.msrb.mxu3 %v3709_v57  ;;  %v709_v12 = vadd.f32 0.5, %v708_v37  ;;  %v5068_v8 = vld [vmem:[#allocation67_spill] sm:$0xff]  ;;  %v5070_v37 = vld [vmem:[#allocation33_spill] sm:$0xff] }
  0xf1   :  { %3191 = vtanh.f32 %v3985_v22 }
  0xf2   :  { %1261 = vmatpush.bf16.msrb.mxu1 %v3713_v3 }
  0xf4   :  { %1287 = vmatpush.bf16.msrb.mxu3 %v3715_v10  ;;  %v5091_v10 = vld [vmem:[#allocation71_spill] sm:$0xff] }
  0xf6   :  { %1262 = vmatpush.bf16.msrb.mxu1 %v3719_v18  ;;  %v5090_v18 = vld [vmem:[#allocation69_spill] sm:$0xff] }
  0xf7   :  { %v3192_v49 = vpop.eup %3191 }
  0xf8   :  { %1288 = vmatpush.bf16.msrb.mxu3 %v3721_v26  ;;  %v714_v31 = vmul.f32 %v3192_v49, %v709_v12  ;;  %v5071_v12 = vld [vmem:[#allocation35_spill] sm:$0xff]  ;;  %v5072_v49 = vld [vmem:[#allocation72_spill] sm:$0xff]  ;;  %v1085_v26 = vpop.f32.mrf.mxu3 }
  0xfa   :  { %1263 = vmatpush.bf16.msrb.mxu1 %v3729_v48  ;;  %v715_v54 = vpack.c.bf16 %v714_v31, %v714_v31  ;;  %v5073_v31 = vld [vmem:[#allocation74_spill] sm:$0xff] }
  0xfb   :  { %v5089_v48 = vld [vmem:[#allocation66_spill] sm:$0xff] }
  0xfc   :  { %1289 = vmatpush.bf16.msrb.mxu3 %v3731_v62  ;;  %1045 = vmatmul.bf16.vlgmr.msra.gmra.mxu0 %v715_v54  ;;  %v5085_v62 = vld [vmem:[#allocation87_spill] sm:$0xff] }
  0xfd   :  { %1071 = vmatmul.bf16.vlgmr.msra.gmra.mxu2 %v715_v54  ;;  %1188 = vmatmul.bf16.vlgmr.msra.gmra.mxu1 %v715_v54 }
  0xfe   :  { %1214 = vmatmul.bf16.vlgmr.msra.gmra.mxu3 %v715_v54  ;;  %1167 = vmatpush.bf16.msra.mxu0 %v3567_v16 }
  0xff   :  { %1193 = vmatpush.bf16.msra.mxu2 %v3571_v21  ;;  %1308 = vmatpush.bf16.msra.mxu1 %v3733_v1  ;;  %v5084_v1 = vld [vmem:[#allocation57_spill] sm:$0xff] }
 0x100   :  { %1334 = vmatpush.bf16.msra.mxu3 %v3736_v13  ;;  %v5081_v13 = vld [vmem:[#allocation43_spill] sm:$0xff] }
 0x102   :  { %1168 = vmatpush.bf16.msra.mxu0 %v5058_v63 }
 0x103   :  { %1194 = vmatpush.bf16.msra.mxu2 %v5059_v7  ;;  %1309 = vmatpush.bf16.msra.mxu1 %v5060_v23  ;;  %v5080_v23 = vld [vmem:[#allocation84_spill] sm:$0xff] }
 0x104   :  { %1335 = vmatpush.bf16.msra.mxu3 %v5061_v32  ;;  %v5079_v32 = vld [vmem:[#allocation82_spill] sm:$0xff] }
 0x106   :  { %1169 = vmatpush.bf16.msra.mxu0 %v5062_v53 }
 0x107   :  { %1195 = vmatpush.bf16.msra.mxu2 %v5063_v0  ;;  %1310 = vmatpush.bf16.msra.mxu1 %v5064_v5  ;;  %v5076_v5 = vld [vmem:[#allocation77_spill] sm:$0xff] }
 0x108   :  { %1336 = vmatpush.bf16.msra.mxu3 %v5065_v47  ;;  %v5075_v47 = vld [vmem:[#allocation39_spill] sm:$0xff] }
 0x10a   :  { %1170 = vmatpush.bf16.msra.mxu0 %v5066_v28 }
 0x10b   :  { %1196 = vmatpush.bf16.msra.mxu2 %v5067_v35  ;;  %1311 = vmatpush.bf16.msra.mxu1 %v5068_v8  ;;  %v5077_v8 = vld [vmem:[#allocation41_spill] sm:$0xff] }
 0x10c   :  { %1337 = vmatpush.bf16.msra.mxu3 %v5069_v42  ;;  %1097 = vmatmul.bf16.vlgmr.msrb.gmra.mxu0 %v715_v54  ;;  %v5078_v42 = vld [vmem:[#allocation42_spill] sm:$0xff] }
 0x10d   :  { %1123 = vmatmul.bf16.vlgmr.msrb.gmra.mxu2 %v715_v54 }
 0x10e   :  { %1171 = vmatpush.bf16.msra.mxu0 %v5070_v37 }
 0x10f   :  { %1197 = vmatpush.bf16.msra.mxu2 %v5071_v12  ;;  %1312 = vmatpush.bf16.msra.mxu1 %v5072_v49  ;;  %v5082_v49 = vld [vmem:[#allocation44_spill] sm:$0xff] }
 0x110   :  { %1338 = vmatpush.bf16.msra.mxu3 %v5073_v31  ;;  %v5083_v31 = vld [vmem:[#allocation56_spill] sm:$0xff] }
 0x112   :  { %1172 = vmatpush.bf16.msra.mxu0 %v5074_v4 }
 0x113   :  { %1198 = vmatpush.bf16.msra.mxu2 %v5075_v47  ;;  %1313 = vmatpush.bf16.msra.mxu1 %v5076_v5  ;;  %v5087_v5 = vld [vmem:[#allocation61_spill] sm:$0xff] }
 0x114   :  { %1339 = vmatpush.bf16.msra.mxu3 %v3823_v33  ;;  %v5086_v33 = vld [vmem:[#allocation60_spill] sm:$0xff] }
 0x116   :  { %1173 = vmatpush.bf16.msra.mxu0 %v5077_v8 }
 0x117   :  { %1199 = vmatpush.bf16.msra.mxu2 %v5078_v42  ;;  %1314 = vmatpush.bf16.msra.mxu1 %v5079_v32  ;;  %v1059_v32 = vpop.f32.mrf.mxu1 }
 0x118   :  { %1340 = vmatpush.bf16.msra.mxu3 %v5080_v23  ;;  %v5088_v23 = vld [vmem:[#allocation65_spill] sm:$0xff] }
 0x11a   :  { %1174 = vmatpush.bf16.msra.mxu0 %v5081_v13 }
 0x11b   :  { %1200 = vmatpush.bf16.msra.mxu2 %v5082_v49  ;;  %1315 = vmatpush.bf16.msra.mxu1 %v5085_v62  ;;  %v5092_v62 = vld [vmem:[#allocation75_spill] sm:$0xff] }
 0x11c   :  { %1341 = vmatpush.bf16.msra.mxu3 %v3855_v11  ;;  %v5093_v11 = vld [vmem:[#allocation76_spill] sm:$0xff] }
 0x11d   :  { %1175 = vmatmul.bf16.vlgmr.msra.gmra.mxu0 %v715_v54 }
 0x11e   :  { %1243 = vmatpush.bf16.msrb.mxu0 %v5083_v31  ;;  %1201 = vmatmul.bf16.vlgmr.msra.gmra.mxu2 %v715_v54  ;;  %v1087_v54 = vpop.f32.mrf.mxu3 }
 0x11f   :  { %1269 = vmatpush.bf16.msrb.mxu2 %v5084_v1  ;;  %v1061_v3 = vpop.f32.mrf.mxu1  ;;  %v5094_v1 = vld [vmem:[#allocation79_spill] sm:$0xff] }
 0x122   :  { %1244 = vmatpush.bf16.msrb.mxu0 %v5086_v33  ;;  %v5095_v33 = vld [vmem:[#allocation81_spill] sm:$0xff] }
 0x123   :  { %1270 = vmatpush.bf16.msrb.mxu2 %v5087_v5  ;;  %v5096_v5 = vld [vmem:[#allocation85_spill] sm:$0xff] }
 0x126   :  { %1245 = vmatpush.bf16.msrb.mxu0 %v5088_v23  ;;  %v5097_v23 = vld [vmem:[#allocation86_spill] sm:$0xff] }
 0x127   :  { %1271 = vmatpush.bf16.msrb.mxu2 %v5089_v48 }
 0x12a   :  { %1246 = vmatpush.bf16.msrb.mxu0 %v5090_v18 }
 0x12b   :  { %1272 = vmatpush.bf16.msrb.mxu2 %v5091_v10 }
 0x12e   :  { %1247 = vmatpush.bf16.msrb.mxu0 %v5092_v62 }
 0x12f   :  { %1273 = vmatpush.bf16.msrb.mxu2 %v5093_v11 }
 0x132   :  { %1248 = vmatpush.bf16.msrb.mxu0 %v5094_v1 }
 0x133   :  { %1274 = vmatpush.bf16.msrb.mxu2 %v5095_v33 }
 0x136   :  { %1249 = vmatpush.bf16.msrb.mxu0 %v5096_v5 }
 0x137   :  { %1275 = vmatpush.bf16.msrb.mxu2 %v5097_v23 }
 0x13a   :  { %1250 = vmatpush.bf16.msrb.mxu0 %v3864_v19 }
 0x13b   :  { %1276 = vmatpush.bf16.msrb.mxu2 %v3869_v60 }
 0x13c   :  { %v1111_v3 = vpop.f32.mrf.mxu1 }
 0x13e   :  { %1295 = vmatpush.bf16.msra.mxu0 %v3871_v24 }
 0x13f   :  { %1321 = vmatpush.bf16.msra.mxu2 %v3876_v20 }
 0x142   :  { %1296 = vmatpush.bf16.msra.mxu0 %v3884_v36  ;;  %v1137_v19 = vpop.f32.mrf.mxu3 }
 0x143   :  { %1322 = vmatpush.bf16.msra.mxu2 %v3887_v56 }
 0x144   :  { %v1113_v54 = vpop.f32.mrf.mxu1 }
 0x145   :  { %v460_v54 = vld [vmem:[%s4766_s5] sm:$0xf]  ;;  %s3505_s5 = smov [#allocation16]  }
 0x146   :  { %1297 = vmatpush.bf16.msra.mxu0 %v3899_v40  ;;  %v4067_v20 = vperm.slane %v460_v54, 2  ;;  %v4070_v5 = vperm.slane %v460_v54, 3  ;;  %s2617_s23 = sshll.u32 %s3505_s5, 4  ;;  %s2618_s23 = int_to_ptr.vmem [resolvable:$true] %s2617_s23 }
 0x147   :  { %1323 = vmatpush.bf16.msra.mxu2 %v3903_v45 }
 0x148   :  { %5100 = vst [vmem:[#allocation25_spill] sm:$0xff] %v4067_v20 }
 0x14a   :  { %1298 = vmatpush.bf16.msra.mxu0 %v3909_v15  ;;  %v1139_v56 = vpop.f32.mrf.mxu3 }
 0x14b   :  { %1324 = vmatpush.bf16.msra.mxu2 %v3912_v50 }
 0x14e   :  { %1299 = vmatpush.bf16.msra.mxu0 %v3923_v39  ;;  %v4061_v39 = vperm.slane %v460_v54, 0 }
 0x14f   :  { %1325 = vmatpush.bf16.msra.mxu2 %v3927_v6 }
 0x150   :  { %5098 = vst [vmem:[#allocation22_spill] sm:$0xff] %v4061_v39 }
 0x152   :  { %1300 = vmatpush.bf16.msra.mxu0 %v3937_v59 }
 0x153   :  { %1326 = vmatpush.bf16.msra.mxu2 %v3940_v2  ;;  %v4064_v2 = vperm.slane %v460_v54, 1 }
 0x155   :  { %5099 = vst [vmem:[#allocation23_spill] sm:$0xff] %v4064_v2 }
 0x156   :  { %1301 = vmatpush.bf16.msra.mxu0 %v3951_v51 }
 0x157   :  { %1327 = vmatpush.bf16.msra.mxu2 %v3955_v58 }
 0x15a   :  { %1302 = vmatpush.bf16.msra.mxu0 %v3965_v29 }
 0x15b   :  { %1328 = vmatpush.bf16.msra.mxu2 %v3969_v46 }
 0x179   :  { %v1046_v6 = vpop.f32.mrf.mxu0 }
 0x17a   :  { %v1047_v59 = vadd.f32 %v1046_v6, %v4061_v39  ;;  %v1189_v50 = vpop.f32.mrf.mxu1 }
 0x17c   :  { %v1060_v56 = vadd.f32 %v1059_v32, %v1047_v59 }
 0x17e   :  { %v1141_v29 = vmul.f32 0.5, %v1060_v56  ;;  %v5101_v56 = vld [vmem:[#allocation63_spill] sm:$0xff] }
 0x180   :  { %v1072_v51 = vpop.f32.mrf.mxu2  ;;  %3193 = vtanh.f32 %v1141_v29 }
 0x181   :  { %v1073_v58 = vadd.f32 %v1072_v51, %v4064_v2  ;;  %v1215_v15 = vpop.f32.mrf.mxu3  ;;  %v1048_v45 = vpop.f32.mrf.mxu0 }
 0x182   :  { %v1191_v40 = vpop.f32.mrf.mxu1  ;;  %v1164_v45 = vunpack.c.h.bf16 %v5101_v56 }
 0x183   :  { %v1086_v46 = vadd.f32 %v1085_v26, %v1073_v58 }
 0x184   :  { %v1220_v58 = vadd.f32 %v1189_v50, %v1164_v45  ;;  %v1163_v50 = vunpack.c.l.bf16 %v5101_v56 }
 0x185   :  { %v1145_v36 = vmul.f32 0.5, %v1086_v46 }
 0x186   :  { %v3194_v23 = vpop.eup %3193 }
 0x187   :  { %3195 = vtanh.f32 %v1145_v36  ;;  %v1143_v26 = vmul.f32 0.5, %v3194_v23 }
 0x188   :  { %v1074_v24 = vpop.f32.mrf.mxu2 }
 0x189   :  { %v1217_v60 = vpop.f32.mrf.mxu3  ;;  %v1098_v6 = vpop.f32.mrf.mxu0  ;;  %v1144_v46 = vadd.f32 0.5, %v1143_v26 }
 0x18a   :  { %v1099_v39 = vadd.f32 %v1098_v6, %v4067_v20  ;;  %v1227_v6 = vmul.f32 0.5, %v1220_v58 }
 0x18c   :  { %v1112_v32 = vadd.f32 %v1111_v3, %v1099_v39 }
 0x18d   :  { %v3196_v59 = vpop.eup %3195 }
 0x18e   :  { %v1147_v51 = vmul.f32 0.5, %v3196_v59  ;;  %3197 = vtanh.f32 %v1112_v32 }
 0x190   :  { %v1124_v40 = vpop.f32.mrf.mxu2  ;;  %v1148_v29 = vadd.f32 0.5, %v1147_v51  ;;  %v5102_v51 = vld [vmem:[#allocation70_spill] sm:$0xff] }
 0x191   :  { %v1125_v36 = vadd.f32 %v1124_v40, %v4070_v5  ;;  %v1100_v24 = vpop.f32.mrf.mxu0 }
 0x192   :  { %v1154_v33 = vmul.f32 0.0, %v1148_v29 }
 0x193   :  { %v1138_v60 = vadd.f32 %v1137_v19, %v1125_v36  ;;  %v1166_v19 = vunpack.c.h.bf16 %v5102_v51 }
 0x194   :  { %v3198_v2 = vpop.eup %3197 }
 0x195   :  { %v1150_v20 = vmul.f32 0.5, %v1138_v60  ;;  %v1155_v39 = vmul.f32 %v3198_v2, %v1144_v46  ;;  %v1222_v58 = vadd.f32 %v1215_v15, %v1166_v19 }
 0x197   :  { %3199 = vtanh.f32 %v1150_v20  ;;  %v4074_v3 = vadd.f32 %v1155_v39, %v1154_v33  ;;  %v1165_v20 = vunpack.c.l.bf16 %v5102_v51  ;;  %v1232_v46 = vmul.f32 0.5, %v1222_v58  ;;  %v5105_v58 = vld [vmem:[#allocation26_spill] sm:$0xff] }
 0x198   :  { %v1126_v54 = vpop.f32.mrf.mxu2  ;;  %3201 = vtanh.f32 %v1227_v6 }
 0x199   :  { %3203 = vtanh.f32 %v4074_v3 }
 0x19a   :  { %v1176_v23 = vpop.f32.mrf.mxu0 }
 0x19b   :  { %v1219_v59 = vadd.f32 %v1176_v23, %v1163_v50  ;;  %v5103_v50 = vld [vmem:[#allocation21_spill] sm:$0xff] }
 0x19d   :  { %v3200_v32 = vpop.eup %3199  ;;  %v1223_v26 = vmul.f32 0.5, %v1219_v59 }
 0x19e   :  { %v1152_v45 = vmul.f32 0.5, %v3200_v32  ;;  %v3202_v40 = vpop.eup %3201 }
 0x19f   :  { %v3204_v36 = vpop.eup %3203  ;;  %3205 = vtanh.f32 %v1223_v26  ;;  %v1229_v60 = vmul.f32 0.5, %v3202_v40 }
 0x1a0   :  { %v1153_v2 = vadd.f32 0.5, %v1152_v45  ;;  %v5104_v45 = vld [vmem:[#allocation24_spill] sm:$0xff] }
 0x1a1   :  { %v1202_v33 = vpop.f32.mrf.mxu2  ;;  %v1230_v54 = vadd.f32 0.5, %v1229_v60  ;;  %v5109_v60 = vld [vmem:[#allocation34_spill] sm:$0xff] }
 0x1a2   :  { %v1158_v29 = vmul.f32 %v3204_v36, %v1153_v2  ;;  %v1221_v24 = vadd.f32 %v1202_v33, %v1165_v20  ;;  %v1178_v56 = vpop.f32.mrf.mxu0  ;;  %v5106_v36 = vld [vmem:[#allocation28_spill] sm:$0xff]  ;;  %v5107_v20 = vld [vmem:[#allocation30_spill] sm:$0xff] }
 0x1a3   :  { %v1236_v51 = vmul.f32 %v1230_v54, %v3985_v22  ;;  %v5108_v33 = vld [vmem:[#allocation32_spill] sm:$0xff] }
 0x1a4   :  { %1159 = vst [vmem:[#allocation16] sm:$0xff] %v1158_v29  ;;  %3207 = vtanh.f32 %v1221_v24  ;;  %v1242_v6 = vpack.c.bf16 %v1158_v29, %v1158_v29  ;;  %v5112_v54 = vld [vmem:[#allocation40_spill] sm:$0xff] }
 0x1a5   :  { %v3206_v39 = vpop.eup %3205  ;;  %3209 = vtanh.f32 %v1232_v46  ;;  %v5110_v46 = vld [vmem:[#allocation36_spill] sm:$0xff] }
 0x1a6   :  { %1264 = vmatmul.bf16.vlgmr.msrb.gmra.mxu1 %v1242_v6  ;;  %1290 = vmatmul.bf16.vlgmr.msrb.gmra.mxu3 %v1242_v6  ;;  %v1225_v15 = vmul.f32 0.5, %v3206_v39  ;;  %v5111_v39 = vld [vmem:[#allocation38_spill] sm:$0xff] }
 0x1a7   :  { %1387 = vmatpush.bf16.msrb.mxu1 %v5103_v50  ;;  %1413 = vmatpush.bf16.msrb.mxu3 %v3574_v25 }
 0x1a8   :  { %v1226_v23 = vadd.f32 0.5, %v1225_v15  ;;  %v5114_v15 = vld [vmem:[#allocation57_spill] sm:$0xff] }
 0x1a9   :  { %v1204_v59 = vpop.f32.mrf.mxu2 }
 0x1aa   :  { %v3208_v32 = vpop.eup %3207  ;;  %v5116_v59 = vld [vmem:[#allocation49_spill] sm:$0xff] }
 0x1ab   :  { %v1237_v19 = vmul.f32 %v3208_v32, %v1226_v23  ;;  %1388 = vmatpush.bf16.msrb.mxu1 %v3584_v34  ;;  %1414 = vmatpush.bf16.msrb.mxu3 %v5104_v45  ;;  %v3210_v26 = vpop.eup %3209  ;;  %v5115_v23 = vld [vmem:[#allocation48_spill] sm:$0xff] }
 0x1ac   :  { %v1234_v2 = vmul.f32 0.5, %v3210_v26  ;;  %v5117_v32 = vld [vmem:[#allocation60_spill] sm:$0xff]  ;;  %v5120_v26 = vld [vmem:[#allocation51_spill] sm:$0xff] }
 0x1ad   :  { %v4085_v40 = vadd.f32 %v1237_v19, %v1236_v51  ;;  %v5118_v51 = vld [vmem:[#allocation61_spill] sm:$0xff]  ;;  %v5119_v19 = vld [vmem:[#allocation50_spill] sm:$0xff] }
 0x1ae   :  { %v1235_v22 = vadd.f32 0.5, %v1234_v2  ;;  %v5121_v2 = vld [vmem:[#allocation65_spill] sm:$0xff] }
 0x1af   :  { %3211 = vtanh.f32 %v4085_v40  ;;  %1389 = vmatpush.bf16.msrb.mxu1 %v5105_v58  ;;  %1415 = vmatpush.bf16.msrb.mxu3 %v5106_v36 }
 0x1b3   :  { %1390 = vmatpush.bf16.msrb.mxu1 %v5107_v20  ;;  %1416 = vmatpush.bf16.msrb.mxu3 %v5108_v33 }
 0x1b5   :  { %v3212_v29 = vpop.eup %3211 }
 0x1b6   :  { %v1240_v24 = vmul.f32 %v3212_v29, %v1235_v22  ;;  %1316 = vmatmul.bf16.vlgmr.msra.gmra.mxu1 %v1242_v6  ;;  %1342 = vmatmul.bf16.vlgmr.msra.gmra.mxu3 %v1242_v6  ;;  %v5113_v6 = vld [vmem:[#allocation45_spill] sm:$0xff]  ;;  %v5122_v22 = vld [vmem:[#allocation52_spill] sm:$0xff] }
 0x1b7   :  { %1391 = vmatpush.bf16.msrb.mxu1 %v5109_v60  ;;  %1417 = vmatpush.bf16.msrb.mxu3 %v5110_v46  ;;  %v5123_v29 = vld [vmem:[#allocation53_spill] sm:$0xff] }
 0x1b8   :  { %v1241_v56 = vpack.c.bf16 %v1240_v24, %v1240_v24  ;;  %v5124_v24 = vld [vmem:[#allocation54_spill] sm:$0xff] }
 0x1ba   :  { %1251 = vmatmul.bf16.vlgmr.msrb.gmra.mxu0 %v1241_v56  ;;  %1277 = vmatmul.bf16.vlgmr.msrb.gmra.mxu2 %v1241_v56 }
 0x1bb   :  { %1374 = vmatpush.bf16.msrb.mxu0 %v3567_v16  ;;  %1400 = vmatpush.bf16.msrb.mxu2 %v3571_v21 }
 0x1bc   :  { %1392 = vmatpush.bf16.msrb.mxu1 %v5111_v39  ;;  %1418 = vmatpush.bf16.msrb.mxu3 %v5112_v54 }
 0x1bf   :  { %1375 = vmatpush.bf16.msrb.mxu0 %v5058_v63  ;;  %1401 = vmatpush.bf16.msrb.mxu2 %v5059_v7 }
 0x1c0   :  { %1393 = vmatpush.bf16.msrb.mxu1 %v3648_v38  ;;  %1419 = vmatpush.bf16.msrb.mxu3 %v3653_v44 }
 0x1c3   :  { %1376 = vmatpush.bf16.msrb.mxu0 %v5062_v53  ;;  %1402 = vmatpush.bf16.msrb.mxu2 %v5063_v0 }
 0x1c4   :  { %1394 = vmatpush.bf16.msrb.mxu1 %v3660_v55  ;;  %1420 = vmatpush.bf16.msrb.mxu3 %v3665_v61 }
 0x1c7   :  { %1377 = vmatpush.bf16.msrb.mxu0 %v5066_v28  ;;  %1395 = vmatmul.bf16.vlgmr.msrb.gmra.mxu1 %v1241_v56 }
 0x1c8   :  { %1463 = vmatpush.bf16.msra.mxu1 %v5113_v6  ;;  %1489 = vmatpush.bf16.msra.mxu3 %v3685_v9 }
 0x1c9   :  { %1403 = vmatpush.bf16.msrb.mxu2 %v5067_v35  ;;  %1421 = vmatmul.bf16.vlgmr.msrb.gmra.mxu3 %v1241_v56 }
 0x1ca   :  { %1303 = vmatmul.bf16.vlgmr.msra.gmra.mxu0 %v1241_v56  ;;  %1329 = vmatmul.bf16.vlgmr.msra.gmra.mxu2 %v1241_v56 }
 0x1cb   :  { %1378 = vmatpush.bf16.msrb.mxu0 %v5070_v37 }
 0x1cc   :  { %1464 = vmatpush.bf16.msra.mxu1 %v3689_v14  ;;  %1490 = vmatpush.bf16.msra.mxu3 %v3691_v17 }
 0x1cd   :  { %1404 = vmatpush.bf16.msrb.mxu2 %v5071_v12 }
 0x1cf   :  { %1379 = vmatpush.bf16.msrb.mxu0 %v5074_v4 }
 0x1d0   :  { %1465 = vmatpush.bf16.msra.mxu1 %v3695_v27  ;;  %1491 = vmatpush.bf16.msra.mxu3 %v3697_v30 }
 0x1d1   :  { %1405 = vmatpush.bf16.msrb.mxu2 %v5075_v47 }
 0x1d3   :  { %1380 = vmatpush.bf16.msrb.mxu0 %v5077_v8 }
 0x1d4   :  { %1466 = vmatpush.bf16.msra.mxu1 %v3701_v41  ;;  %1492 = vmatpush.bf16.msra.mxu3 %v3703_v43 }
 0x1d5   :  { %1406 = vmatpush.bf16.msrb.mxu2 %v5078_v42 }
 0x1d7   :  { %1381 = vmatpush.bf16.msrb.mxu0 %v5081_v13  ;;  %v5163_v13 = vld [vmem:[#allocation25_spill] sm:$0xff] }
 0x1d8   :  { %1467 = vmatpush.bf16.msra.mxu1 %v3707_v52  ;;  %1493 = vmatpush.bf16.msra.mxu3 %v3709_v57 }
 0x1d9   :  { %1407 = vmatpush.bf16.msrb.mxu2 %v5082_v49 }
 0x1da   :  { %1382 = vmatmul.bf16.vlgmr.msrb.gmra.mxu0 %v1241_v56 }
 0x1db   :  { %1450 = vmatpush.bf16.msra.mxu0 %v5083_v31 }
 0x1dc   :  { %1468 = vmatpush.bf16.msra.mxu1 %v5115_v23  ;;  %1494 = vmatpush.bf16.msra.mxu3 %v5116_v59  ;;  %v5125_v59 = vld [vmem:[#allocation55_spill] sm:$0xff] }
 0x1dd   :  { %1476 = vmatpush.bf16.msra.mxu2 %v5114_v15  ;;  %v5162_v23 = vld [vmem:[#allocation23_spill] sm:$0xff] }
 0x1de   :  { %1408 = vmatmul.bf16.vlgmr.msrb.gmra.mxu2 %v1241_v56  ;;  %v5126_v56 = vld [vmem:[#allocation58_spill] sm:$0xff] }
 0x1df   :  { %1451 = vmatpush.bf16.msra.mxu0 %v5117_v32 }
 0x1e0   :  { %1469 = vmatpush.bf16.msra.mxu1 %v5119_v19  ;;  %1495 = vmatpush.bf16.msra.mxu3 %v5120_v26  ;;  %v5127_v19 = vld [vmem:[#allocation59_spill] sm:$0xff]  ;;  %v5161_v26 = vld [vmem:[#allocation22_spill] sm:$0xff] }
 0x1e1   :  { %1477 = vmatpush.bf16.msra.mxu2 %v5118_v51 }
 0x1e3   :  { %1452 = vmatpush.bf16.msra.mxu0 %v5121_v2 }
 0x1e4   :  { %1470 = vmatpush.bf16.msra.mxu1 %v5122_v22  ;;  %1496 = vmatpush.bf16.msra.mxu3 %v5123_v29  ;;  %v5129_v22 = vld [vmem:[#allocation64_spill] sm:$0xff] }
 0x1e5   :  { %1478 = vmatpush.bf16.msra.mxu2 %v5089_v48  ;;  %v5128_v48 = vld [vmem:[#allocation62_spill] sm:$0xff] }
 0x1e7   :  { %1453 = vmatpush.bf16.msra.mxu0 %v5090_v18  ;;  %v5132_v18 = vld [vmem:[#allocation68_spill] sm:$0xff] }
 0x1e8   :  { %1515 = vmatpush.bf16.msrb.mxu1 %v5124_v24  ;;  %1541 = vmatpush.bf16.msrb.mxu3 %v5125_v59  ;;  %v5130_v24 = vld [vmem:[#allocation81_spill] sm:$0xff]  ;;  %v5131_v59 = vld [vmem:[#allocation67_spill] sm:$0xff] }
 0x1e9   :  { %1479 = vmatpush.bf16.msra.mxu2 %v5091_v10  ;;  %v5133_v10 = vld [vmem:[#allocation85_spill] sm:$0xff] }
 0x1eb   :  { %1454 = vmatpush.bf16.msra.mxu0 %v5092_v62  ;;  %v5136_v62 = vld [vmem:[#allocation74_spill] sm:$0xff] }
 0x1ec   :  { %1516 = vmatpush.bf16.msrb.mxu1 %v5126_v56  ;;  %1542 = vmatpush.bf16.msrb.mxu3 %v5127_v19  ;;  %v5134_v56 = vld [vmem:[#allocation86_spill] sm:$0xff]  ;;  %v5135_v19 = vld [vmem:[#allocation72_spill] sm:$0xff] }
 0x1ed   :  { %1480 = vmatpush.bf16.msra.mxu2 %v5093_v11  ;;  %v5137_v11 = vld [vmem:[#allocation89_spill] sm:$0xff] }
 0x1ef   :  { %1455 = vmatpush.bf16.msra.mxu0 %v5094_v1  ;;  %v5140_v1 = vld [vmem:[#allocation94_spill] sm:$0xff] }
 0x1f0   :  { %1517 = vmatpush.bf16.msrb.mxu1 %v5128_v48  ;;  %1543 = vmatpush.bf16.msrb.mxu3 %v5129_v22  ;;  %v5138_v48 = vld [vmem:[#allocation91_spill] sm:$0xff]  ;;  %v5139_v22 = vld [vmem:[#allocation92_spill] sm:$0xff] }
 0x1f1   :  { %1481 = vmatpush.bf16.msra.mxu2 %v5130_v24  ;;  %v5141_v24 = vld [vmem:[#allocation77_spill] sm:$0xff] }
 0x1f3   :  { %1456 = vmatpush.bf16.msra.mxu0 %v5133_v10  ;;  %v5144_v10 = vld [vmem:[#allocation96_spill] sm:$0xff] }
 0x1f4   :  { %1518 = vmatpush.bf16.msrb.mxu1 %v5131_v59  ;;  %1544 = vmatpush.bf16.msrb.mxu3 %v5132_v18  ;;  %v5142_v59 = vld [vmem:[#allocation78_spill] sm:$0xff]  ;;  %v5143_v18 = vld [vmem:[#allocation95_spill] sm:$0xff] }
 0x1f5   :  { %1482 = vmatpush.bf16.msra.mxu2 %v5134_v56  ;;  %v5145_v56 = vld [vmem:[#allocation82_spill] sm:$0xff] }
 0x1f7   :  { %1457 = vmatpush.bf16.msra.mxu0 %v5137_v11  ;;  %v5148_v11 = vld [vmem:[#allocation100_spill] sm:$0xff] }
 0x1f8   :  { %1519 = vmatpush.bf16.msrb.mxu1 %v5135_v19  ;;  %1545 = vmatpush.bf16.msrb.mxu3 %v5136_v62  ;;  %v5146_v19 = vld [vmem:[#allocation84_spill] sm:$0xff]  ;;  %v5147_v62 = vld [vmem:[#allocation98_spill] sm:$0xff] }
 0x1f9   :  { %1483 = vmatpush.bf16.msra.mxu2 %v5138_v48  ;;  %v5149_v48 = vld [vmem:[#allocation87_spill] sm:$0xff] }
 0x1fb   :  { %1502 = vmatpush.bf16.msrb.mxu0 %v5139_v22  ;;  %v5150_v22 = vld [vmem:[#allocation88_spill] sm:$0xff] }
 0x1fc   :  { %1520 = vmatpush.bf16.msrb.mxu1 %v5141_v24  ;;  %1546 = vmatpush.bf16.msrb.mxu3 %v5142_v59  ;;  %v5152_v24 = vld [vmem:[#allocation102_spill] sm:$0xff]  ;;  %v5153_v59 = vld [vmem:[#allocation104_spill] sm:$0xff] }
 0x1fd   :  { %1528 = vmatpush.bf16.msrb.mxu2 %v5140_v1  ;;  %v5151_v1 = vld [vmem:[#allocation101_spill] sm:$0xff] }
 0x1ff   :  { %1503 = vmatpush.bf16.msrb.mxu0 %v5143_v18  ;;  %v5154_v18 = vld [vmem:[#allocation106_spill] sm:$0xff] }
 0x200   :  { %1521 = vmatpush.bf16.msrb.mxu1 %v5145_v56  ;;  %1547 = vmatpush.bf16.msrb.mxu3 %v5146_v19  ;;  %v5156_v56 = vld [vmem:[#allocation108_spill] sm:$0xff]  ;;  %v5157_v19 = vld [vmem:[#allocation110_spill] sm:$0xff] }
 0x201   :  { %1529 = vmatpush.bf16.msrb.mxu2 %v5144_v10  ;;  %v5155_v10 = vld [vmem:[#allocation107_spill] sm:$0xff] }
 0x203   :  { %1504 = vmatpush.bf16.msrb.mxu0 %v5147_v62  ;;  %v5158_v62 = vld [vmem:[#allocation112_spill] sm:$0xff] }
 0x204   :  { %1522 = vmatpush.bf16.msrb.mxu1 %v5149_v48  ;;  %1548 = vmatpush.bf16.msrb.mxu3 %v5150_v22  ;;  %v5160_v48 = vld [vmem:[#allocation114_spill] sm:$0xff] }
 0x205   :  { %1530 = vmatpush.bf16.msrb.mxu2 %v5148_v11  ;;  %v5159_v11 = vld [vmem:[#allocation113_spill] sm:$0xff] }
 0x207   :  { %1505 = vmatpush.bf16.msrb.mxu0 %v5151_v1 }
 0x209   :  { %1531 = vmatpush.bf16.msrb.mxu2 %v5152_v24 }
 0x20b   :  { %1506 = vmatpush.bf16.msrb.mxu0 %v5153_v59 }
 0x20d   :  { %1532 = vmatpush.bf16.msrb.mxu2 %v5154_v18 }
 0x20f   :  { %1507 = vmatpush.bf16.msrb.mxu0 %v5155_v10 }
 0x211   :  { %1533 = vmatpush.bf16.msrb.mxu2 %v5156_v56 }
 0x213   :  { %1508 = vmatpush.bf16.msrb.mxu0 %v5157_v19 }
 0x215   :  { %1534 = vmatpush.bf16.msrb.mxu2 %v5158_v62 }
 0x217   :  { %1509 = vmatpush.bf16.msrb.mxu0 %v5159_v11 }
 0x219   :  { %1535 = vmatpush.bf16.msrb.mxu2 %v5160_v48 }
 0x223   :  { %v1265_v22 = vpop.f32.mrf.mxu1 }
 0x229   :  { %v1291_v1 = vpop.f32.mrf.mxu3 }
 0x22b   :  { %v1267_v29 = vpop.f32.mrf.mxu1 }
 0x231   :  { %v1293_v24 = vpop.f32.mrf.mxu3 }
 0x233   :  { %v1317_v2 = vpop.f32.mrf.mxu1 }
 0x237   :  { %v1252_v59 = vpop.f32.mrf.mxu0 }
 0x238   :  { %v1253_v18 = vadd.f32 %v1252_v59, %v5161_v26 }
 0x239   :  { %v1343_v51 = vpop.f32.mrf.mxu3 }
 0x23a   :  { %v1266_v10 = vadd.f32 %v1265_v22, %v1253_v18  ;;  %v5164_v22 = vld [vmem:[#allocation73_spill] sm:$0xff] }
 0x23b   :  { %v1319_v32 = vpop.f32.mrf.mxu1  ;;  %v1371_v42 = vunpack.c.h.bf16 %v5164_v22 }
 0x23c   :  { %v1347_v15 = vmul.f32 0.5, %v1266_v10 }
 0x23d   :  { %v1278_v56 = vpop.f32.mrf.mxu2 }
 0x23e   :  { %v1279_v19 = vadd.f32 %v1278_v56, %v5162_v23  ;;  %3213 = vtanh.f32 %v1347_v15 }
 0x23f   :  { %v1254_v62 = vpop.f32.mrf.mxu0 }
 0x240   :  { %v1292_v31 = vadd.f32 %v1291_v1, %v1279_v19 }
 0x241   :  { %v1345_v11 = vpop.f32.mrf.mxu3 }
 0x242   :  { %v1351_v49 = vmul.f32 0.5, %v1292_v31 }
 0x244   :  { %3215 = vtanh.f32 %v1351_v49  ;;  %v1396_v48 = vpop.f32.mrf.mxu1  ;;  %v3214_v52 = vpop.eup %3213 }
 0x245   :  { %v1280_v29 = vpop.f32.mrf.mxu2  ;;  %v1349_v62 = vmul.f32 0.5, %v3214_v52  ;;  %v1427_v11 = vadd.f32 %v1396_v48, %v1371_v42  ;;  %v1370_v52 = vunpack.c.l.bf16 %v5164_v22 }
 0x247   :  { %v1304_v24 = vpop.f32.mrf.mxu0  ;;  %v1350_v56 = vadd.f32 0.5, %v1349_v62 }
 0x248   :  { %v1305_v57 = vadd.f32 %v1304_v24, %v5163_v13  ;;  %v1434_v24 = vmul.f32 0.5, %v1427_v11 }
 0x24a   :  { %v3216_v59 = vpop.eup %3215  ;;  %v1318_v26 = vadd.f32 %v1317_v2, %v1305_v57 }
 0x24b   :  { %v1353_v18 = vmul.f32 0.5, %v3216_v59 }
 0x24c   :  { %v1422_v32 = vpop.f32.mrf.mxu3  ;;  %3217 = vtanh.f32 %v1318_v26  ;;  %v1398_v10 = vpop.f32.mrf.mxu1 }
 0x24d   :  { %v1330_v1 = vpop.f32.mrf.mxu2  ;;  %v1354_v49 = vadd.f32 0.5, %v1353_v18  ;;  %v5165_v18 = vld [vmem:[#allocation80_spill] sm:$0xff] }
 0x24e   :  { %v1331_v31 = vadd.f32 %v1330_v1, %v4070_v5  ;;  %v1373_v10 = vunpack.c.h.bf16 %v5165_v18 }
 0x24f   :  { %v1306_v15 = vpop.f32.mrf.mxu0  ;;  %v1360_v57 = vmul.f32 %v1354_v49, %v4074_v3  ;;  %v1372_v49 = vunpack.c.l.bf16 %v5165_v18 }
 0x250   :  { %v1344_v19 = vadd.f32 %v1343_v51, %v1331_v31  ;;  %v1429_v3 = vadd.f32 %v1422_v32, %v1373_v10 }
 0x252   :  { %v3218_v29 = vpop.eup %3217  ;;  %v1356_v13 = vmul.f32 0.5, %v1344_v19 }
 0x253   :  { %v1361_v2 = vmul.f32 %v3218_v29, %v1350_v56 }
 0x254   :  { %v1424_v59 = vpop.f32.mrf.mxu3  ;;  %3219 = vtanh.f32 %v1356_v13 }
 0x255   :  { %v4186_v23 = vadd.f32 %v1361_v2, %v1360_v57  ;;  %v1332_v26 = vpop.f32.mrf.mxu2  ;;  %3221 = vtanh.f32 %v1434_v24  ;;  %v1439_v24 = vmul.f32 0.5, %v1429_v3 }
 0x257   :  { %3223 = vtanh.f32 %v4186_v23  ;;  %v1383_v48 = vpop.f32.mrf.mxu0 }
 0x258   :  { %v1426_v42 = vadd.f32 %v1383_v48, %v1370_v52 }
 0x25a   :  { %v3220_v51 = vpop.eup %3219  ;;  %v1430_v62 = vmul.f32 0.5, %v1426_v42 }
 0x25b   :  { %v1358_v1 = vmul.f32 0.5, %v3220_v51  ;;  %v3222_v11 = vpop.eup %3221 }
 0x25c   :  { %3225 = vtanh.f32 %v1430_v62  ;;  %v1436_v29 = vmul.f32 0.5, %v3222_v11 }
 0x25d   :  { %v3224_v31 = vpop.eup %3223  ;;  %v1359_v13 = vadd.f32 0.5, %v1358_v1 }
 0x25e   :  { %v1437_v26 = vadd.f32 0.5, %v1436_v29  ;;  %v5173_v29 = vld [vmem:[#allocation48_spill] sm:$0xff] }
 0x25f   :  { %v1364_v19 = vmul.f32 %v3224_v31, %v1359_v13  ;;  %v1385_v22 = vpop.f32.mrf.mxu0  ;;  %v5166_v31 = vld [vmem:[#allocation42_spill] sm:$0xff] }
 0x260   :  { %v1443_v42 = vmul.f32 %v1437_v26, %v4085_v40  ;;  %v5167_v13 = vld [vmem:[#allocation46_spill] sm:$0xff]  ;;  %v5172_v22 = vld [vmem:[#allocation57_spill] sm:$0xff]  ;;  %v5178_v26 = vld [vmem:[#allocation51_spill] sm:$0xff] }
 0x261   :  { %v1409_v15 = vpop.f32.mrf.mxu2  ;;  %1366 = vst [vmem:[#allocation16 + $0x8] sm:$0xff] %v1364_v19  ;;  %v1449_v57 = vpack.c.bf16 %v1364_v19, %v1364_v19  ;;  %v5170_v19 = vld [vmem:[#allocation44_spill] sm:$0xff] }
 0x262   :  { %v1428_v56 = vadd.f32 %v1409_v15, %v1372_v49  ;;  %v3226_v2 = vpop.eup %3225  ;;  %v5168_v49 = vld [vmem:[#allocation47_spill] sm:$0xff] }
 0x263   :  { %v1432_v59 = vmul.f32 0.5, %v3226_v2  ;;  %1471 = vmatmul.bf16.vlgmr.msra.gmra.mxu1 %v1449_v57  ;;  %1497 = vmatmul.bf16.vlgmr.msra.gmra.mxu3 %v1449_v57  ;;  %v5169_v15 = vld [vmem:[#allocation43_spill] sm:$0xff]  ;;  %v5176_v2 = vld [vmem:[#allocation61_spill] sm:$0xff] }
 0x264   :  { %3227 = vtanh.f32 %v1428_v56  ;;  %1594 = vmatpush.bf16.msra.mxu1 %v5103_v50  ;;  %1620 = vmatpush.bf16.msra.mxu3 %v3574_v25  ;;  %v5171_v56 = vld [vmem:[#allocation56_spill] sm:$0xff] }
 0x265   :  { %3229 = vtanh.f32 %v1439_v24  ;;  %v1433_v32 = vadd.f32 0.5, %v1432_v59  ;;  %v5174_v24 = vld [vmem:[#allocation49_spill] sm:$0xff]  ;;  %v5177_v59 = vld [vmem:[#allocation50_spill] sm:$0xff] }
 0x268   :  { %1595 = vmatpush.bf16.msra.mxu1 %v3584_v34  ;;  %1621 = vmatpush.bf16.msra.mxu3 %v5104_v45 }
 0x269   :  { %v1411_v52 = vpop.f32.mrf.mxu2 }
 0x26a   :  { %v3228_v48 = vpop.eup %3227  ;;  %v5180_v52 = vld [vmem:[#allocation66_spill] sm:$0xff] }
 0x26b   :  { %v1444_v51 = vmul.f32 %v3228_v48, %v1433_v32  ;;  %v3230_v18 = vpop.eup %3229  ;;  %v5179_v32 = vld [vmem:[#allocation65_spill] sm:$0xff]  ;;  %v5181_v48 = vld [vmem:[#allocation52_spill] sm:$0xff] }
 0x26c   :  { %1596 = vmatpush.bf16.msra.mxu1 %v5105_v58  ;;  %1622 = vmatpush.bf16.msra.mxu3 %v5106_v36  ;;  %v1441_v62 = vmul.f32 0.5, %v3230_v18  ;;  %v5184_v18 = vld [vmem:[#allocation55_spill] sm:$0xff] }
 0x26d   :  { %v4197_v10 = vadd.f32 %v1444_v51, %v1443_v42  ;;  %v5182_v42 = vld [vmem:[#allocation53_spill] sm:$0xff]  ;;  %v5183_v51 = vld [vmem:[#allocation54_spill] sm:$0xff] }
 0x26e   :  { %v1442_v40 = vadd.f32 0.5, %v1441_v62  ;;  %v5185_v62 = vld [vmem:[#allocation69_spill] sm:$0xff] }
 0x26f   :  { %3231 = vtanh.f32 %v4197_v10 }
 0x270   :  { %1597 = vmatpush.bf16.msra.mxu1 %v5107_v20  ;;  %1623 = vmatpush.bf16.msra.mxu3 %v5108_v33 }
 0x273   :  { %1523 = vmatmul.bf16.vlgmr.msrb.gmra.mxu1 %v1449_v57  ;;  %1549 = vmatmul.bf16.vlgmr.msrb.gmra.mxu3 %v1449_v57  ;;  %v5175_v57 = vld [vmem:[#allocation60_spill] sm:$0xff] }
 0x274   :  { %1598 = vmatpush.bf16.msra.mxu1 %v5109_v60  ;;  %1624 = vmatpush.bf16.msra.mxu3 %v5110_v46 }
 0x275   :  { %v3232_v1 = vpop.eup %3231 }
 0x276   :  { %v1447_v11 = vmul.f32 %v3232_v1, %v1442_v40  ;;  %v5186_v40 = vld [vmem:[#allocation71_spill] sm:$0xff]  ;;  %v5187_v1 = vld [vmem:[#allocation58_spill] sm:$0xff] }
 0x278   :  { %v1448_v3 = vpack.c.bf16 %v1447_v11, %v1447_v11  ;;  %1599 = vmatpush.bf16.msra.mxu1 %v5111_v39  ;;  %1625 = vmatpush.bf16.msra.mxu3 %v5112_v54  ;;  %v5188_v11 = vld [vmem:[#allocation59_spill] sm:$0xff] }
 0x27a   :  { %1458 = vmatmul.bf16.vlgmr.msra.gmra.mxu0 %v1448_v3  ;;  %1484 = vmatmul.bf16.vlgmr.msra.gmra.mxu2 %v1448_v3 }
 0x27b   :  { %1581 = vmatpush.bf16.msra.mxu0 %v3567_v16  ;;  %1607 = vmatpush.bf16.msra.mxu2 %v3571_v21 }
 0x27c   :  { %1600 = vmatpush.bf16.msra.mxu1 %v3648_v38  ;;  %1626 = vmatpush.bf16.msra.mxu3 %v3653_v44 }
 0x27f   :  { %1582 = vmatpush.bf16.msra.mxu0 %v5058_v63  ;;  %1608 = vmatpush.bf16.msra.mxu2 %v5059_v7 }
 0x280   :  { %1601 = vmatpush.bf16.msra.mxu1 %v3660_v55  ;;  %1627 = vmatpush.bf16.msra.mxu3 %v3665_v61 }
 0x283   :  { %1583 = vmatpush.bf16.msra.mxu0 %v5062_v53  ;;  %1609 = vmatpush.bf16.msra.mxu2 %v5063_v0 }
 0x284   :  { %1670 = vmatpush.bf16.msrb.mxu1 %v5113_v6  ;;  %1696 = vmatpush.bf16.msrb.mxu3 %v3685_v9 }
 0x285   :  { %1602 = vmatmul.bf16.vlgmr.msra.gmra.mxu1 %v1448_v3  ;;  %1628 = vmatmul.bf16.vlgmr.msra.gmra.mxu3 %v1448_v3 }
 0x287   :  { %1584 = vmatpush.bf16.msra.mxu0 %v5066_v28  ;;  %1610 = vmatpush.bf16.msra.mxu2 %v5067_v35 }
 0x288   :  { %1671 = vmatpush.bf16.msrb.mxu1 %v3689_v14  ;;  %1697 = vmatpush.bf16.msrb.mxu3 %v3691_v17 }
 0x28a   :  { %1510 = vmatmul.bf16.vlgmr.msrb.gmra.mxu0 %v1448_v3  ;;  %1536 = vmatmul.bf16.vlgmr.msrb.gmra.mxu2 %v1448_v3 }
 0x28b   :  { %1585 = vmatpush.bf16.msra.mxu0 %v5070_v37  ;;  %1611 = vmatpush.bf16.msra.mxu2 %v5071_v12 }
 0x28c   :  { %1672 = vmatpush.bf16.msrb.mxu1 %v3695_v27  ;;  %1698 = vmatpush.bf16.msrb.mxu3 %v3697_v30 }
 0x28f   :  { %1586 = vmatpush.bf16.msra.mxu0 %v5074_v4  ;;  %1612 = vmatpush.bf16.msra.mxu2 %v5075_v47 }
 0x290   :  { %1673 = vmatpush.bf16.msrb.mxu1 %v3701_v41  ;;  %1699 = vmatpush.bf16.msrb.mxu3 %v3703_v43 }
 0x293   :  { %1587 = vmatpush.bf16.msra.mxu0 %v5077_v8  ;;  %1613 = vmatpush.bf16.msra.mxu2 %v5166_v31 }
 0x294   :  { %1674 = vmatpush.bf16.msrb.mxu1 %v5167_v13  ;;  %1700 = vmatpush.bf16.msrb.mxu3 %v5168_v49 }
 0x297   :  { %1588 = vmatpush.bf16.msra.mxu0 %v5169_v15  ;;  %1614 = vmatpush.bf16.msra.mxu2 %v5170_v19  ;;  %v5227_v15 = vld [vmem:[#allocation25_spill] sm:$0xff] }
 0x298   :  { %1675 = vmatpush.bf16.msrb.mxu1 %v5173_v29  ;;  %1701 = vmatpush.bf16.msrb.mxu3 %v5174_v24  ;;  %v5226_v29 = vld [vmem:[#allocation23_spill] sm:$0xff] }
 0x29a   :  { %1589 = vmatmul.bf16.vlgmr.msra.gmra.mxu0 %v1448_v3  ;;  %1615 = vmatmul.bf16.vlgmr.msra.gmra.mxu2 %v1448_v3  ;;  %v5189_v3 = vld [vmem:[#allocation75_spill] sm:$0xff] }
 0x29b   :  { %1657 = vmatpush.bf16.msrb.mxu0 %v5171_v56  ;;  %1683 = vmatpush.bf16.msrb.mxu2 %v5172_v22 }
 0x29c   :  { %1676 = vmatpush.bf16.msrb.mxu1 %v5177_v59  ;;  %1702 = vmatpush.bf16.msrb.mxu3 %v5178_v26 }
 0x29f   :  { %1658 = vmatpush.bf16.msrb.mxu0 %v5175_v57  ;;  %1684 = vmatpush.bf16.msrb.mxu2 %v5176_v2  ;;  %v5225_v2 = vld [vmem:[#allocation22_spill] sm:$0xff] }
 0x2a0   :  { %1677 = vmatpush.bf16.msrb.mxu1 %v5181_v48  ;;  %1703 = vmatpush.bf16.msrb.mxu3 %v5182_v42  ;;  %v5192_v48 = vld [vmem:[#allocation64_spill] sm:$0xff]  ;;  %v5193_v42 = vld [vmem:[#allocation79_spill] sm:$0xff] }
 0x2a3   :  { %1659 = vmatpush.bf16.msrb.mxu0 %v5179_v32  ;;  %1685 = vmatpush.bf16.msrb.mxu2 %v5180_v52  ;;  %v5190_v32 = vld [vmem:[#allocation76_spill] sm:$0xff]  ;;  %v5191_v52 = vld [vmem:[#allocation62_spill] sm:$0xff] }
 0x2a4   :  { %1722 = vmatpush.bf16.msra.mxu1 %v5183_v51  ;;  %1748 = vmatpush.bf16.msra.mxu3 %v5184_v18  ;;  %v5194_v51 = vld [vmem:[#allocation81_spill] sm:$0xff]  ;;  %v5195_v18 = vld [vmem:[#allocation67_spill] sm:$0xff] }
 0x2a7   :  { %1660 = vmatpush.bf16.msrb.mxu0 %v5185_v62  ;;  %1686 = vmatpush.bf16.msrb.mxu2 %v5186_v40  ;;  %v5196_v62 = vld [vmem:[#allocation68_spill] sm:$0xff]  ;;  %v5197_v40 = vld [vmem:[#allocation85_spill] sm:$0xff] }
 0x2a8   :  { %1723 = vmatpush.bf16.msra.mxu1 %v5187_v1  ;;  %1749 = vmatpush.bf16.msra.mxu3 %v5188_v11  ;;  %v5198_v1 = vld [vmem:[#allocation86_spill] sm:$0xff]  ;;  %v5199_v11 = vld [vmem:[#allocation72_spill] sm:$0xff] }
 0x2ab   :  { %1661 = vmatpush.bf16.msrb.mxu0 %v5189_v3  ;;  %1687 = vmatpush.bf16.msrb.mxu2 %v5190_v32  ;;  %v5200_v3 = vld [vmem:[#allocation74_spill] sm:$0xff]  ;;  %v5201_v32 = vld [vmem:[#allocation89_spill] sm:$0xff] }
 0x2ac   :  { %1724 = vmatpush.bf16.msra.mxu1 %v5191_v52  ;;  %1750 = vmatpush.bf16.msra.mxu3 %v5192_v48  ;;  %v5202_v52 = vld [vmem:[#allocation91_spill] sm:$0xff]  ;;  %v5203_v48 = vld [vmem:[#allocation92_spill] sm:$0xff] }
 0x2af   :  { %1662 = vmatpush.bf16.msrb.mxu0 %v5193_v42  ;;  %1688 = vmatpush.bf16.msrb.mxu2 %v5194_v51  ;;  %v5204_v42 = vld [vmem:[#allocation94_spill] sm:$0xff]  ;;  %v5205_v51 = vld [vmem:[#allocation77_spill] sm:$0xff] }
 0x2b0   :  { %1725 = vmatpush.bf16.msra.mxu1 %v5195_v18  ;;  %1751 = vmatpush.bf16.msra.mxu3 %v5196_v62  ;;  %v5206_v18 = vld [vmem:[#allocation78_spill] sm:$0xff]  ;;  %v5207_v62 = vld [vmem:[#allocation95_spill] sm:$0xff] }
 0x2b3   :  { %1663 = vmatpush.bf16.msrb.mxu0 %v5197_v40  ;;  %1689 = vmatpush.bf16.msrb.mxu2 %v5198_v1  ;;  %v5208_v40 = vld [vmem:[#allocation96_spill] sm:$0xff]  ;;  %v5209_v1 = vld [vmem:[#allocation82_spill] sm:$0xff] }
 0x2b4   :  { %1726 = vmatpush.bf16.msra.mxu1 %v5199_v11  ;;  %1752 = vmatpush.bf16.msra.mxu3 %v5200_v3  ;;  %v5210_v11 = vld [vmem:[#allocation84_spill] sm:$0xff]  ;;  %v5211_v3 = vld [vmem:[#allocation98_spill] sm:$0xff] }
 0x2b7   :  { %1664 = vmatpush.bf16.msrb.mxu0 %v5201_v32  ;;  %1690 = vmatpush.bf16.msrb.mxu2 %v5202_v52  ;;  %v5212_v32 = vld [vmem:[#allocation100_spill] sm:$0xff]  ;;  %v5213_v52 = vld [vmem:[#allocation87_spill] sm:$0xff] }
 0x2b8   :  { %1727 = vmatpush.bf16.msra.mxu1 %v5205_v51  ;;  %1753 = vmatpush.bf16.msra.mxu3 %v5206_v18  ;;  %v5216_v51 = vld [vmem:[#allocation102_spill] sm:$0xff]  ;;  %v5217_v18 = vld [vmem:[#allocation104_spill] sm:$0xff] }
 0x2bb   :  { %1709 = vmatpush.bf16.msra.mxu0 %v5203_v48  ;;  %1735 = vmatpush.bf16.msra.mxu2 %v5204_v42  ;;  %v5214_v48 = vld [vmem:[#allocation88_spill] sm:$0xff]  ;;  %v5215_v42 = vld [vmem:[#allocation101_spill] sm:$0xff] }
 0x2bc   :  { %1728 = vmatpush.bf16.msra.mxu1 %v5209_v1  ;;  %1754 = vmatpush.bf16.msra.mxu3 %v5210_v11  ;;  %v5220_v1 = vld [vmem:[#allocation108_spill] sm:$0xff]  ;;  %v5221_v11 = vld [vmem:[#allocation110_spill] sm:$0xff] }
 0x2bf   :  { %1710 = vmatpush.bf16.msra.mxu0 %v5207_v62  ;;  %1736 = vmatpush.bf16.msra.mxu2 %v5208_v40  ;;  %v5218_v62 = vld [vmem:[#allocation106_spill] sm:$0xff]  ;;  %v5219_v40 = vld [vmem:[#allocation107_spill] sm:$0xff] }
 0x2c0   :  { %1729 = vmatpush.bf16.msra.mxu1 %v5213_v52  ;;  %1755 = vmatpush.bf16.msra.mxu3 %v5214_v48  ;;  %v5224_v52 = vld [vmem:[#allocation114_spill] sm:$0xff] }
 0x2c3   :  { %1711 = vmatpush.bf16.msra.mxu0 %v5211_v3  ;;  %1737 = vmatpush.bf16.msra.mxu2 %v5212_v32  ;;  %v5222_v3 = vld [vmem:[#allocation112_spill] sm:$0xff]  ;;  %v5223_v32 = vld [vmem:[#allocation113_spill] sm:$0xff] }
 0x2c7   :  { %1712 = vmatpush.bf16.msra.mxu0 %v5215_v42  ;;  %1738 = vmatpush.bf16.msra.mxu2 %v5216_v51 }
 0x2cb   :  { %1713 = vmatpush.bf16.msra.mxu0 %v5217_v18  ;;  %1739 = vmatpush.bf16.msra.mxu2 %v5218_v62 }
 0x2cf   :  { %1714 = vmatpush.bf16.msra.mxu0 %v5219_v40  ;;  %1740 = vmatpush.bf16.msra.mxu2 %v5220_v1 }
 0x2d3   :  { %1715 = vmatpush.bf16.msra.mxu0 %v5221_v11  ;;  %1741 = vmatpush.bf16.msra.mxu2 %v5222_v3 }
 0x2d7   :  { %1716 = vmatpush.bf16.msra.mxu0 %v5223_v32  ;;  %1742 = vmatpush.bf16.msra.mxu2 %v5224_v52 }
 0x2e0   :  { %v1472_v48 = vpop.f32.mrf.mxu1 }
 0x2e6   :  { %v1498_v42 = vpop.f32.mrf.mxu3 }
 0x2e8   :  { %v1474_v26 = vpop.f32.mrf.mxu1 }
 0x2ee   :  { %v1500_v51 = vpop.f32.mrf.mxu3 }
 0x2f0   :  { %v1524_v59 = vpop.f32.mrf.mxu1 }
 0x2f6   :  { %v1550_v57 = vpop.f32.mrf.mxu3 }
 0x2f7   :  { %v1459_v18 = vpop.f32.mrf.mxu0 }
 0x2f8   :  { %v1460_v62 = vadd.f32 %v1459_v18, %v5225_v2  ;;  %v1526_v24 = vpop.f32.mrf.mxu1 }
 0x2fa   :  { %v1473_v40 = vadd.f32 %v1472_v48, %v1460_v62  ;;  %v5228_v62 = vld [vmem:[#allocation83_spill] sm:$0xff] }
 0x2fb   :  { %v1578_v31 = vunpack.c.h.bf16 %v5228_v62 }
 0x2fc   :  { %v1554_v22 = vmul.f32 0.5, %v1473_v40 }
 0x2fd   :  { %v1485_v1 = vpop.f32.mrf.mxu2 }
 0x2fe   :  { %v1486_v11 = vadd.f32 %v1485_v1, %v5226_v29  ;;  %v1552_v32 = vpop.f32.mrf.mxu3  ;;  %3233 = vtanh.f32 %v1554_v22 }
 0x2ff   :  { %v1461_v3 = vpop.f32.mrf.mxu0 }
 0x300   :  { %v1499_v56 = vadd.f32 %v1498_v42, %v1486_v11 }
 0x302   :  { %v1558_v19 = vmul.f32 0.5, %v1499_v56  ;;  %v1603_v52 = vpop.f32.mrf.mxu1 }
 0x303   :  { %v1634_v32 = vadd.f32 %v1603_v52, %v1578_v31  ;;  %v1577_v31 = vunpack.c.l.bf16 %v5228_v62 }
 0x304   :  { %3235 = vtanh.f32 %v1558_v19  ;;  %v3234_v13 = vpop.eup %3233 }
 0x305   :  { %v1487_v26 = vpop.f32.mrf.mxu2  ;;  %v1556_v1 = vmul.f32 0.5, %v3234_v13 }
 0x307   :  { %v1511_v51 = vpop.f32.mrf.mxu0  ;;  %v1557_v3 = vadd.f32 0.5, %v1556_v1 }
 0x308   :  { %v1512_v49 = vadd.f32 %v1511_v51, %v5227_v15  ;;  %v1629_v24 = vpop.f32.mrf.mxu3  ;;  %v1641_v51 = vmul.f32 0.5, %v1634_v32 }
 0x30a   :  { %v3236_v18 = vpop.eup %3235  ;;  %v1525_v2 = vadd.f32 %v1524_v59, %v1512_v49  ;;  %v1605_v40 = vpop.f32.mrf.mxu1 }
 0x30b   :  { %v1560_v48 = vmul.f32 0.5, %v3236_v18 }
 0x30c   :  { %3237 = vtanh.f32 %v1525_v2 }
 0x30d   :  { %v1537_v42 = vpop.f32.mrf.mxu2  ;;  %v1561_v19 = vadd.f32 0.5, %v1560_v48  ;;  %v5229_v48 = vld [vmem:[#allocation90_spill] sm:$0xff] }
 0x30e   :  { %v1538_v56 = vadd.f32 %v1537_v42, %v4070_v5  ;;  %v1580_v40 = vunpack.c.h.bf16 %v5229_v48 }
 0x30f   :  { %v1513_v22 = vpop.f32.mrf.mxu0  ;;  %v1567_v49 = vmul.f32 %v1561_v19, %v4186_v23  ;;  %v1579_v19 = vunpack.c.l.bf16 %v5229_v48 }
 0x310   :  { %v1551_v11 = vadd.f32 %v1550_v57, %v1538_v56  ;;  %v1631_v18 = vpop.f32.mrf.mxu3  ;;  %v1636_v23 = vadd.f32 %v1629_v24, %v1580_v40 }
 0x312   :  { %v3238_v26 = vpop.eup %3237  ;;  %v1563_v15 = vmul.f32 0.5, %v1551_v11 }
 0x313   :  { %v1568_v59 = vmul.f32 %v3238_v26, %v1557_v3 }
 0x314   :  { %3239 = vtanh.f32 %v1563_v15 }
 0x315   :  { %v4298_v29 = vadd.f32 %v1568_v59, %v1567_v49  ;;  %v1539_v2 = vpop.f32.mrf.mxu2  ;;  %3241 = vtanh.f32 %v1641_v51  ;;  %v1646_v51 = vmul.f32 0.5, %v1636_v23 }
 0x317   :  { %3243 = vtanh.f32 %v4298_v29  ;;  %v1590_v13 = vpop.f32.mrf.mxu0 }
 0x318   :  { %v1633_v52 = vadd.f32 %v1590_v13, %v1577_v31 }
 0x31a   :  { %v3240_v57 = vpop.eup %3239  ;;  %v1637_v1 = vmul.f32 0.5, %v1633_v52 }
 0x31b   :  { %v1565_v42 = vmul.f32 0.5, %v3240_v57  ;;  %v3242_v32 = vpop.eup %3241 }
 0x31c   :  { %3245 = vtanh.f32 %v1637_v1  ;;  %v1643_v26 = vmul.f32 0.5, %v3242_v32 }
 0x31d   :  { %v3244_v56 = vpop.eup %3243  ;;  %v1566_v15 = vadd.f32 0.5, %v1565_v42  ;;  %v1616_v22 = vpop.f32.mrf.mxu2 }
 0x31e   :  { %v1635_v3 = vadd.f32 %v1616_v22, %v1579_v19  ;;  %v1644_v2 = vadd.f32 0.5, %v1643_v26  ;;  %v5232_v19 = vld [vmem:[#allocation47_spill] sm:$0xff]  ;;  %v5237_v26 = vld [vmem:[#allocation48_spill] sm:$0xff] }
 0x31f   :  { %v1571_v11 = vmul.f32 %v3244_v56, %v1566_v15  ;;  %v1592_v62 = vpop.f32.mrf.mxu0  ;;  %v5230_v56 = vld [vmem:[#allocation42_spill] sm:$0xff]  ;;  %v5233_v22 = vld [vmem:[#allocation43_spill] sm:$0xff] }
 0x320   :  { %3247 = vtanh.f32 %v1635_v3  ;;  %v1650_v52 = vmul.f32 %v1644_v2, %v4197_v10  ;;  %v5231_v15 = vld [vmem:[#allocation46_spill] sm:$0xff]  ;;  %v5235_v3 = vld [vmem:[#allocation56_spill] sm:$0xff]  ;;  %v5236_v62 = vld [vmem:[#allocation57_spill] sm:$0xff] }
 0x321   :  { %1573 = vst [vmem:[#allocation16 + $0x10] sm:$0xff] %v1571_v11  ;;  %v1656_v49 = vpack.c.bf16 %v1571_v11, %v1571_v11  ;;  %3249 = vtanh.f32 %v1646_v51  ;;  %v5234_v11 = vld [vmem:[#allocation44_spill] sm:$0xff]  ;;  %v5238_v51 = vld [vmem:[#allocation49_spill] sm:$0xff]  ;;  %v5242_v2 = vld [vmem:[#allocation51_spill] sm:$0xff] }
 0x322   :  { %v3246_v59 = vpop.eup %3245 }
 0x323   :  { %v1639_v18 = vmul.f32 0.5, %v3246_v59  ;;  %1678 = vmatmul.bf16.vlgmr.msrb.gmra.mxu1 %v1656_v49  ;;  %1704 = vmatmul.bf16.vlgmr.msrb.gmra.mxu3 %v1656_v49  ;;  %v5240_v59 = vld [vmem:[#allocation61_spill] sm:$0xff] }
 0x324   :  { %1801 = vmatpush.bf16.msrb.mxu1 %v5103_v50  ;;  %1827 = vmatpush.bf16.msrb.mxu3 %v3574_v25 }
 0x325   :  { %v1640_v24 = vadd.f32 0.5, %v1639_v18  ;;  %v1618_v31 = vpop.f32.mrf.mxu2  ;;  %v5241_v18 = vld [vmem:[#allocation50_spill] sm:$0xff] }
 0x326   :  { %v3248_v13 = vpop.eup %3247  ;;  %v5244_v31 = vld [vmem:[#allocation66_spill] sm:$0xff] }
 0x327   :  { %v1651_v57 = vmul.f32 %v3248_v13, %v1640_v24  ;;  %v3250_v48 = vpop.eup %3249  ;;  %v5243_v24 = vld [vmem:[#allocation65_spill] sm:$0xff]  ;;  %v5245_v13 = vld [vmem:[#allocation52_spill] sm:$0xff] }
 0x328   :  { %1802 = vmatpush.bf16.msrb.mxu1 %v3584_v34  ;;  %1828 = vmatpush.bf16.msrb.mxu3 %v5104_v45  ;;  %v1648_v1 = vmul.f32 0.5, %v3250_v48  ;;  %v5248_v48 = vld [vmem:[#allocation55_spill] sm:$0xff] }
 0x329   :  { %v4309_v40 = vadd.f32 %v1651_v57, %v1650_v52  ;;  %v5246_v52 = vld [vmem:[#allocation53_spill] sm:$0xff]  ;;  %v5247_v57 = vld [vmem:[#allocation54_spill] sm:$0xff] }
 0x32a   :  { %v1649_v10 = vadd.f32 0.5, %v1648_v1  ;;  %v5249_v1 = vld [vmem:[#allocation69_spill] sm:$0xff] }
 0x32b   :  { %3251 = vtanh.f32 %v4309_v40 }
 0x32c   :  { %1803 = vmatpush.bf16.msrb.mxu1 %v5105_v58  ;;  %1829 = vmatpush.bf16.msrb.mxu3 %v5106_v36 }
 0x330   :  { %1804 = vmatpush.bf16.msrb.mxu1 %v5107_v20  ;;  %1830 = vmatpush.bf16.msrb.mxu3 %v5108_v33 }
 0x331   :  { %v3252_v42 = vpop.eup %3251 }
 0x332   :  { %v1654_v32 = vmul.f32 %v3252_v42, %v1649_v10  ;;  %v5250_v10 = vld [vmem:[#allocation71_spill] sm:$0xff]  ;;  %v5251_v42 = vld [vmem:[#allocation58_spill] sm:$0xff] }
 0x333   :  { %1730 = vmatmul.bf16.vlgmr.msra.gmra.mxu1 %v1656_v49  ;;  %1756 = vmatmul.bf16.vlgmr.msra.gmra.mxu3 %v1656_v49  ;;  %v5239_v49 = vld [vmem:[#allocation60_spill] sm:$0xff] }
 0x334   :  { %1805 = vmatpush.bf16.msrb.mxu1 %v5109_v60  ;;  %1831 = vmatpush.bf16.msrb.mxu3 %v5110_v46  ;;  %v1655_v23 = vpack.c.bf16 %v1654_v32, %v1654_v32  ;;  %v5252_v32 = vld [vmem:[#allocation59_spill] sm:$0xff] }
 0x336   :  { %1665 = vmatmul.bf16.vlgmr.msrb.gmra.mxu0 %v1655_v23  ;;  %1691 = vmatmul.bf16.vlgmr.msrb.gmra.mxu2 %v1655_v23 }
 0x337   :  { %1788 = vmatpush.bf16.msrb.mxu0 %v3567_v16  ;;  %1814 = vmatpush.bf16.msrb.mxu2 %v3571_v21 }
 0x338   :  { %1806 = vmatpush.bf16.msrb.mxu1 %v5111_v39  ;;  %1832 = vmatpush.bf16.msrb.mxu3 %v5112_v54 }
 0x33b   :  { %1789 = vmatpush.bf16.msrb.mxu0 %v5058_v63  ;;  %1815 = vmatpush.bf16.msrb.mxu2 %v5059_v7 }
 0x33c   :  { %1807 = vmatpush.bf16.msrb.mxu1 %v3648_v38  ;;  %1833 = vmatpush.bf16.msrb.mxu3 %v3653_v44 }
 0x33f   :  { %1790 = vmatpush.bf16.msrb.mxu0 %v5062_v53  ;;  %1816 = vmatpush.bf16.msrb.mxu2 %v5063_v0 }
 0x340   :  { %1808 = vmatpush.bf16.msrb.mxu1 %v3660_v55  ;;  %1834 = vmatpush.bf16.msrb.mxu3 %v3665_v61 }
 0x343   :  { %1791 = vmatpush.bf16.msrb.mxu0 %v5066_v28  ;;  %1809 = vmatmul.bf16.vlgmr.msrb.gmra.mxu1 %v1655_v23 }
 0x344   :  { %1877 = vmatpush.bf16.msra.mxu1 %v5113_v6  ;;  %1903 = vmatpush.bf16.msra.mxu3 %v3685_v9 }
 0x345   :  { %1817 = vmatpush.bf16.msrb.mxu2 %v5067_v35  ;;  %1835 = vmatmul.bf16.vlgmr.msrb.gmra.mxu3 %v1655_v23 }
 0x346   :  { %1717 = vmatmul.bf16.vlgmr.msra.gmra.mxu0 %v1655_v23  ;;  %1743 = vmatmul.bf16.vlgmr.msra.gmra.mxu2 %v1655_v23 }
 0x347   :  { %1792 = vmatpush.bf16.msrb.mxu0 %v5070_v37 }
 0x348   :  { %1878 = vmatpush.bf16.msra.mxu1 %v3689_v14  ;;  %1904 = vmatpush.bf16.msra.mxu3 %v3691_v17 }
 0x349   :  { %1818 = vmatpush.bf16.msrb.mxu2 %v5071_v12 }
 0x34b   :  { %1793 = vmatpush.bf16.msrb.mxu0 %v5074_v4 }
 0x34c   :  { %1879 = vmatpush.bf16.msra.mxu1 %v3695_v27  ;;  %1905 = vmatpush.bf16.msra.mxu3 %v3697_v30 }
 0x34d   :  { %1819 = vmatpush.bf16.msrb.mxu2 %v5075_v47 }
 0x34f   :  { %1794 = vmatpush.bf16.msrb.mxu0 %v5077_v8 }
 0x350   :  { %1880 = vmatpush.bf16.msra.mxu1 %v3701_v41  ;;  %1906 = vmatpush.bf16.msra.mxu3 %v3703_v43 }
 0x351   :  { %1820 = vmatpush.bf16.msrb.mxu2 %v5230_v56 }
 0x353   :  { %1795 = vmatpush.bf16.msrb.mxu0 %v5233_v22  ;;  %v5291_v22 = vld [vmem:[#allocation25_spill] sm:$0xff] }
 0x354   :  { %1881 = vmatpush.bf16.msra.mxu1 %v5231_v15  ;;  %1907 = vmatpush.bf16.msra.mxu3 %v5232_v19 }
 0x355   :  { %1821 = vmatpush.bf16.msrb.mxu2 %v5234_v11 }
 0x356   :  { %1796 = vmatmul.bf16.vlgmr.msrb.gmra.mxu0 %v1655_v23 }
 0x357   :  { %1864 = vmatpush.bf16.msra.mxu0 %v5235_v3 }
 0x358   :  { %1882 = vmatpush.bf16.msra.mxu1 %v5237_v26  ;;  %1908 = vmatpush.bf16.msra.mxu3 %v5238_v51  ;;  %v5290_v26 = vld [vmem:[#allocation23_spill] sm:$0xff] }
 0x359   :  { %1890 = vmatpush.bf16.msra.mxu2 %v5236_v62 }
 0x35a   :  { %1822 = vmatmul.bf16.vlgmr.msrb.gmra.mxu2 %v1655_v23  ;;  %v5253_v23 = vld [vmem:[#allocation75_spill] sm:$0xff] }
 0x35b   :  { %1865 = vmatpush.bf16.msra.mxu0 %v5239_v49 }
 0x35c   :  { %1883 = vmatpush.bf16.msra.mxu1 %v5241_v18  ;;  %1909 = vmatpush.bf16.msra.mxu3 %v5242_v2 }
 0x35d   :  { %1891 = vmatpush.bf16.msra.mxu2 %v5240_v59  ;;  %v5289_v59 = vld [vmem:[#allocation22_spill] sm:$0xff] }
 0x35f   :  { %1866 = vmatpush.bf16.msra.mxu0 %v5243_v24  ;;  %v5254_v24 = vld [vmem:[#allocation76_spill] sm:$0xff] }
 0x360   :  { %1884 = vmatpush.bf16.msra.mxu1 %v5245_v13  ;;  %1910 = vmatpush.bf16.msra.mxu3 %v5246_v52  ;;  %v5256_v13 = vld [vmem:[#allocation64_spill] sm:$0xff]  ;;  %v5257_v52 = vld [vmem:[#allocation79_spill] sm:$0xff] }
 0x361   :  { %1892 = vmatpush.bf16.msra.mxu2 %v5244_v31  ;;  %v5255_v31 = vld [vmem:[#allocation62_spill] sm:$0xff] }
 0x363   :  { %1867 = vmatpush.bf16.msra.mxu0 %v5249_v1  ;;  %v5260_v1 = vld [vmem:[#allocation68_spill] sm:$0xff] }
 0x364   :  { %1929 = vmatpush.bf16.msrb.mxu1 %v5247_v57  ;;  %1955 = vmatpush.bf16.msrb.mxu3 %v5248_v48  ;;  %v5258_v57 = vld [vmem:[#allocation81_spill] sm:$0xff]  ;;  %v5259_v48 = vld [vmem:[#allocation67_spill] sm:$0xff] }
 0x365   :  { %1893 = vmatpush.bf16.msra.mxu2 %v5250_v10  ;;  %v5261_v10 = vld [vmem:[#allocation85_spill] sm:$0xff] }
 0x367   :  { %1868 = vmatpush.bf16.msra.mxu0 %v5253_v23  ;;  %v5264_v23 = vld [vmem:[#allocation74_spill] sm:$0xff] }
 0x368   :  { %1930 = vmatpush.bf16.msrb.mxu1 %v5251_v42  ;;  %1956 = vmatpush.bf16.msrb.mxu3 %v5252_v32  ;;  %v5262_v42 = vld [vmem:[#allocation86_spill] sm:$0xff]  ;;  %v5263_v32 = vld [vmem:[#allocation72_spill] sm:$0xff] }
 0x369   :  { %1894 = vmatpush.bf16.msra.mxu2 %v5254_v24  ;;  %v5265_v24 = vld [vmem:[#allocation89_spill] sm:$0xff] }
 0x36b   :  { %1869 = vmatpush.bf16.msra.mxu0 %v5257_v52  ;;  %v5268_v52 = vld [vmem:[#allocation94_spill] sm:$0xff] }
 0x36c   :  { %1931 = vmatpush.bf16.msrb.mxu1 %v5255_v31  ;;  %1957 = vmatpush.bf16.msrb.mxu3 %v5256_v13  ;;  %v5266_v31 = vld [vmem:[#allocation91_spill] sm:$0xff]  ;;  %v5267_v13 = vld [vmem:[#allocation92_spill] sm:$0xff] }
 0x36d   :  { %1895 = vmatpush.bf16.msra.mxu2 %v5258_v57  ;;  %v5269_v57 = vld [vmem:[#allocation77_spill] sm:$0xff] }
 0x36f   :  { %1870 = vmatpush.bf16.msra.mxu0 %v5261_v10  ;;  %v5272_v10 = vld [vmem:[#allocation96_spill] sm:$0xff] }
 0x370   :  { %1932 = vmatpush.bf16.msrb.mxu1 %v5259_v48  ;;  %1958 = vmatpush.bf16.msrb.mxu3 %v5260_v1  ;;  %v5270_v48 = vld [vmem:[#allocation78_spill] sm:$0xff]  ;;  %v5271_v1 = vld [vmem:[#allocation95_spill] sm:$0xff] }
 0x371   :  { %1896 = vmatpush.bf16.msra.mxu2 %v5262_v42  ;;  %v5273_v42 = vld [vmem:[#allocation82_spill] sm:$0xff] }
 0x373   :  { %1871 = vmatpush.bf16.msra.mxu0 %v5265_v24  ;;  %v5276_v24 = vld [vmem:[#allocation100_spill] sm:$0xff] }
 0x374   :  { %1933 = vmatpush.bf16.msrb.mxu1 %v5263_v32  ;;  %1959 = vmatpush.bf16.msrb.mxu3 %v5264_v23  ;;  %v5274_v32 = vld [vmem:[#allocation84_spill] sm:$0xff]  ;;  %v5275_v23 = vld [vmem:[#allocation98_spill] sm:$0xff] }
 0x375   :  { %1897 = vmatpush.bf16.msra.mxu2 %v5266_v31  ;;  %v5277_v31 = vld [vmem:[#allocation87_spill] sm:$0xff] }
 0x377   :  { %1916 = vmatpush.bf16.msrb.mxu0 %v5267_v13  ;;  %v5278_v13 = vld [vmem:[#allocation88_spill] sm:$0xff] }
 0x378   :  { %1934 = vmatpush.bf16.msrb.mxu1 %v5269_v57  ;;  %1960 = vmatpush.bf16.msrb.mxu3 %v5270_v48  ;;  %v5280_v57 = vld [vmem:[#allocation102_spill] sm:$0xff]  ;;  %v5281_v48 = vld [vmem:[#allocation104_spill] sm:$0xff] }
 0x379   :  { %1942 = vmatpush.bf16.msrb.mxu2 %v5268_v52  ;;  %v5279_v52 = vld [vmem:[#allocation101_spill] sm:$0xff] }
 0x37b   :  { %1917 = vmatpush.bf16.msrb.mxu0 %v5271_v1  ;;  %v5282_v1 = vld [vmem:[#allocation106_spill] sm:$0xff] }
 0x37c   :  { %1935 = vmatpush.bf16.msrb.mxu1 %v5273_v42  ;;  %1961 = vmatpush.bf16.msrb.mxu3 %v5274_v32  ;;  %v5284_v42 = vld [vmem:[#allocation108_spill] sm:$0xff]  ;;  %v5285_v32 = vld [vmem:[#allocation110_spill] sm:$0xff] }
 0x37d   :  { %1943 = vmatpush.bf16.msrb.mxu2 %v5272_v10  ;;  %v5283_v10 = vld [vmem:[#allocation107_spill] sm:$0xff] }
 0x37f   :  { %1918 = vmatpush.bf16.msrb.mxu0 %v5275_v23  ;;  %v5286_v23 = vld [vmem:[#allocation112_spill] sm:$0xff] }
 0x380   :  { %1936 = vmatpush.bf16.msrb.mxu1 %v5277_v31  ;;  %1962 = vmatpush.bf16.msrb.mxu3 %v5278_v13  ;;  %v5288_v31 = vld [vmem:[#allocation114_spill] sm:$0xff] }
 0x381   :  { %1944 = vmatpush.bf16.msrb.mxu2 %v5276_v24  ;;  %v5287_v24 = vld [vmem:[#allocation113_spill] sm:$0xff] }
 0x383   :  { %1919 = vmatpush.bf16.msrb.mxu0 %v5279_v52 }
 0x385   :  { %1945 = vmatpush.bf16.msrb.mxu2 %v5280_v57 }
 0x387   :  { %1920 = vmatpush.bf16.msrb.mxu0 %v5281_v48 }
 0x389   :  { %1946 = vmatpush.bf16.msrb.mxu2 %v5282_v1 }
 0x38b   :  { %1921 = vmatpush.bf16.msrb.mxu0 %v5283_v10 }
 0x38d   :  { %1947 = vmatpush.bf16.msrb.mxu2 %v5284_v42 }
 0x38f   :  { %1922 = vmatpush.bf16.msrb.mxu0 %v5285_v32 }
 0x391   :  { %1948 = vmatpush.bf16.msrb.mxu2 %v5286_v23 }
 0x393   :  { %1923 = vmatpush.bf16.msrb.mxu0 %v5287_v24 }
 0x395   :  { %1949 = vmatpush.bf16.msrb.mxu2 %v5288_v31 }
 0x3a0   :  { %v1679_v13 = vpop.f32.mrf.mxu1 }
 0x3a6   :  { %v1705_v52 = vpop.f32.mrf.mxu3 }
 0x3a8   :  { %v1681_v2 = vpop.f32.mrf.mxu1 }
 0x3ae   :  { %v1707_v57 = vpop.f32.mrf.mxu3 }
 0x3b0   :  { %v1731_v18 = vpop.f32.mrf.mxu1 }
 0x3b3   :  { %v1666_v48 = vpop.f32.mrf.mxu0 }
 0x3b4   :  { %v1667_v1 = vadd.f32 %v1666_v48, %v5289_v59 }
 0x3b6   :  { %v1757_v49 = vpop.f32.mrf.mxu3  ;;  %v1680_v10 = vadd.f32 %v1679_v13, %v1667_v1  ;;  %v5292_v1 = vld [vmem:[#allocation93_spill] sm:$0xff] }
 0x3b7   :  { %v1785_v56 = vunpack.c.h.bf16 %v5292_v1 }
 0x3b8   :  { %v1733_v51 = vpop.f32.mrf.mxu1  ;;  %v1761_v62 = vmul.f32 0.5, %v1680_v10 }
 0x3b9   :  { %v1692_v42 = vpop.f32.mrf.mxu2 }
 0x3ba   :  { %v1693_v32 = vadd.f32 %v1692_v42, %v5290_v26  ;;  %3253 = vtanh.f32 %v1761_v62 }
 0x3bb   :  { %v1668_v23 = vpop.f32.mrf.mxu0 }
 0x3bc   :  { %v1706_v3 = vadd.f32 %v1705_v52, %v1693_v32 }
 0x3be   :  { %v1759_v24 = vpop.f32.mrf.mxu3  ;;  %v1765_v11 = vmul.f32 0.5, %v1706_v3 }
 0x3c0   :  { %3255 = vtanh.f32 %v1765_v11  ;;  %v1810_v31 = vpop.f32.mrf.mxu1  ;;  %v3254_v15 = vpop.eup %3253 }
 0x3c1   :  { %v1694_v2 = vpop.f32.mrf.mxu2  ;;  %v1763_v42 = vmul.f32 0.5, %v3254_v15  ;;  %v1841_v24 = vadd.f32 %v1810_v31, %v1785_v56  ;;  %v1784_v56 = vunpack.c.l.bf16 %v5292_v1 }
 0x3c3   :  { %v1718_v57 = vpop.f32.mrf.mxu0  ;;  %v1764_v23 = vadd.f32 0.5, %v1763_v42 }
 0x3c4   :  { %v1719_v19 = vadd.f32 %v1718_v57, %v5291_v22  ;;  %v1848_v57 = vmul.f32 0.5, %v1841_v24 }
 0x3c6   :  { %v3256_v48 = vpop.eup %3255  ;;  %v1732_v59 = vadd.f32 %v1731_v18, %v1719_v19 }
 0x3c7   :  { %v1767_v13 = vmul.f32 0.5, %v3256_v48 }
 0x3c8   :  { %v1836_v51 = vpop.f32.mrf.mxu3  ;;  %3257 = vtanh.f32 %v1732_v59  ;;  %v1812_v10 = vpop.f32.mrf.mxu1 }
 0x3c9   :  { %v1744_v52 = vpop.f32.mrf.mxu2  ;;  %v1768_v11 = vadd.f32 0.5, %v1767_v13  ;;  %v5293_v13 = vld [vmem:[#allocation97_spill] sm:$0xff] }
 0x3ca   :  { %v1745_v3 = vadd.f32 %v1744_v52, %v4070_v5  ;;  %v1787_v10 = vunpack.c.h.bf16 %v5293_v13 }
 0x3cb   :  { %v1720_v62 = vpop.f32.mrf.mxu0  ;;  %v1774_v19 = vmul.f32 %v1768_v11, %v4298_v29  ;;  %v1786_v11 = vunpack.c.l.bf16 %v5293_v13 }
 0x3cc   :  { %v1758_v32 = vadd.f32 %v1757_v49, %v1745_v3  ;;  %v1843_v29 = vadd.f32 %v1836_v51, %v1787_v10 }
 0x3ce   :  { %v3258_v2 = vpop.eup %3257  ;;  %v1770_v22 = vmul.f32 0.5, %v1758_v32 }
 0x3cf   :  { %v1775_v18 = vmul.f32 %v3258_v2, %v1764_v23 }
 0x3d0   :  { %v1838_v48 = vpop.f32.mrf.mxu3  ;;  %3259 = vtanh.f32 %v1770_v22 }
 0x3d1   :  { %v4410_v26 = vadd.f32 %v1775_v18, %v1774_v19  ;;  %v1746_v59 = vpop.f32.mrf.mxu2  ;;  %3261 = vtanh.f32 %v1848_v57  ;;  %v1853_v57 = vmul.f32 0.5, %v1843_v29 }
 0x3d3   :  { %3263 = vtanh.f32 %v4410_v26  ;;  %v1797_v15 = vpop.f32.mrf.mxu0 }
 0x3d4   :  { %v1840_v31 = vadd.f32 %v1797_v15, %v1784_v56 }
 0x3d6   :  { %v3260_v49 = vpop.eup %3259  ;;  %v1844_v42 = vmul.f32 0.5, %v1840_v31 }
 0x3d7   :  { %v1772_v52 = vmul.f32 0.5, %v3260_v49  ;;  %v3262_v24 = vpop.eup %3261 }
 0x3d8   :  { %3265 = vtanh.f32 %v1844_v42  ;;  %v1850_v2 = vmul.f32 0.5, %v3262_v24 }
 0x3d9   :  { %v3264_v3 = vpop.eup %3263  ;;  %v1773_v22 = vadd.f32 0.5, %v1772_v52 }
 0x3da   :  { %v1851_v59 = vadd.f32 0.5, %v1850_v2  ;;  %v5301_v2 = vld [vmem:[#allocation48_spill] sm:$0xff] }
 0x3db   :  { %v1778_v32 = vmul.f32 %v3264_v3, %v1773_v22  ;;  %v1799_v1 = vpop.f32.mrf.mxu0  ;;  %v5294_v3 = vld [vmem:[#allocation42_spill] sm:$0xff] }
 0x3dc   :  { %v1857_v31 = vmul.f32 %v1851_v59, %v4309_v40  ;;  %v5295_v22 = vld [vmem:[#allocation46_spill] sm:$0xff]  ;;  %v5300_v1 = vld [vmem:[#allocation57_spill] sm:$0xff]  ;;  %v5306_v59 = vld [vmem:[#allocation51_spill] sm:$0xff] }
 0x3dd   :  { %v1823_v62 = vpop.f32.mrf.mxu2  ;;  %1780 = vst [vmem:[#allocation16 + $0x18] sm:$0xff] %v1778_v32  ;;  %v1863_v19 = vpack.c.bf16 %v1778_v32, %v1778_v32  ;;  %v5298_v32 = vld [vmem:[#allocation44_spill] sm:$0xff] }
 0x3de   :  { %v1842_v23 = vadd.f32 %v1823_v62, %v1786_v11  ;;  %v3266_v18 = vpop.eup %3265  ;;  %v5296_v11 = vld [vmem:[#allocation47_spill] sm:$0xff] }
 0x3df   :  { %v1846_v48 = vmul.f32 0.5, %v3266_v18  ;;  %1885 = vmatmul.bf16.vlgmr.msra.gmra.mxu1 %v1863_v19  ;;  %1911 = vmatmul.bf16.vlgmr.msra.gmra.mxu3 %v1863_v19  ;;  %v5297_v62 = vld [vmem:[#allocation43_spill] sm:$0xff]  ;;  %v5304_v18 = vld [vmem:[#allocation61_spill] sm:$0xff] }
 0x3e0   :  { %3267 = vtanh.f32 %v1842_v23  ;;  %2008 = vmatpush.bf16.msra.mxu1 %v5103_v50  ;;  %2034 = vmatpush.bf16.msra.mxu3 %v3574_v25  ;;  %v5299_v23 = vld [vmem:[#allocation56_spill] sm:$0xff] }
 0x3e1   :  { %3269 = vtanh.f32 %v1853_v57  ;;  %v1847_v51 = vadd.f32 0.5, %v1846_v48  ;;  %v5302_v57 = vld [vmem:[#allocation49_spill] sm:$0xff]  ;;  %v5305_v48 = vld [vmem:[#allocation50_spill] sm:$0xff] }
 0x3e4   :  { %2009 = vmatpush.bf16.msra.mxu1 %v3584_v34  ;;  %2035 = vmatpush.bf16.msra.mxu3 %v5104_v45 }
 0x3e5   :  { %v1825_v56 = vpop.f32.mrf.mxu2 }
 0x3e6   :  { %v3268_v15 = vpop.eup %3267  ;;  %v5308_v56 = vld [vmem:[#allocation66_spill] sm:$0xff] }
 0x3e7   :  { %v1858_v49 = vmul.f32 %v3268_v15, %v1847_v51  ;;  %v3270_v13 = vpop.eup %3269  ;;  %v5307_v51 = vld [vmem:[#allocation65_spill] sm:$0xff]  ;;  %v5309_v15 = vld [vmem:[#allocation52_spill] sm:$0xff] }
 0x3e8   :  { %2010 = vmatpush.bf16.msra.mxu1 %v5105_v58  ;;  %2036 = vmatpush.bf16.msra.mxu3 %v5106_v36  ;;  %v1855_v42 = vmul.f32 0.5, %v3270_v13  ;;  %v5312_v13 = vld [vmem:[#allocation55_spill] sm:$0xff] }
 0x3e9   :  { %v4421_v10 = vadd.f32 %v1858_v49, %v1857_v31  ;;  %v5310_v31 = vld [vmem:[#allocation53_spill] sm:$0xff]  ;;  %v5311_v49 = vld [vmem:[#allocation54_spill] sm:$0xff] }
 0x3ea   :  { %v1856_v40 = vadd.f32 0.5, %v1855_v42  ;;  %v5313_v42 = vld [vmem:[#allocation69_spill] sm:$0xff] }
 0x3eb   :  { %3271 = vtanh.f32 %v4421_v10 }
 0x3ec   :  { %2011 = vmatpush.bf16.msra.mxu1 %v5107_v20  ;;  %2037 = vmatpush.bf16.msra.mxu3 %v5108_v33 }
 0x3ef   :  { %1937 = vmatmul.bf16.vlgmr.msrb.gmra.mxu1 %v1863_v19  ;;  %1963 = vmatmul.bf16.vlgmr.msrb.gmra.mxu3 %v1863_v19  ;;  %v5303_v19 = vld [vmem:[#allocation60_spill] sm:$0xff] }
 0x3f0   :  { %2012 = vmatpush.bf16.msra.mxu1 %v5109_v60  ;;  %2038 = vmatpush.bf16.msra.mxu3 %v5110_v46 }
 0x3f1   :  { %v3272_v52 = vpop.eup %3271 }
 0x3f2   :  { %v1861_v24 = vmul.f32 %v3272_v52, %v1856_v40  ;;  %v5314_v40 = vld [vmem:[#allocation71_spill] sm:$0xff]  ;;  %v5315_v52 = vld [vmem:[#allocation58_spill] sm:$0xff] }
 0x3f4   :  { %v1862_v29 = vpack.c.bf16 %v1861_v24, %v1861_v24  ;;  %2013 = vmatpush.bf16.msra.mxu1 %v5111_v39  ;;  %2039 = vmatpush.bf16.msra.mxu3 %v5112_v54  ;;  %v5316_v24 = vld [vmem:[#allocation59_spill] sm:$0xff] }
 0x3f6   :  { %1872 = vmatmul.bf16.vlgmr.msra.gmra.mxu0 %v1862_v29  ;;  %1898 = vmatmul.bf16.vlgmr.msra.gmra.mxu2 %v1862_v29 }
 0x3f7   :  { %1995 = vmatpush.bf16.msra.mxu0 %v3567_v16  ;;  %2021 = vmatpush.bf16.msra.mxu2 %v3571_v21 }
 0x3f8   :  { %2014 = vmatpush.bf16.msra.mxu1 %v3648_v38  ;;  %2040 = vmatpush.bf16.msra.mxu3 %v3653_v44 }
 0x3fb   :  { %1996 = vmatpush.bf16.msra.mxu0 %v5058_v63  ;;  %2022 = vmatpush.bf16.msra.mxu2 %v5059_v7 }
 0x3fc   :  { %2015 = vmatpush.bf16.msra.mxu1 %v3660_v55  ;;  %2041 = vmatpush.bf16.msra.mxu3 %v3665_v61 }
 0x3ff   :  { %1997 = vmatpush.bf16.msra.mxu0 %v5062_v53  ;;  %2023 = vmatpush.bf16.msra.mxu2 %v5063_v0 }
 0x400   :  { %2084 = vmatpush.bf16.msrb.mxu1 %v5113_v6  ;;  %2110 = vmatpush.bf16.msrb.mxu3 %v3685_v9 }
 0x401   :  { %2016 = vmatmul.bf16.vlgmr.msra.gmra.mxu1 %v1862_v29  ;;  %2042 = vmatmul.bf16.vlgmr.msra.gmra.mxu3 %v1862_v29 }
 0x403   :  { %1998 = vmatpush.bf16.msra.mxu0 %v5066_v28  ;;  %2024 = vmatpush.bf16.msra.mxu2 %v5067_v35 }
 0x404   :  { %2085 = vmatpush.bf16.msrb.mxu1 %v3689_v14  ;;  %2111 = vmatpush.bf16.msrb.mxu3 %v3691_v17 }
 0x406   :  { %1924 = vmatmul.bf16.vlgmr.msrb.gmra.mxu0 %v1862_v29  ;;  %1950 = vmatmul.bf16.vlgmr.msrb.gmra.mxu2 %v1862_v29 }
 0x407   :  { %1999 = vmatpush.bf16.msra.mxu0 %v5070_v37  ;;  %2025 = vmatpush.bf16.msra.mxu2 %v5071_v12 }
 0x408   :  { %2086 = vmatpush.bf16.msrb.mxu1 %v3695_v27  ;;  %2112 = vmatpush.bf16.msrb.mxu3 %v3697_v30 }
 0x40b   :  { %2000 = vmatpush.bf16.msra.mxu0 %v5074_v4  ;;  %2026 = vmatpush.bf16.msra.mxu2 %v5075_v47 }
 0x40c   :  { %2087 = vmatpush.bf16.msrb.mxu1 %v3701_v41  ;;  %2113 = vmatpush.bf16.msrb.mxu3 %v3703_v43 }
 0x40f   :  { %2001 = vmatpush.bf16.msra.mxu0 %v5077_v8  ;;  %2027 = vmatpush.bf16.msra.mxu2 %v5294_v3 }
 0x410   :  { %2088 = vmatpush.bf16.msrb.mxu1 %v5295_v22  ;;  %2114 = vmatpush.bf16.msrb.mxu3 %v5296_v11 }
 0x413   :  { %2002 = vmatpush.bf16.msra.mxu0 %v5297_v62  ;;  %2028 = vmatpush.bf16.msra.mxu2 %v5298_v32  ;;  %v5355_v62 = vld [vmem:[#allocation25_spill] sm:$0xff] }
 0x414   :  { %2089 = vmatpush.bf16.msrb.mxu1 %v5301_v2  ;;  %2115 = vmatpush.bf16.msrb.mxu3 %v5302_v57  ;;  %v5354_v2 = vld [vmem:[#allocation23_spill] sm:$0xff] }
 0x416   :  { %2003 = vmatmul.bf16.vlgmr.msra.gmra.mxu0 %v1862_v29  ;;  %2029 = vmatmul.bf16.vlgmr.msra.gmra.mxu2 %v1862_v29  ;;  %v5317_v29 = vld [vmem:[#allocation75_spill] sm:$0xff] }
 0x417   :  { %2071 = vmatpush.bf16.msrb.mxu0 %v5299_v23  ;;  %2097 = vmatpush.bf16.msrb.mxu2 %v5300_v1 }
 0x418   :  { %2090 = vmatpush.bf16.msrb.mxu1 %v5305_v48  ;;  %2116 = vmatpush.bf16.msrb.mxu3 %v5306_v59 }
 0x41b   :  { %2072 = vmatpush.bf16.msrb.mxu0 %v5303_v19  ;;  %2098 = vmatpush.bf16.msrb.mxu2 %v5304_v18  ;;  %v5353_v18 = vld [vmem:[#allocation22_spill] sm:$0xff] }
 0x41c   :  { %2091 = vmatpush.bf16.msrb.mxu1 %v5309_v15  ;;  %2117 = vmatpush.bf16.msrb.mxu3 %v5310_v31  ;;  %v5320_v15 = vld [vmem:[#allocation64_spill] sm:$0xff]  ;;  %v5321_v31 = vld [vmem:[#allocation79_spill] sm:$0xff] }
 0x41f   :  { %2073 = vmatpush.bf16.msrb.mxu0 %v5307_v51  ;;  %2099 = vmatpush.bf16.msrb.mxu2 %v5308_v56  ;;  %v5318_v51 = vld [vmem:[#allocation76_spill] sm:$0xff]  ;;  %v5319_v56 = vld [vmem:[#allocation62_spill] sm:$0xff] }
 0x420   :  { %2136 = vmatpush.bf16.msra.mxu1 %v5311_v49  ;;  %2162 = vmatpush.bf16.msra.mxu3 %v5312_v13  ;;  %v5322_v49 = vld [vmem:[#allocation81_spill] sm:$0xff]  ;;  %v5323_v13 = vld [vmem:[#allocation67_spill] sm:$0xff] }
 0x423   :  { %2074 = vmatpush.bf16.msrb.mxu0 %v5313_v42  ;;  %2100 = vmatpush.bf16.msrb.mxu2 %v5314_v40  ;;  %v5324_v42 = vld [vmem:[#allocation68_spill] sm:$0xff]  ;;  %v5325_v40 = vld [vmem:[#allocation85_spill] sm:$0xff] }
 0x424   :  { %2137 = vmatpush.bf16.msra.mxu1 %v5315_v52  ;;  %2163 = vmatpush.bf16.msra.mxu3 %v5316_v24  ;;  %v5326_v52 = vld [vmem:[#allocation86_spill] sm:$0xff]  ;;  %v5327_v24 = vld [vmem:[#allocation72_spill] sm:$0xff] }
 0x427   :  { %2075 = vmatpush.bf16.msrb.mxu0 %v5317_v29  ;;  %2101 = vmatpush.bf16.msrb.mxu2 %v5318_v51  ;;  %v5328_v29 = vld [vmem:[#allocation74_spill] sm:$0xff]  ;;  %v5329_v51 = vld [vmem:[#allocation89_spill] sm:$0xff] }
 0x428   :  { %2138 = vmatpush.bf16.msra.mxu1 %v5319_v56  ;;  %2164 = vmatpush.bf16.msra.mxu3 %v5320_v15  ;;  %v5330_v56 = vld [vmem:[#allocation91_spill] sm:$0xff]  ;;  %v5331_v15 = vld [vmem:[#allocation92_spill] sm:$0xff] }
 0x42b   :  { %2076 = vmatpush.bf16.msrb.mxu0 %v5321_v31  ;;  %2102 = vmatpush.bf16.msrb.mxu2 %v5322_v49  ;;  %v5332_v31 = vld [vmem:[#allocation94_spill] sm:$0xff]  ;;  %v5333_v49 = vld [vmem:[#allocation77_spill] sm:$0xff] }
 0x42c   :  { %2139 = vmatpush.bf16.msra.mxu1 %v5323_v13  ;;  %2165 = vmatpush.bf16.msra.mxu3 %v5324_v42  ;;  %v5334_v13 = vld [vmem:[#allocation78_spill] sm:$0xff]  ;;  %v5335_v42 = vld [vmem:[#allocation95_spill] sm:$0xff] }
 0x42f   :  { %2077 = vmatpush.bf16.msrb.mxu0 %v5325_v40  ;;  %2103 = vmatpush.bf16.msrb.mxu2 %v5326_v52  ;;  %v5336_v40 = vld [vmem:[#allocation96_spill] sm:$0xff]  ;;  %v5337_v52 = vld [vmem:[#allocation82_spill] sm:$0xff] }
 0x430   :  { %2140 = vmatpush.bf16.msra.mxu1 %v5327_v24  ;;  %2166 = vmatpush.bf16.msra.mxu3 %v5328_v29  ;;  %v5338_v24 = vld [vmem:[#allocation84_spill] sm:$0xff]  ;;  %v5339_v29 = vld [vmem:[#allocation98_spill] sm:$0xff] }
 0x433   :  { %2078 = vmatpush.bf16.msrb.mxu0 %v5329_v51  ;;  %2104 = vmatpush.bf16.msrb.mxu2 %v5330_v56  ;;  %v5340_v51 = vld [vmem:[#allocation100_spill] sm:$0xff]  ;;  %v5341_v56 = vld [vmem:[#allocation87_spill] sm:$0xff] }
 0x434   :  { %2141 = vmatpush.bf16.msra.mxu1 %v5333_v49  ;;  %2167 = vmatpush.bf16.msra.mxu3 %v5334_v13  ;;  %v5344_v49 = vld [vmem:[#allocation102_spill] sm:$0xff]  ;;  %v5345_v13 = vld [vmem:[#allocation104_spill] sm:$0xff] }
 0x437   :  { %2123 = vmatpush.bf16.msra.mxu0 %v5331_v15  ;;  %2149 = vmatpush.bf16.msra.mxu2 %v5332_v31  ;;  %v5342_v15 = vld [vmem:[#allocation88_spill] sm:$0xff]  ;;  %v5343_v31 = vld [vmem:[#allocation101_spill] sm:$0xff] }
 0x438   :  { %2142 = vmatpush.bf16.msra.mxu1 %v5337_v52  ;;  %2168 = vmatpush.bf16.msra.mxu3 %v5338_v24  ;;  %v5348_v52 = vld [vmem:[#allocation108_spill] sm:$0xff]  ;;  %v5349_v24 = vld [vmem:[#allocation110_spill] sm:$0xff] }
 0x43b   :  { %2124 = vmatpush.bf16.msra.mxu0 %v5335_v42  ;;  %2150 = vmatpush.bf16.msra.mxu2 %v5336_v40  ;;  %v5346_v42 = vld [vmem:[#allocation106_spill] sm:$0xff]  ;;  %v5347_v40 = vld [vmem:[#allocation107_spill] sm:$0xff] }
 0x43c   :  { %2143 = vmatpush.bf16.msra.mxu1 %v5341_v56  ;;  %2169 = vmatpush.bf16.msra.mxu3 %v5342_v15  ;;  %v5352_v56 = vld [vmem:[#allocation114_spill] sm:$0xff] }
 0x43f   :  { %2125 = vmatpush.bf16.msra.mxu0 %v5339_v29  ;;  %2151 = vmatpush.bf16.msra.mxu2 %v5340_v51  ;;  %v5350_v29 = vld [vmem:[#allocation112_spill] sm:$0xff]  ;;  %v5351_v51 = vld [vmem:[#allocation113_spill] sm:$0xff] }
 0x443   :  { %2126 = vmatpush.bf16.msra.mxu0 %v5343_v31  ;;  %2152 = vmatpush.bf16.msra.mxu2 %v5344_v49 }
 0x447   :  { %2127 = vmatpush.bf16.msra.mxu0 %v5345_v13  ;;  %2153 = vmatpush.bf16.msra.mxu2 %v5346_v42 }
 0x44b   :  { %2128 = vmatpush.bf16.msra.mxu0 %v5347_v40  ;;  %2154 = vmatpush.bf16.msra.mxu2 %v5348_v52 }
 0x44f   :  { %2129 = vmatpush.bf16.msra.mxu0 %v5349_v24  ;;  %2155 = vmatpush.bf16.msra.mxu2 %v5350_v29 }
 0x453   :  { %2130 = vmatpush.bf16.msra.mxu0 %v5351_v51  ;;  %2156 = vmatpush.bf16.msra.mxu2 %v5352_v56 }
 0x45c   :  { %v1886_v15 = vpop.f32.mrf.mxu1 }
 0x462   :  { %v1912_v31 = vpop.f32.mrf.mxu3 }
 0x464   :  { %v1888_v59 = vpop.f32.mrf.mxu1 }
 0x46a   :  { %v1914_v49 = vpop.f32.mrf.mxu3 }
 0x46c   :  { %v1938_v48 = vpop.f32.mrf.mxu1 }
 0x472   :  { %v1964_v19 = vpop.f32.mrf.mxu3 }
 0x473   :  { %v1873_v13 = vpop.f32.mrf.mxu0 }
 0x474   :  { %v1874_v42 = vadd.f32 %v1873_v13, %v5353_v18  ;;  %v1940_v57 = vpop.f32.mrf.mxu1 }
 0x476   :  { %v1887_v40 = vadd.f32 %v1886_v15, %v1874_v42  ;;  %v5356_v42 = vld [vmem:[#allocation99_spill] sm:$0xff] }
 0x477   :  { %v1992_v3 = vunpack.c.h.bf16 %v5356_v42 }
 0x478   :  { %v1968_v1 = vmul.f32 0.5, %v1887_v40 }
 0x479   :  { %v1899_v52 = vpop.f32.mrf.mxu2 }
 0x47a   :  { %v1900_v24 = vadd.f32 %v1899_v52, %v5354_v2  ;;  %v1966_v51 = vpop.f32.mrf.mxu3  ;;  %3273 = vtanh.f32 %v1968_v1 }
 0x47b   :  { %v1875_v29 = vpop.f32.mrf.mxu0 }
 0x47c   :  { %v1913_v23 = vadd.f32 %v1912_v31, %v1900_v24 }
 0x47e   :  { %v1972_v32 = vmul.f32 0.5, %v1913_v23  ;;  %v2017_v56 = vpop.f32.mrf.mxu1 }
 0x47f   :  { %v2048_v51 = vadd.f32 %v2017_v56, %v1992_v3  ;;  %v1991_v3 = vunpack.c.l.bf16 %v5356_v42 }
 0x480   :  { %3275 = vtanh.f32 %v1972_v32  ;;  %v3274_v22 = vpop.eup %3273 }
 0x481   :  { %v1901_v59 = vpop.f32.mrf.mxu2  ;;  %v1970_v52 = vmul.f32 0.5, %v3274_v22 }
 0x483   :  { %v1925_v49 = vpop.f32.mrf.mxu0  ;;  %v1971_v29 = vadd.f32 0.5, %v1970_v52 }
 0x484   :  { %v1926_v11 = vadd.f32 %v1925_v49, %v5355_v62  ;;  %v2043_v57 = vpop.f32.mrf.mxu3  ;;  %v2055_v49 = vmul.f32 0.5, %v2048_v51 }
 0x486   :  { %v3276_v13 = vpop.eup %3275  ;;  %v1939_v18 = vadd.f32 %v1938_v48, %v1926_v11  ;;  %v2019_v40 = vpop.f32.mrf.mxu1 }
 0x487   :  { %v1974_v15 = vmul.f32 0.5, %v3276_v13 }
 0x488   :  { %3277 = vtanh.f32 %v1939_v18 }
 0x489   :  { %v1951_v31 = vpop.f32.mrf.mxu2  ;;  %v1975_v32 = vadd.f32 0.5, %v1974_v15  ;;  %v5357_v15 = vld [vmem:[#allocation103_spill] sm:$0xff] }
 0x48a   :  { %v1952_v23 = vadd.f32 %v1951_v31, %v4070_v5  ;;  %v1994_v40 = vunpack.c.h.bf16 %v5357_v15 }
 0x48b   :  { %v1927_v1 = vpop.f32.mrf.mxu0  ;;  %v1981_v11 = vmul.f32 %v1975_v32, %v4410_v26  ;;  %v1993_v32 = vunpack.c.l.bf16 %v5357_v15 }
 0x48c   :  { %v1965_v24 = vadd.f32 %v1964_v19, %v1952_v23  ;;  %v2045_v13 = vpop.f32.mrf.mxu3  ;;  %v2050_v26 = vadd.f32 %v2043_v57, %v1994_v40 }
 0x48e   :  { %v3278_v59 = vpop.eup %3277  ;;  %v1977_v62 = vmul.f32 0.5, %v1965_v24 }
 0x48f   :  { %v1982_v48 = vmul.f32 %v3278_v59, %v1971_v29 }
 0x490   :  { %3279 = vtanh.f32 %v1977_v62 }
 0x491   :  { %v4522_v2 = vadd.f32 %v1982_v48, %v1981_v11  ;;  %v1953_v18 = vpop.f32.mrf.mxu2  ;;  %3281 = vtanh.f32 %v2055_v49  ;;  %v2060_v49 = vmul.f32 0.5, %v2050_v26 }
 0x493   :  { %3283 = vtanh.f32 %v4522_v2  ;;  %v2004_v22 = vpop.f32.mrf.mxu0 }
 0x494   :  { %v2047_v56 = vadd.f32 %v2004_v22, %v1991_v3 }
 0x496   :  { %v3280_v19 = vpop.eup %3279  ;;  %v2051_v52 = vmul.f32 0.5, %v2047_v56 }
 0x497   :  { %v1979_v31 = vmul.f32 0.5, %v3280_v19  ;;  %v3282_v51 = vpop.eup %3281 }
 0x498   :  { %3285 = vtanh.f32 %v2051_v52  ;;  %v2057_v59 = vmul.f32 0.5, %v3282_v51 }
 0x499   :  { %v3284_v23 = vpop.eup %3283  ;;  %v1980_v62 = vadd.f32 0.5, %v1979_v31  ;;  %v2030_v1 = vpop.f32.mrf.mxu2 }
 0x49a   :  { %v2049_v29 = vadd.f32 %v2030_v1, %v1993_v32  ;;  %v2058_v18 = vadd.f32 0.5, %v2057_v59  ;;  %v5360_v32 = vld [vmem:[#allocation47_spill] sm:$0xff]  ;;  %v5365_v59 = vld [vmem:[#allocation48_spill] sm:$0xff] }
 0x49b   :  { %v1985_v24 = vmul.f32 %v3284_v23, %v1980_v62  ;;  %v2006_v42 = vpop.f32.mrf.mxu0  ;;  %v5358_v23 = vld [vmem:[#allocation42_spill] sm:$0xff]  ;;  %v5361_v1 = vld [vmem:[#allocation43_spill] sm:$0xff] }
 0x49c   :  { %3287 = vtanh.f32 %v2049_v29  ;;  %v2064_v56 = vmul.f32 %v2058_v18, %v4421_v10  ;;  %v5359_v62 = vld [vmem:[#allocation46_spill] sm:$0xff]  ;;  %v5363_v29 = vld [vmem:[#allocation56_spill] sm:$0xff]  ;;  %v5364_v42 = vld [vmem:[#allocation57_spill] sm:$0xff] }
 0x49d   :  { %1987 = vst [vmem:[#allocation16 + $0x20] sm:$0xff] %v1985_v24  ;;  %v2070_v11 = vpack.c.bf16 %v1985_v24, %v1985_v24  ;;  %3289 = vtanh.f32 %v2060_v49  ;;  %v5362_v24 = vld [vmem:[#allocation44_spill] sm:$0xff]  ;;  %v5366_v49 = vld [vmem:[#allocation49_spill] sm:$0xff]  ;;  %v5370_v18 = vld [vmem:[#allocation51_spill] sm:$0xff] }
 0x49e   :  { %v3286_v48 = vpop.eup %3285 }
 0x49f   :  { %v2053_v13 = vmul.f32 0.5, %v3286_v48  ;;  %2092 = vmatmul.bf16.vlgmr.msrb.gmra.mxu1 %v2070_v11  ;;  %2118 = vmatmul.bf16.vlgmr.msrb.gmra.mxu3 %v2070_v11  ;;  %v5368_v48 = vld [vmem:[#allocation61_spill] sm:$0xff] }
 0x4a0   :  { %2215 = vmatpush.bf16.msrb.mxu1 %v5103_v50  ;;  %2241 = vmatpush.bf16.msrb.mxu3 %v3574_v25 }
 0x4a1   :  { %v2054_v57 = vadd.f32 0.5, %v2053_v13  ;;  %v2032_v3 = vpop.f32.mrf.mxu2  ;;  %v5369_v13 = vld [vmem:[#allocation50_spill] sm:$0xff] }
 0x4a2   :  { %v3288_v22 = vpop.eup %3287  ;;  %v5372_v3 = vld [vmem:[#allocation66_spill] sm:$0xff] }
 0x4a3   :  { %v2065_v19 = vmul.f32 %v3288_v22, %v2054_v57  ;;  %v3290_v15 = vpop.eup %3289  ;;  %v5371_v57 = vld [vmem:[#allocation65_spill] sm:$0xff]  ;;  %v5373_v22 = vld [vmem:[#allocation52_spill] sm:$0xff] }
 0x4a4   :  { %2216 = vmatpush.bf16.msrb.mxu1 %v3584_v34  ;;  %2242 = vmatpush.bf16.msrb.mxu3 %v5104_v45  ;;  %v2062_v52 = vmul.f32 0.5, %v3290_v15  ;;  %v5376_v15 = vld [vmem:[#allocation55_spill] sm:$0xff] }
 0x4a5   :  { %v4533_v40 = vadd.f32 %v2065_v19, %v2064_v56  ;;  %v5374_v56 = vld [vmem:[#allocation53_spill] sm:$0xff]  ;;  %v5375_v19 = vld [vmem:[#allocation54_spill] sm:$0xff] }
 0x4a6   :  { %v2063_v10 = vadd.f32 0.5, %v2062_v52  ;;  %v5377_v52 = vld [vmem:[#allocation69_spill] sm:$0xff] }
 0x4a7   :  { %3291 = vtanh.f32 %v4533_v40 }
 0x4a8   :  { %2217 = vmatpush.bf16.msrb.mxu1 %v5105_v58  ;;  %2243 = vmatpush.bf16.msrb.mxu3 %v5106_v36 }
 0x4ac   :  { %2218 = vmatpush.bf16.msrb.mxu1 %v5107_v20  ;;  %2244 = vmatpush.bf16.msrb.mxu3 %v5108_v33 }
 0x4ad   :  { %v3292_v31 = vpop.eup %3291 }
 0x4ae   :  { %v2068_v51 = vmul.f32 %v3292_v31, %v2063_v10  ;;  %v5378_v10 = vld [vmem:[#allocation71_spill] sm:$0xff]  ;;  %v5379_v31 = vld [vmem:[#allocation58_spill] sm:$0xff] }
 0x4af   :  { %2144 = vmatmul.bf16.vlgmr.msra.gmra.mxu1 %v2070_v11  ;;  %2170 = vmatmul.bf16.vlgmr.msra.gmra.mxu3 %v2070_v11  ;;  %v5367_v11 = vld [vmem:[#allocation60_spill] sm:$0xff] }
 0x4b0   :  { %2219 = vmatpush.bf16.msrb.mxu1 %v5109_v60  ;;  %2245 = vmatpush.bf16.msrb.mxu3 %v5110_v46  ;;  %v2069_v26 = vpack.c.bf16 %v2068_v51, %v2068_v51  ;;  %v5380_v51 = vld [vmem:[#allocation59_spill] sm:$0xff] }
 0x4b2   :  { %2079 = vmatmul.bf16.vlgmr.msrb.gmra.mxu0 %v2069_v26  ;;  %2105 = vmatmul.bf16.vlgmr.msrb.gmra.mxu2 %v2069_v26 }
 0x4b3   :  { %2202 = vmatpush.bf16.msrb.mxu0 %v3567_v16  ;;  %2228 = vmatpush.bf16.msrb.mxu2 %v3571_v21 }
 0x4b4   :  { %2220 = vmatpush.bf16.msrb.mxu1 %v5111_v39  ;;  %2246 = vmatpush.bf16.msrb.mxu3 %v5112_v54 }
 0x4b7   :  { %2203 = vmatpush.bf16.msrb.mxu0 %v5058_v63  ;;  %2229 = vmatpush.bf16.msrb.mxu2 %v5059_v7 }
 0x4b8   :  { %2221 = vmatpush.bf16.msrb.mxu1 %v3648_v38  ;;  %2247 = vmatpush.bf16.msrb.mxu3 %v3653_v44 }
 0x4bb   :  { %2204 = vmatpush.bf16.msrb.mxu0 %v5062_v53  ;;  %2230 = vmatpush.bf16.msrb.mxu2 %v5063_v0 }
 0x4bc   :  { %2222 = vmatpush.bf16.msrb.mxu1 %v3660_v55  ;;  %2248 = vmatpush.bf16.msrb.mxu3 %v3665_v61 }
 0x4bf   :  { %2205 = vmatpush.bf16.msrb.mxu0 %v5066_v28  ;;  %2223 = vmatmul.bf16.vlgmr.msrb.gmra.mxu1 %v2069_v26 }
 0x4c0   :  { %2291 = vmatpush.bf16.msra.mxu1 %v5113_v6  ;;  %2317 = vmatpush.bf16.msra.mxu3 %v3685_v9 }
 0x4c1   :  { %2231 = vmatpush.bf16.msrb.mxu2 %v5067_v35  ;;  %2249 = vmatmul.bf16.vlgmr.msrb.gmra.mxu3 %v2069_v26 }
 0x4c2   :  { %2131 = vmatmul.bf16.vlgmr.msra.gmra.mxu0 %v2069_v26  ;;  %2157 = vmatmul.bf16.vlgmr.msra.gmra.mxu2 %v2069_v26 }
 0x4c3   :  { %2206 = vmatpush.bf16.msrb.mxu0 %v5070_v37 }
 0x4c4   :  { %2292 = vmatpush.bf16.msra.mxu1 %v3689_v14  ;;  %2318 = vmatpush.bf16.msra.mxu3 %v3691_v17 }
 0x4c5   :  { %2232 = vmatpush.bf16.msrb.mxu2 %v5071_v12 }
 0x4c7   :  { %2207 = vmatpush.bf16.msrb.mxu0 %v5074_v4 }
 0x4c8   :  { %2293 = vmatpush.bf16.msra.mxu1 %v3695_v27  ;;  %2319 = vmatpush.bf16.msra.mxu3 %v3697_v30 }
 0x4c9   :  { %2233 = vmatpush.bf16.msrb.mxu2 %v5075_v47 }
 0x4cb   :  { %2208 = vmatpush.bf16.msrb.mxu0 %v5077_v8 }
 0x4cc   :  { %2294 = vmatpush.bf16.msra.mxu1 %v3701_v41  ;;  %2320 = vmatpush.bf16.msra.mxu3 %v3703_v43 }
 0x4cd   :  { %2234 = vmatpush.bf16.msrb.mxu2 %v5358_v23 }
 0x4cf   :  { %2209 = vmatpush.bf16.msrb.mxu0 %v5361_v1  ;;  %v5419_v1 = vld [vmem:[#allocation25_spill] sm:$0xff] }
 0x4d0   :  { %2295 = vmatpush.bf16.msra.mxu1 %v5359_v62  ;;  %2321 = vmatpush.bf16.msra.mxu3 %v5360_v32 }
 0x4d1   :  { %2235 = vmatpush.bf16.msrb.mxu2 %v5362_v24 }
 0x4d2   :  { %2210 = vmatmul.bf16.vlgmr.msrb.gmra.mxu0 %v2069_v26 }
 0x4d3   :  { %2278 = vmatpush.bf16.msra.mxu0 %v5363_v29 }
 0x4d4   :  { %2296 = vmatpush.bf16.msra.mxu1 %v5365_v59  ;;  %2322 = vmatpush.bf16.msra.mxu3 %v5366_v49  ;;  %v5418_v59 = vld [vmem:[#allocation23_spill] sm:$0xff] }
 0x4d5   :  { %2304 = vmatpush.bf16.msra.mxu2 %v5364_v42 }
 0x4d6   :  { %2236 = vmatmul.bf16.vlgmr.msrb.gmra.mxu2 %v2069_v26  ;;  %v5381_v26 = vld [vmem:[#allocation75_spill] sm:$0xff] }
 0x4d7   :  { %2279 = vmatpush.bf16.msra.mxu0 %v5367_v11 }
 0x4d8   :  { %2297 = vmatpush.bf16.msra.mxu1 %v5369_v13  ;;  %2323 = vmatpush.bf16.msra.mxu3 %v5370_v18 }
 0x4d9   :  { %2305 = vmatpush.bf16.msra.mxu2 %v5368_v48  ;;  %v5417_v48 = vld [vmem:[#allocation22_spill] sm:$0xff] }
 0x4db   :  { %2280 = vmatpush.bf16.msra.mxu0 %v5371_v57  ;;  %v5382_v57 = vld [vmem:[#allocation76_spill] sm:$0xff] }
 0x4dc   :  { %2298 = vmatpush.bf16.msra.mxu1 %v5373_v22  ;;  %2324 = vmatpush.bf16.msra.mxu3 %v5374_v56  ;;  %v5384_v22 = vld [vmem:[#allocation64_spill] sm:$0xff]  ;;  %v5385_v56 = vld [vmem:[#allocation79_spill] sm:$0xff] }
 0x4dd   :  { %2306 = vmatpush.bf16.msra.mxu2 %v5372_v3  ;;  %v5383_v3 = vld [vmem:[#allocation62_spill] sm:$0xff] }
 0x4df   :  { %2281 = vmatpush.bf16.msra.mxu0 %v5377_v52  ;;  %v5388_v52 = vld [vmem:[#allocation68_spill] sm:$0xff] }
 0x4e0   :  { %2343 = vmatpush.bf16.msrb.mxu1 %v5375_v19  ;;  %2369 = vmatpush.bf16.msrb.mxu3 %v5376_v15  ;;  %v5386_v19 = vld [vmem:[#allocation81_spill] sm:$0xff]  ;;  %v5387_v15 = vld [vmem:[#allocation67_spill] sm:$0xff] }
 0x4e1   :  { %2307 = vmatpush.bf16.msra.mxu2 %v5378_v10  ;;  %v5389_v10 = vld [vmem:[#allocation85_spill] sm:$0xff] }
 0x4e3   :  { %2282 = vmatpush.bf16.msra.mxu0 %v5381_v26  ;;  %v5392_v26 = vld [vmem:[#allocation74_spill] sm:$0xff] }
 0x4e4   :  { %2344 = vmatpush.bf16.msrb.mxu1 %v5379_v31  ;;  %2370 = vmatpush.bf16.msrb.mxu3 %v5380_v51  ;;  %v5390_v31 = vld [vmem:[#allocation86_spill] sm:$0xff]  ;;  %v5391_v51 = vld [vmem:[#allocation72_spill] sm:$0xff] }
 0x4e5   :  { %2308 = vmatpush.bf16.msra.mxu2 %v5382_v57  ;;  %v5393_v57 = vld [vmem:[#allocation89_spill] sm:$0xff] }
 0x4e7   :  { %2283 = vmatpush.bf16.msra.mxu0 %v5385_v56  ;;  %v5396_v56 = vld [vmem:[#allocation94_spill] sm:$0xff] }
 0x4e8   :  { %2345 = vmatpush.bf16.msrb.mxu1 %v5383_v3  ;;  %2371 = vmatpush.bf16.msrb.mxu3 %v5384_v22  ;;  %v5394_v3 = vld [vmem:[#allocation91_spill] sm:$0xff]  ;;  %v5395_v22 = vld [vmem:[#allocation92_spill] sm:$0xff] }
 0x4e9   :  { %2309 = vmatpush.bf16.msra.mxu2 %v5386_v19  ;;  %v5397_v19 = vld [vmem:[#allocation77_spill] sm:$0xff] }
 0x4eb   :  { %2284 = vmatpush.bf16.msra.mxu0 %v5389_v10  ;;  %v5400_v10 = vld [vmem:[#allocation96_spill] sm:$0xff] }
 0x4ec   :  { %2346 = vmatpush.bf16.msrb.mxu1 %v5387_v15  ;;  %2372 = vmatpush.bf16.msrb.mxu3 %v5388_v52  ;;  %v5398_v15 = vld [vmem:[#allocation78_spill] sm:$0xff]  ;;  %v5399_v52 = vld [vmem:[#allocation95_spill] sm:$0xff] }
 0x4ed   :  { %2310 = vmatpush.bf16.msra.mxu2 %v5390_v31  ;;  %v5401_v31 = vld [vmem:[#allocation82_spill] sm:$0xff] }
 0x4ef   :  { %2285 = vmatpush.bf16.msra.mxu0 %v5393_v57  ;;  %v5404_v57 = vld [vmem:[#allocation100_spill] sm:$0xff] }
 0x4f0   :  { %2347 = vmatpush.bf16.msrb.mxu1 %v5391_v51  ;;  %2373 = vmatpush.bf16.msrb.mxu3 %v5392_v26  ;;  %v5402_v51 = vld [vmem:[#allocation84_spill] sm:$0xff]  ;;  %v5403_v26 = vld [vmem:[#allocation98_spill] sm:$0xff] }
 0x4f1   :  { %2311 = vmatpush.bf16.msra.mxu2 %v5394_v3  ;;  %v5405_v3 = vld [vmem:[#allocation87_spill] sm:$0xff] }
 0x4f3   :  { %2330 = vmatpush.bf16.msrb.mxu0 %v5395_v22  ;;  %v5406_v22 = vld [vmem:[#allocation88_spill] sm:$0xff] }
 0x4f4   :  { %2348 = vmatpush.bf16.msrb.mxu1 %v5397_v19  ;;  %2374 = vmatpush.bf16.msrb.mxu3 %v5398_v15  ;;  %v5408_v19 = vld [vmem:[#allocation102_spill] sm:$0xff]  ;;  %v5409_v15 = vld [vmem:[#allocation104_spill] sm:$0xff] }
 0x4f5   :  { %2356 = vmatpush.bf16.msrb.mxu2 %v5396_v56  ;;  %v5407_v56 = vld [vmem:[#allocation101_spill] sm:$0xff] }
 0x4f7   :  { %2331 = vmatpush.bf16.msrb.mxu0 %v5399_v52  ;;  %v5410_v52 = vld [vmem:[#allocation106_spill] sm:$0xff] }
 0x4f8   :  { %2349 = vmatpush.bf16.msrb.mxu1 %v5401_v31  ;;  %2375 = vmatpush.bf16.msrb.mxu3 %v5402_v51  ;;  %v5412_v31 = vld [vmem:[#allocation108_spill] sm:$0xff]  ;;  %v5413_v51 = vld [vmem:[#allocation110_spill] sm:$0xff] }
 0x4f9   :  { %2357 = vmatpush.bf16.msrb.mxu2 %v5400_v10  ;;  %v5411_v10 = vld [vmem:[#allocation107_spill] sm:$0xff] }
 0x4fb   :  { %2332 = vmatpush.bf16.msrb.mxu0 %v5403_v26  ;;  %v5414_v26 = vld [vmem:[#allocation112_spill] sm:$0xff] }
 0x4fc   :  { %2350 = vmatpush.bf16.msrb.mxu1 %v5405_v3  ;;  %2376 = vmatpush.bf16.msrb.mxu3 %v5406_v22  ;;  %v5416_v3 = vld [vmem:[#allocation114_spill] sm:$0xff] }
 0x4fd   :  { %2358 = vmatpush.bf16.msrb.mxu2 %v5404_v57  ;;  %v5415_v57 = vld [vmem:[#allocation113_spill] sm:$0xff] }
 0x4ff   :  { %2333 = vmatpush.bf16.msrb.mxu0 %v5407_v56 }
 0x501   :  { %2359 = vmatpush.bf16.msrb.mxu2 %v5408_v19 }
 0x503   :  { %2334 = vmatpush.bf16.msrb.mxu0 %v5409_v15 }
 0x505   :  { %2360 = vmatpush.bf16.msrb.mxu2 %v5410_v52 }
 0x507   :  { %2335 = vmatpush.bf16.msrb.mxu0 %v5411_v10 }
 0x509   :  { %2361 = vmatpush.bf16.msrb.mxu2 %v5412_v31 }
 0x50b   :  { %2336 = vmatpush.bf16.msrb.mxu0 %v5413_v51 }
 0x50d   :  { %2362 = vmatpush.bf16.msrb.mxu2 %v5414_v26 }
 0x50f   :  { %2337 = vmatpush.bf16.msrb.mxu0 %v5415_v57 }
 0x511   :  { %2363 = vmatpush.bf16.msrb.mxu2 %v5416_v3 }
 0x51c   :  { %v2093_v22 = vpop.f32.mrf.mxu1 }
 0x522   :  { %v2119_v56 = vpop.f32.mrf.mxu3 }
 0x524   :  { %v2095_v18 = vpop.f32.mrf.mxu1 }
 0x52a   :  { %v2121_v19 = vpop.f32.mrf.mxu3 }
 0x52c   :  { %v2145_v13 = vpop.f32.mrf.mxu1 }
 0x52f   :  { %v2080_v15 = vpop.f32.mrf.mxu0 }
 0x530   :  { %v2081_v52 = vadd.f32 %v2080_v15, %v5417_v48 }
 0x532   :  { %v2171_v11 = vpop.f32.mrf.mxu3  ;;  %v2094_v10 = vadd.f32 %v2093_v22, %v2081_v52  ;;  %v5420_v52 = vld [vmem:[#allocation105_spill] sm:$0xff] }
 0x533   :  { %v2199_v23 = vunpack.c.h.bf16 %v5420_v52 }
 0x534   :  { %v2147_v49 = vpop.f32.mrf.mxu1  ;;  %v2175_v42 = vmul.f32 0.5, %v2094_v10 }
 0x535   :  { %v2106_v31 = vpop.f32.mrf.mxu2 }
 0x536   :  { %v2107_v51 = vadd.f32 %v2106_v31, %v5418_v59  ;;  %3293 = vtanh.f32 %v2175_v42 }
 0x537   :  { %v2082_v26 = vpop.f32.mrf.mxu0 }
 0x538   :  { %v2120_v29 = vadd.f32 %v2119_v56, %v2107_v51 }
 0x53a   :  { %v2173_v57 = vpop.f32.mrf.mxu3  ;;  %v2179_v24 = vmul.f32 0.5, %v2120_v29 }
 0x53c   :  { %3295 = vtanh.f32 %v2179_v24  ;;  %v2224_v3 = vpop.f32.mrf.mxu1  ;;  %v3294_v62 = vpop.eup %3293 }
 0x53d   :  { %v2108_v18 = vpop.f32.mrf.mxu2  ;;  %v2177_v31 = vmul.f32 0.5, %v3294_v62  ;;  %v2255_v57 = vadd.f32 %v2224_v3, %v2199_v23  ;;  %v2198_v23 = vunpack.c.l.bf16 %v5420_v52 }
 0x53f   :  { %v2132_v19 = vpop.f32.mrf.mxu0  ;;  %v2178_v26 = vadd.f32 0.5, %v2177_v31 }
 0x540   :  { %v2133_v32 = vadd.f32 %v2132_v19, %v5419_v1  ;;  %v2262_v19 = vmul.f32 0.5, %v2255_v57 }
 0x542   :  { %v3296_v15 = vpop.eup %3295  ;;  %v2146_v48 = vadd.f32 %v2145_v13, %v2133_v32 }
 0x543   :  { %v2181_v22 = vmul.f32 0.5, %v3296_v15 }
 0x544   :  { %v2250_v49 = vpop.f32.mrf.mxu3  ;;  %3297 = vtanh.f32 %v2146_v48  ;;  %v2226_v10 = vpop.f32.mrf.mxu1 }
 0x545   :  { %v2158_v56 = vpop.f32.mrf.mxu2  ;;  %v2182_v24 = vadd.f32 0.5, %v2181_v22  ;;  %v5421_v22 = vld [vmem:[#allocation109_spill] sm:$0xff] }
 0x546   :  { %v2159_v29 = vadd.f32 %v2158_v56, %v4070_v5  ;;  %v2201_v10 = vunpack.c.h.bf16 %v5421_v22 }
 0x547   :  { %v2134_v42 = vpop.f32.mrf.mxu0  ;;  %v2188_v32 = vmul.f32 %v2182_v24, %v4522_v2  ;;  %v2200_v24 = vunpack.c.l.bf16 %v5421_v22 }
 0x548   :  { %v2172_v51 = vadd.f32 %v2171_v11, %v2159_v29  ;;  %v2257_v2 = vadd.f32 %v2250_v49, %v2201_v10 }
 0x54a   :  { %v3298_v18 = vpop.eup %3297  ;;  %v2184_v1 = vmul.f32 0.5, %v2172_v51 }
 0x54b   :  { %v2189_v13 = vmul.f32 %v3298_v18, %v2178_v26 }
 0x54c   :  { %v2252_v15 = vpop.f32.mrf.mxu3  ;;  %3299 = vtanh.f32 %v2184_v1 }
 0x54d   :  { %v4634_v59 = vadd.f32 %v2189_v13, %v2188_v32  ;;  %v2160_v48 = vpop.f32.mrf.mxu2  ;;  %3301 = vtanh.f32 %v2262_v19  ;;  %v2267_v19 = vmul.f32 0.5, %v2257_v2  ;;  %v5458_v2 = vld [vmem:[#allocation91_spill] sm:$0xff] }
 0x54f   :  { %3303 = vtanh.f32 %v4634_v59  ;;  %v2211_v62 = vpop.f32.mrf.mxu0 }
 0x550   :  { %v2254_v3 = vadd.f32 %v2211_v62, %v2198_v23 }
 0x552   :  { %v3300_v11 = vpop.eup %3299  ;;  %v2258_v31 = vmul.f32 0.5, %v2254_v3 }
 0x553   :  { %v2186_v56 = vmul.f32 0.5, %v3300_v11  ;;  %v3302_v57 = vpop.eup %3301 }
 0x554   :  { %3305 = vtanh.f32 %v2258_v31  ;;  %v2264_v18 = vmul.f32 0.5, %v3302_v57  ;;  %v5457_v57 = vld [vmem:[#allocation89_spill] sm:$0xff] }
 0x555   :  { %v3304_v29 = vpop.eup %3303  ;;  %v2187_v1 = vadd.f32 0.5, %v2186_v56  ;;  %v5456_v56 = vld [vmem:[#allocation74_spill] sm:$0xff] }
 0x556   :  { %v2265_v48 = vadd.f32 0.5, %v2264_v18  ;;  %v5466_v18 = vld [vmem:[#allocation84_spill] sm:$0xff] }
 0x557   :  { %v2192_v51 = vmul.f32 %v3304_v29, %v2187_v1  ;;  %v2213_v52 = vpop.f32.mrf.mxu0  ;;  %v5459_v29 = vld [vmem:[#allocation92_spill] sm:$0xff]  ;;  %v5460_v1 = vld [vmem:[#allocation94_spill] sm:$0xff] }
 0x558   :  { %v2271_v3 = vmul.f32 %v2265_v48, %v4533_v40  ;;  %v5465_v52 = vld [vmem:[#allocation82_spill] sm:$0xff]  ;;  %v5471_v48 = vld [vmem:[#allocation101_spill] sm:$0xff] }
 0x559   :  { %v2237_v42 = vpop.f32.mrf.mxu2  ;;  %2194 = vst [vmem:[#allocation16 + $0x28] sm:$0xff] %v2192_v51  ;;  %v2277_v32 = vpack.c.bf16 %v2192_v51, %v2192_v51  ;;  %v5463_v51 = vld [vmem:[#allocation95_spill] sm:$0xff] }
 0x55a   :  { %v2256_v26 = vadd.f32 %v2237_v42, %v2200_v24  ;;  %v3306_v13 = vpop.eup %3305  ;;  %v5461_v24 = vld [vmem:[#allocation77_spill] sm:$0xff]  ;;  %v5462_v42 = vld [vmem:[#allocation78_spill] sm:$0xff] }
 0x55b   :  { %v2260_v15 = vmul.f32 0.5, %v3306_v13  ;;  %2299 = vmatmul.bf16.vlgmr.msra.gmra.mxu1 %v2277_v32  ;;  %2325 = vmatmul.bf16.vlgmr.msra.gmra.mxu3 %v2277_v32  ;;  %v5469_v13 = vld [vmem:[#allocation87_spill] sm:$0xff] }
 0x55c   :  { %3307 = vtanh.f32 %v2256_v26  ;;  %2422 = vmatpush.bf16.msra.mxu1 %v5103_v50  ;;  %2448 = vmatpush.bf16.msra.mxu3 %v3574_v25  ;;  %v5464_v26 = vld [vmem:[#allocation96_spill] sm:$0xff] }
 0x55d   :  { %3309 = vtanh.f32 %v2267_v19  ;;  %v2261_v49 = vadd.f32 0.5, %v2260_v15  ;;  %v5467_v19 = vld [vmem:[#allocation98_spill] sm:$0xff]  ;;  %v5470_v15 = vld [vmem:[#allocation88_spill] sm:$0xff] }
 0x560   :  { %2423 = vmatpush.bf16.msra.mxu1 %v3584_v34  ;;  %2449 = vmatpush.bf16.msra.mxu3 %v5104_v45  ;;  %v5446_v45 = vld [vmem:[#allocation76_spill] sm:$0xff] }
 0x561   :  { %v2239_v23 = vpop.f32.mrf.mxu2 }
 0x562   :  { %v3308_v62 = vpop.eup %3307  ;;  %v5473_v23 = vld [vmem:[#allocation104_spill] sm:$0xff] }
 0x563   :  { %v2272_v11 = vmul.f32 %v3308_v62, %v2261_v49  ;;  %v3310_v22 = vpop.eup %3309  ;;  %v5472_v49 = vld [vmem:[#allocation102_spill] sm:$0xff] }
 0x564   :  { %2424 = vmatpush.bf16.msra.mxu1 %v5105_v58  ;;  %2450 = vmatpush.bf16.msra.mxu3 %v5106_v36  ;;  %v2269_v25 = vmul.f32 0.5, %v3310_v22  ;;  %v5447_v58 = vld [vmem:[#allocation62_spill] sm:$0xff]  ;;  %v5448_v36 = vld [vmem:[#allocation64_spill] sm:$0xff] }
 0x565   :  { %v4645_v10 = vadd.f32 %v2272_v11, %v2271_v3  ;;  %v5474_v62 = vld [vmem:[#allocation106_spill] sm:$0xff]  ;;  %v5475_v3 = vld [vmem:[#allocation107_spill] sm:$0xff]  ;;  %v5476_v11 = vld [vmem:[#allocation108_spill] sm:$0xff] }
 0x566   :  { %v2270_v50 = vadd.f32 0.5, %v2269_v25  ;;  %v5477_v22 = vld [vmem:[#allocation110_spill] sm:$0xff]  ;;  %v5478_v25 = vld [vmem:[#allocation112_spill] sm:$0xff] }
 0x567   :  { %3311 = vtanh.f32 %v4645_v10 }
 0x568   :  { %2425 = vmatpush.bf16.msra.mxu1 %v5107_v20  ;;  %2451 = vmatpush.bf16.msra.mxu3 %v5108_v33  ;;  %v5449_v20 = vld [vmem:[#allocation79_spill] sm:$0xff]  ;;  %v5450_v33 = vld [vmem:[#allocation81_spill] sm:$0xff] }
 0x56b   :  { %2351 = vmatmul.bf16.vlgmr.msrb.gmra.mxu1 %v2277_v32  ;;  %2377 = vmatmul.bf16.vlgmr.msrb.gmra.mxu3 %v2277_v32  ;;  %v5468_v32 = vld [vmem:[#allocation100_spill] sm:$0xff] }
 0x56c   :  { %2426 = vmatpush.bf16.msra.mxu1 %v5109_v60  ;;  %2452 = vmatpush.bf16.msra.mxu3 %v5110_v46  ;;  %v5451_v60 = vld [vmem:[#allocation67_spill] sm:$0xff]  ;;  %v5452_v46 = vld [vmem:[#allocation68_spill] sm:$0xff] }
 0x56d   :  { %v3312_v40 = vpop.eup %3311 }
 0x56e   :  { %v2275_v31 = vmul.f32 %v3312_v40, %v2270_v50  ;;  %v5479_v50 = vld [vmem:[#allocation113_spill] sm:$0xff]  ;;  %v5480_v40 = vld [vmem:[#allocation114_spill] sm:$0xff] }
 0x570   :  { %v2276_v34 = vpack.c.bf16 %v2275_v31, %v2275_v31  ;;  %2427 = vmatpush.bf16.msra.mxu1 %v5111_v39  ;;  %2453 = vmatpush.bf16.msra.mxu3 %v5112_v54  ;;  %v5453_v39 = vld [vmem:[#allocation85_spill] sm:$0xff]  ;;  %v5454_v54 = vld [vmem:[#allocation86_spill] sm:$0xff] }
 0x572   :  { %2286 = vmatmul.bf16.vlgmr.msra.gmra.mxu0 %v2276_v34  ;;  %2312 = vmatmul.bf16.vlgmr.msra.gmra.mxu2 %v2276_v34 }
 0x573   :  { %2409 = vmatpush.bf16.msra.mxu0 %v3567_v16  ;;  %2435 = vmatpush.bf16.msra.mxu2 %v3571_v21  ;;  %v5422_v16 = vld [vmem:[#allocation42_spill] sm:$0xff] }
 0x574   :  { %2428 = vmatpush.bf16.msra.mxu1 %v3648_v38  ;;  %2454 = vmatpush.bf16.msra.mxu3 %v3653_v44  ;;  %v5423_v21 = vld [vmem:[#allocation46_spill] sm:$0xff]  ;;  %v5424_v38 = vld [vmem:[#allocation47_spill] sm:$0xff] }
 0x575   :  { %v5425_v44 = vld [vmem:[#allocation43_spill] sm:$0xff] }
 0x577   :  { %2410 = vmatpush.bf16.msra.mxu0 %v5058_v63  ;;  %2436 = vmatpush.bf16.msra.mxu2 %v5059_v7  ;;  %v5436_v63 = vld [vmem:[#allocation66_spill] sm:$0xff]  ;;  %v5437_v7 = vld [vmem:[#allocation52_spill] sm:$0xff] }
 0x578   :  { %2429 = vmatpush.bf16.msra.mxu1 %v3660_v55  ;;  %2455 = vmatpush.bf16.msra.mxu3 %v3665_v61  ;;  %v5426_v55 = vld [vmem:[#allocation44_spill] sm:$0xff] }
 0x579   :  { %v5427_v61 = vld [vmem:[#allocation56_spill] sm:$0xff] }
 0x57b   :  { %2411 = vmatpush.bf16.msra.mxu0 %v5062_v53  ;;  %2437 = vmatpush.bf16.msra.mxu2 %v5063_v0  ;;  %v5438_v53 = vld [vmem:[#allocation53_spill] sm:$0xff]  ;;  %v5439_v0 = vld [vmem:[#allocation54_spill] sm:$0xff] }
 0x57c   :  { %2498 = vmatpush.bf16.msrb.mxu1 %v5113_v6  ;;  %2524 = vmatpush.bf16.msrb.mxu3 %v3685_v9  ;;  %v5429_v9 = vld [vmem:[#allocation48_spill] sm:$0xff] }
 0x57d   :  { %2430 = vmatmul.bf16.vlgmr.msra.gmra.mxu1 %v2276_v34  ;;  %2456 = vmatmul.bf16.vlgmr.msra.gmra.mxu3 %v2276_v34  ;;  %v5455_v6 = vld [vmem:[#allocation72_spill] sm:$0xff] }
 0x57f   :  { %2412 = vmatpush.bf16.msra.mxu0 %v5066_v28  ;;  %2438 = vmatpush.bf16.msra.mxu2 %v5067_v35  ;;  %v5441_v28 = vld [vmem:[#allocation69_spill] sm:$0xff]  ;;  %v5442_v35 = vld [vmem:[#allocation71_spill] sm:$0xff] }
 0x580   :  { %2499 = vmatpush.bf16.msrb.mxu1 %v3689_v14  ;;  %2525 = vmatpush.bf16.msrb.mxu3 %v3691_v17  ;;  %v5430_v14 = vld [vmem:[#allocation49_spill] sm:$0xff]  ;;  %v5431_v17 = vld [vmem:[#allocation60_spill] sm:$0xff] }
 0x582   :  { %2338 = vmatmul.bf16.vlgmr.msrb.gmra.mxu0 %v2276_v34  ;;  %2364 = vmatmul.bf16.vlgmr.msrb.gmra.mxu2 %v2276_v34 }
 0x583   :  { %2413 = vmatpush.bf16.msra.mxu0 %v5070_v37  ;;  %2439 = vmatpush.bf16.msra.mxu2 %v5071_v12  ;;  %v5444_v37 = vld [vmem:[#allocation59_spill] sm:$0xff] }
 0x584   :  { %2500 = vmatpush.bf16.msrb.mxu1 %v3695_v27  ;;  %2526 = vmatpush.bf16.msrb.mxu3 %v3697_v30  ;;  %v5432_v27 = vld [vmem:[#allocation61_spill] sm:$0xff]  ;;  %v5433_v30 = vld [vmem:[#allocation50_spill] sm:$0xff]  ;;  %v5445_v12 = vld [vmem:[#allocation75_spill] sm:$0xff] }
 0x587   :  { %2414 = vmatpush.bf16.msra.mxu0 %v5074_v4  ;;  %2440 = vmatpush.bf16.msra.mxu2 %v5075_v47  ;;  %v5428_v4 = vld [vmem:[#allocation57_spill] sm:$0xff]  ;;  %v5440_v47 = vld [vmem:[#allocation55_spill] sm:$0xff] }
 0x588   :  { %2501 = vmatpush.bf16.msrb.mxu1 %v3701_v41  ;;  %2527 = vmatpush.bf16.msrb.mxu3 %v3703_v43  ;;  %v5434_v41 = vld [vmem:[#allocation51_spill] sm:$0xff]  ;;  %v5435_v43 = vld [vmem:[#allocation65_spill] sm:$0xff] }
 0x58b   :  { %2415 = vmatpush.bf16.msra.mxu0 %v5077_v8  ;;  %2441 = vmatpush.bf16.msra.mxu2 %v5422_v16  ;;  %v5443_v8 = vld [vmem:[#allocation58_spill] sm:$0xff] }
 0x58c   :  { %2502 = vmatpush.bf16.msrb.mxu1 %v5423_v21  ;;  %2528 = vmatpush.bf16.msrb.mxu3 %v5424_v38 }
 0x58f   :  { %2416 = vmatpush.bf16.msra.mxu0 %v5425_v44  ;;  %2442 = vmatpush.bf16.msra.mxu2 %v5426_v55  ;;  %v5481_v55 = vld [vmem:[#allocation22_spill] sm:$0xff] }
 0x590   :  { %2503 = vmatpush.bf16.msrb.mxu1 %v5429_v9  ;;  %2529 = vmatpush.bf16.msrb.mxu3 %v5430_v14 }
 0x592   :  { %2417 = vmatmul.bf16.vlgmr.msra.gmra.mxu0 %v2276_v34  ;;  %2443 = vmatmul.bf16.vlgmr.msra.gmra.mxu2 %v2276_v34 }
 0x593   :  { %2485 = vmatpush.bf16.msrb.mxu0 %v5427_v61  ;;  %2511 = vmatpush.bf16.msrb.mxu2 %v5428_v4 }
 0x594   :  { %2504 = vmatpush.bf16.msrb.mxu1 %v5433_v30  ;;  %2530 = vmatpush.bf16.msrb.mxu3 %v5434_v41 }
 0x597   :  { %2486 = vmatpush.bf16.msrb.mxu0 %v5431_v17  ;;  %2512 = vmatpush.bf16.msrb.mxu2 %v5432_v27  ;;  %v5482_v27 = vld [vmem:[#allocation23_spill] sm:$0xff] }
 0x598   :  { %2505 = vmatpush.bf16.msrb.mxu1 %v5437_v7  ;;  %2531 = vmatpush.bf16.msrb.mxu3 %v5438_v53 }
 0x59b   :  { %2487 = vmatpush.bf16.msrb.mxu0 %v5435_v43  ;;  %2513 = vmatpush.bf16.msrb.mxu2 %v5436_v63 }
 0x59c   :  { %2550 = vmatpush.bf16.msra.mxu1 %v5439_v0  ;;  %2576 = vmatpush.bf16.msra.mxu3 %v5440_v47 }
 0x59f   :  { %2488 = vmatpush.bf16.msrb.mxu0 %v5441_v28  ;;  %2514 = vmatpush.bf16.msrb.mxu2 %v5442_v35  ;;  %v5483_v35 = vld [vmem:[#allocation25_spill] sm:$0xff] }
 0x5a0   :  { %2551 = vmatpush.bf16.msra.mxu1 %v5443_v8  ;;  %2577 = vmatpush.bf16.msra.mxu3 %v5444_v37 }
 0x5a3   :  { %2489 = vmatpush.bf16.msrb.mxu0 %v5445_v12  ;;  %2515 = vmatpush.bf16.msrb.mxu2 %v5446_v45 }
 0x5a4   :  { %2552 = vmatpush.bf16.msra.mxu1 %v5447_v58  ;;  %2578 = vmatpush.bf16.msra.mxu3 %v5448_v36 }
 0x5a7   :  { %2490 = vmatpush.bf16.msrb.mxu0 %v5449_v20  ;;  %2516 = vmatpush.bf16.msrb.mxu2 %v5450_v33  ;;  %v5484_v20 = vld [vmem:[#allocation111_spill] sm:$0xff] }
 0x5a8   :  { %2553 = vmatpush.bf16.msra.mxu1 %v5451_v60  ;;  %2579 = vmatpush.bf16.msra.mxu3 %v5452_v46  ;;  %v2406_v33 = vunpack.c.h.bf16 %v5484_v20 }
 0x5ab   :  { %2491 = vmatpush.bf16.msrb.mxu0 %v5453_v39  ;;  %2517 = vmatpush.bf16.msrb.mxu2 %v5454_v54 }
 0x5ac   :  { %2554 = vmatpush.bf16.msra.mxu1 %v5455_v6  ;;  %2580 = vmatpush.bf16.msra.mxu3 %v5456_v56 }
 0x5af   :  { %2492 = vmatpush.bf16.msrb.mxu0 %v5457_v57  ;;  %2518 = vmatpush.bf16.msrb.mxu2 %v5458_v2 }
 0x5b0   :  { %2555 = vmatpush.bf16.msra.mxu1 %v5461_v24  ;;  %2581 = vmatpush.bf16.msra.mxu3 %v5462_v42 }
 0x5b3   :  { %2537 = vmatpush.bf16.msra.mxu0 %v5459_v29  ;;  %2563 = vmatpush.bf16.msra.mxu2 %v5460_v1 }
 0x5b4   :  { %2556 = vmatpush.bf16.msra.mxu1 %v5465_v52  ;;  %2582 = vmatpush.bf16.msra.mxu3 %v5466_v18 }
 0x5b7   :  { %2538 = vmatpush.bf16.msra.mxu0 %v5463_v51  ;;  %2564 = vmatpush.bf16.msra.mxu2 %v5464_v26 }
 0x5b8   :  { %2557 = vmatpush.bf16.msra.mxu1 %v5469_v13  ;;  %2583 = vmatpush.bf16.msra.mxu3 %v5470_v15 }
 0x5bb   :  { %2539 = vmatpush.bf16.msra.mxu0 %v5467_v19  ;;  %2565 = vmatpush.bf16.msra.mxu2 %v5468_v32  ;;  %v2405_v32 = vunpack.c.l.bf16 %v5484_v20 }
 0x5bf   :  { %2540 = vmatpush.bf16.msra.mxu0 %v5471_v48  ;;  %2566 = vmatpush.bf16.msra.mxu2 %v5472_v49  ;;  %v5485_v49 = vld [vmem:[#allocation115_spill] sm:$0xff] }
 0x5c3   :  { %2541 = vmatpush.bf16.msra.mxu0 %v5473_v23  ;;  %2567 = vmatpush.bf16.msra.mxu2 %v5474_v62  ;;  %v2408_v23 = vunpack.c.h.bf16 %v5485_v49 }
 0x5c7   :  { %2542 = vmatpush.bf16.msra.mxu0 %v5475_v3  ;;  %2568 = vmatpush.bf16.msra.mxu2 %v5476_v11 }
 0x5cb   :  { %2543 = vmatpush.bf16.msra.mxu0 %v5477_v22  ;;  %2569 = vmatpush.bf16.msra.mxu2 %v5478_v25 }
 0x5cf   :  { %2544 = vmatpush.bf16.msra.mxu0 %v5479_v50  ;;  %2570 = vmatpush.bf16.msra.mxu2 %v5480_v40  ;;  %v2407_v50 = vunpack.c.l.bf16 %v5485_v49 }
 0x5d8   :  { %v2300_v31 = vpop.f32.mrf.mxu1 }
 0x5de   :  { %v2326_v34 = vpop.f32.mrf.mxu3 }
 0x5e0   :  { %v2302_v16 = vpop.f32.mrf.mxu1 }
 0x5e6   :  { %v2328_v21 = vpop.f32.mrf.mxu3 }
 0x5e8   :  { %v2352_v38 = vpop.f32.mrf.mxu1 }
 0x5ee   :  { %v2378_v4 = vpop.f32.mrf.mxu3 }
 0x5ef   :  { %v2287_v44 = vpop.f32.mrf.mxu0 }
 0x5f0   :  { %v2288_v61 = vadd.f32 %v2287_v44, %v5481_v55  ;;  %v2354_v14 = vpop.f32.mrf.mxu1 }
 0x5f2   :  { %v2301_v9 = vadd.f32 %v2300_v31, %v2288_v61 }
 0x5f4   :  { %v2382_v41 = vmul.f32 0.5, %v2301_v9 }
 0x5f5   :  { %v2313_v17 = vpop.f32.mrf.mxu2 }
 0x5f6   :  { %v2314_v30 = vadd.f32 %v2313_v17, %v5482_v27  ;;  %v2380_v7 = vpop.f32.mrf.mxu3  ;;  %3313 = vtanh.f32 %v2382_v41 }
 0x5f7   :  { %v2289_v43 = vpop.f32.mrf.mxu0 }
 0x5f8   :  { %v2327_v63 = vadd.f32 %v2326_v34, %v2314_v30 }
 0x5fa   :  { %v2386_v53 = vmul.f32 0.5, %v2327_v63  ;;  %v2431_v0 = vpop.f32.mrf.mxu1 }
 0x5fb   :  { %v2462_v54 = vadd.f32 %v2431_v0, %v2406_v33 }
 0x5fc   :  { %3315 = vtanh.f32 %v2386_v53  ;;  %v3314_v37 = vpop.eup %3313 }
 0x5fd   :  { %v2315_v47 = vpop.f32.mrf.mxu2  ;;  %v2384_v46 = vmul.f32 0.5, %v3314_v37  ;;  %v2469_v24 = vmul.f32 0.5, %v2462_v54 }
 0x5ff   :  { %v2339_v28 = vpop.f32.mrf.mxu0  ;;  %v2385_v29 = vadd.f32 0.5, %v2384_v46 }
 0x600   :  { %v2340_v8 = vadd.f32 %v2339_v28, %v5483_v35  ;;  %v2457_v36 = vpop.f32.mrf.mxu3 }
 0x602   :  { %v3316_v12 = vpop.eup %3315  ;;  %v2353_v45 = vadd.f32 %v2352_v38, %v2340_v8  ;;  %v2433_v60 = vpop.f32.mrf.mxu1 }
 0x603   :  { %v2388_v58 = vmul.f32 0.5, %v3316_v12 }
 0x604   :  { %3317 = vtanh.f32 %v2353_v45 }
 0x605   :  { %v2365_v39 = vpop.f32.mrf.mxu2  ;;  %v2389_v56 = vadd.f32 0.5, %v2388_v58 }
 0x606   :  { %v2366_v6 = vadd.f32 %v2365_v39, %v4070_v5 }
 0x607   :  { %v2341_v57 = vpop.f32.mrf.mxu0  ;;  %v2395_v51 = vmul.f32 %v2389_v56, %v4634_v59  ;;  %v2464_v59 = vadd.f32 %v2457_v36, %v2408_v23 }
 0x608   :  { %v2379_v2 = vadd.f32 %v2378_v4, %v2366_v6  ;;  %v2459_v52 = vpop.f32.mrf.mxu3 }
 0x609   :  { %v2474_v38 = vmul.f32 0.5, %v2464_v59 }
 0x60a   :  { %v3318_v1 = vpop.eup %3317  ;;  %v2391_v42 = vmul.f32 0.5, %v2379_v2 }
 0x60b   :  { %v2396_v26 = vmul.f32 %v3318_v1, %v2385_v29 }
 0x60c   :  { %3319 = vtanh.f32 %v2391_v42 }
 0x60d   :  { %v4746_v18 = vadd.f32 %v2396_v26, %v2395_v51  ;;  %v2367_v19 = vpop.f32.mrf.mxu2  ;;  %3321 = vtanh.f32 %v2469_v24 }
 0x60f   :  { %3323 = vtanh.f32 %v4746_v18  ;;  %v2418_v13 = vpop.f32.mrf.mxu0 }
 0x610   :  { %v2461_v15 = vadd.f32 %v2418_v13, %v2405_v32 }
 0x612   :  { %v3320_v48 = vpop.eup %3319  ;;  %v2465_v62 = vmul.f32 0.5, %v2461_v15 }
 0x613   :  { %v2393_v3 = vmul.f32 0.5, %v3320_v48  ;;  %v3322_v11 = vpop.eup %3321 }
 0x614   :  { %3325 = vtanh.f32 %v2465_v62  ;;  %v2471_v21 = vmul.f32 0.5, %v3322_v11 }
 0x615   :  { %v3324_v22 = vpop.eup %3323  ;;  %v2394_v25 = vadd.f32 0.5, %v2393_v3  ;;  %v2444_v40 = vpop.f32.mrf.mxu2 }
 0x616   :  { %v2463_v34 = vadd.f32 %v2444_v40, %v2407_v50  ;;  %v2472_v9 = vadd.f32 0.5, %v2471_v21 }
 0x617   :  { %v2399_v31 = vmul.f32 %v3324_v22, %v2394_v25  ;;  %v2420_v16 = vpop.f32.mrf.mxu0 }
 0x618   :  { %3327 = vtanh.f32 %v2463_v34  ;;  %v2478_v41 = vmul.f32 %v2472_v9, %v4645_v10 }
 0x619   :  { %2401 = vst [vmem:[#allocation16 + $0x30] sm:$0xff] %v2399_v31  ;;  %v2484_v44 = vpack.c.bf16 %v2399_v31, %v2399_v31  ;;  %3329 = vtanh.f32 %v2474_v38 }
 0x61a   :  { %v3326_v61 = vpop.eup %3325 }
 0x61b   :  { %v2467_v4 = vmul.f32 0.5, %v3326_v61  ;;  %2506 = vmatmul.bf16.vlgmr.msrb.gmra.mxu1 %v2484_v44  ;;  %2532 = vmatmul.bf16.vlgmr.msrb.gmra.mxu3 %v2484_v44 }
 0x61d   :  { %v2468_v14 = vadd.f32 0.5, %v2467_v4  ;;  %v2446_v17 = vpop.f32.mrf.mxu2 }
 0x61e   :  { %v3328_v30 = vpop.eup %3327 }
 0x61f   :  { %v2479_v43 = vmul.f32 %v3328_v30, %v2468_v14  ;;  %v3330_v63 = vpop.eup %3329 }
 0x620   :  { %v2476_v53 = vmul.f32 0.5, %v3330_v63 }
 0x621   :  { %v2480_v7 = vadd.f32 %v2479_v43, %v2478_v41 }
 0x622   :  { %v2477_v0 = vadd.f32 0.5, %v2476_v53 }
 0x623   :  { %3331 = vtanh.f32 %v2480_v7 }
 0x629   :  { %v3332_v47 = vpop.eup %3331 }
 0x62a   :  { %v2482_v28 = vmul.f32 %v3332_v47, %v2477_v0 }
 0x62b   :  { %2558 = vmatmul.bf16.vlgmr.msra.gmra.mxu1 %v2484_v44  ;;  %2584 = vmatmul.bf16.vlgmr.msra.gmra.mxu3 %v2484_v44 }
 0x62c   :  { %v2483_v8 = vpack.c.bf16 %v2482_v28, %v2482_v28 }
 0x62e   :  { %2493 = vmatmul.bf16.vlgmr.msrb.gmra.mxu0 %v2483_v8  ;;  %2519 = vmatmul.bf16.vlgmr.msrb.gmra.mxu2 %v2483_v8 }
 0x63e   :  { %2545 = vmatmul.bf16.vlgmr.msra.gmra.mxu0 %v2483_v8  ;;  %2571 = vmatmul.bf16.vlgmr.msra.gmra.mxu2 %v2483_v8 }
 0x698   :  { %v2507_v37 = vpop.f32.mrf.mxu1 }
 0x69e   :  { %v2533_v12 = vpop.f32.mrf.mxu3 }
 0x6a0   :  { %v2509_v45 = vpop.f32.mrf.mxu1 }
 0x6a6   :  { %v2535_v58 = vpop.f32.mrf.mxu3 }
 0x6a8   :  { %v2559_v10 = vpop.f32.mrf.mxu1 }
 0x6ab   :  { %v2494_v36 = vpop.f32.mrf.mxu0 }
 0x6ac   :  { %v2495_v20 = vadd.f32 %v2494_v36, %v5481_v55 }
 0x6ae   :  { %v2585_v33 = vpop.f32.mrf.mxu3  ;;  %v2508_v60 = vadd.f32 %v2507_v37, %v2495_v20 }
 0x6b0   :  { %v2561_v46 = vpop.f32.mrf.mxu1  ;;  %v2589_v6 = vmul.f32 0.5, %v2508_v60 }
 0x6b1   :  { %v2520_v39 = vpop.f32.mrf.mxu2 }
 0x6b2   :  { %v2521_v54 = vadd.f32 %v2520_v39, %v5482_v27  ;;  %3333 = vtanh.f32 %v2589_v6 }
 0x6b3   :  { %v2496_v56 = vpop.f32.mrf.mxu0 }
 0x6b4   :  { %v2534_v57 = vadd.f32 %v2533_v12, %v2521_v54 }
 0x6b6   :  { %v2587_v2 = vpop.f32.mrf.mxu3  ;;  %v2593_v29 = vmul.f32 0.5, %v2534_v57 }
 0x6b8   :  { %3335 = vtanh.f32 %v2593_v29  ;;  %v3334_v51 = vpop.eup %3333 }
 0x6b9   :  { %v2522_v1 = vpop.f32.mrf.mxu2  ;;  %v2591_v19 = vmul.f32 0.5, %v3334_v51 }
 0x6bb   :  { %v2546_v24 = vpop.f32.mrf.mxu0  ;;  %v2592_v49 = vadd.f32 0.5, %v2591_v19 }
 0x6bc   :  { %v2547_v42 = vadd.f32 %v2546_v24, %v5483_v35 }
 0x6be   :  { %v3336_v26 = vpop.eup %3335  ;;  %v2560_v55 = vadd.f32 %v2559_v10, %v2547_v42 }
 0x6bf   :  { %v2595_v52 = vmul.f32 0.5, %v3336_v26 }
 0x6c0   :  { %3337 = vtanh.f32 %v2560_v55 }
 0x6c1   :  { %v2572_v32 = vpop.f32.mrf.mxu2  ;;  %v2596_v13 = vadd.f32 0.5, %v2595_v52 }
 0x6c2   :  { %v2573_v27 = vadd.f32 %v2572_v32, %v4070_v5 }
 0x6c3   :  { %v2548_v15 = vpop.f32.mrf.mxu0  ;;  %v2602_v3 = vmul.f32 %v2596_v13, %v4746_v18 }
 0x6c4   :  { %v2586_v48 = vadd.f32 %v2585_v33, %v2573_v27 }
 0x6c6   :  { %v3338_v23 = vpop.eup %3337  ;;  %v2598_v62 = vmul.f32 0.5, %v2586_v48 }
 0x6c7   :  { %v2603_v11 = vmul.f32 %v3338_v23, %v2592_v49 }
 0x6c8   :  { %3339 = vtanh.f32 %v2598_v62 }
 0x6c9   :  { %v2604_v35 = vadd.f32 %v2603_v11, %v2602_v3  ;;  %v2574_v59 = vpop.f32.mrf.mxu2 }
 0x6cb   :  { %3341 = vtanh.f32 %v2604_v35 }
 0x6ce   :  { %v3340_v22 = vpop.eup %3339 }
 0x6cf   :  { %v2600_v25 = vmul.f32 0.5, %v3340_v22 }
 0x6d1   :  { %v3342_v5 = vpop.eup %3341  ;;  %v2601_v50 = vadd.f32 0.5, %v2600_v25 }
 0x6d3   :  { %v2606_v40 = vmul.f32 %v3342_v5, %v2601_v50 }
 0x6d5   :  { %2608 = vst [vmem:[#allocation16 + $0x38] sm:$0xff] %v2606_v40 }
 0x6d6   :  { %2625 = dma.vmem_to_hbm [thread:$0]  %s2618_s23, 1024, %s2620_s26, [#allocation9], %s3506_s27, %s3506_s27, %s3507_s28  }
 0x6d7   :  { %3493 = dma.done.wait [#allocation9], 1024  }
 0x6d8   :  { %3494 = vsyncadd [#allocation9], 4294966272 }
 0x6d9   :  { %2630 = vsyncpa [#allocation8], 1 }
 0x6da   :  { %2631 = vsyncpa [#allocation11], 1 }
 0x6db   :  { %2632 = vsyncpa [#allocation14], 1 }
 0x6dc   :  { %2633 = vsyncpa [#allocation9], 1 }

</bundles_post_ra>
